<compile_context>
chip_gen: v7x
topology: tpu7x:2x2x1
jax: 0.10.0
libtpu: 0.0.40
codegen_flags: <defaults>
</compile_context>

<pallas_src>
import math

import jax
import jax.numpy as jnp
from jax.experimental import pallas as pl
from jax.experimental.pallas import tpu as pltpu

EMB_TOKENS = 30522       # embedding_tokens
EMB_FEATURES = 300       # embedding_features
LSTM_FEATURES = 128      # lstm_features (hidden size)


# --------------------------------------------------------------------------------------
# Fused TextProcessor kernel:
#   in-kernel embedding gather (row DMAs) + tanh + hoisted bf16 input projection
#   + statically-unrolled LSTM recurrence, with weight DMAs overlapped with compute.
# --------------------------------------------------------------------------------------
def text_processor_kernel(q_tok_ref,     # SMEM (bs*T,) int32   -- scalar prefetch
                          emb_hbm,       # HBM  (V, E) f32      -- memory_space=pl.ANY
                          wih_hbm,       # HBM  (E, 4H) bf16    -- memory_space=pl.ANY
                          whh_hbm,       # HBM  (H, 4H) bf16    -- memory_space=pl.ANY
                          b_ref,         # VMEM (1, 4H) f32
                          h_out_ref,     # VMEM (bs, T, H) f32  -- batch_first output
                          x_buf,         # VMEM scratch (bs*T, E) f32
                          wih_buf,       # VMEM scratch (E, 4H) bf16
                          whh_buf,       # VMEM scratch (H, 4H) bf16
                          row_sem,       # DMA sems (bs*T,)
                          w_sem):        # DMA sems (2,)
    bs, T, H = h_out_ref.shape
    N, E = x_buf.shape  # N == bs*T

    # ---- in-kernel embedding gather: one row DMA per token (HBM -> VMEM scratch) ----
    row_copies = []
    for r in range(N):
        cp = pltpu.make_async_copy(
            emb_hbm.at[pl.ds(q_tok_ref[r], 1), :],   # (1, E) row selected by token id
            x_buf.at[pl.ds(r, 1), :],
            row_sem.at[r],
        )
        cp.start()
        row_copies.append(cp)

    # ---- weight DMAs issued up-front; waited right before their first use ----
    wih_cp = pltpu.make_async_copy(wih_hbm, wih_buf, w_sem.at[0])
    whh_cp = pltpu.make_async_copy(whh_hbm, whh_buf, w_sem.at[1])
    wih_cp.start()
    whh_cp.start()

    for cp in row_copies:
        cp.wait()

    # tanh(dropout(embedded)); drop=0.0 => identity. Feed the MXU in bf16, accumulate f32.
    x = jnp.tanh(x_buf[...]).astype(jnp.bfloat16)

    # Hoisted input projection for ALL time steps: one (bs*T, E) x (E, 4H) matmul.
    wih_cp.wait()
    gx = jnp.dot(x, wih_buf[...], preferred_element_type=jnp.float32) + b_ref[...]
    gx = gx.reshape(bs, T, 4 * H)   # layout-preserving split of the sublane dim (T == 8)

    whh_cp.wait()
    whh = whh_buf[...]              # (H, 4H) bf16, stays live across the recurrence

    h = jnp.zeros((bs, H), jnp.float32)
    c = jnp.zeros((bs, H), jnp.float32)

    # Short, statically-unrolled recurrence (state is tiny: 2 x (bs, H) f32).
    # Per-step output stores are kept (they are off the h/c serial dependence chain and
    # lower to simple sublane stores); coalescing them via jnp.stack was considered but
    # kept out for lowering robustness at this size.
    for t in range(T):
        gates = gx[:, t, :] + jnp.dot(h.astype(jnp.bfloat16), whh,
                                      preferred_element_type=jnp.float32)
        i = jax.nn.sigmoid(gates[:, 0 * H:1 * H])   # PyTorch gate order: i, f, g, o
        f = jax.nn.sigmoid(gates[:, 1 * H:2 * H])
        g = jnp.tanh(gates[:, 2 * H:3 * H])
        o = jax.nn.sigmoid(gates[:, 3 * H:4 * H])
        c = f * c + i * g
        h = o * jnp.tanh(c)
        h_out_ref[:, t, :] = h


def text_processor_forward(params, q_tokens, q_mask):
    # q_len = q_mask.sum(dim=1) is computed but unused in the reference forward.
    del q_mask
    emb = params["emb"]              # (V, E)  f32, stays in HBM
    wih = params["w_ih_t"]           # (E, 4H) bf16
    whh = params["w_hh_t"]           # (H, 4H) bf16
    b = params["b_lstm"]             # (1, 4H) f32
    bs, T = q_tokens.shape
    V, E = emb.shape
    H = whh.shape[0]
    N = bs * T

    q_tok_flat = q_tokens.reshape(N).astype(jnp.int32)

    flops = 2 * N * E * 4 * H + 2 * N * H * 4 * H
    transcendentals = N * (E + 6 * H)          # tanh on embeddings + gate sigmoids/tanh
    bytes_accessed = (N * E * 4                # gathered embedding rows
                      + wih.size * 2 + whh.size * 2 + b.size * 4
                      + N * H * 4 + N * 4)

    grid_spec = pltpu.PrefetchScalarGridSpec(
        num_scalar_prefetch=1,                 # q_tokens -> SMEM, drives the gather DMAs
        grid=(1,),                             # single invocation; recurrence is in-kernel
        in_specs=[
            pl.BlockSpec(memory_space=pl.ANY),                 # embedding table (HBM)
            pl.BlockSpec(memory_space=pl.ANY),                 # w_ih^T (manual, overlapped DMA)
            pl.BlockSpec(memory_space=pl.ANY),                 # w_hh^T (manual, overlapped DMA)
            pl.BlockSpec((1, 4 * H), lambda i, tok: (0, 0)),   # bias -> VMEM (tiny)
        ],
        out_specs=pl.BlockSpec((bs, T, H), lambda i, tok: (0, 0, 0)),
        scratch_shapes=[
            pltpu.VMEM((N, E), jnp.float32),          # gathered embeddings
            pltpu.VMEM((E, 4 * H), jnp.bfloat16),     # w_ih^T landing buffer
            pltpu.VMEM((H, 4 * H), jnp.bfloat16),     # w_hh^T landing buffer
            pltpu.SemaphoreType.DMA((N,)),            # one sem per gathered row
            pltpu.SemaphoreType.DMA((2,)),            # w_ih / w_hh copies
        ],
    )

    # NOTE(v7x): a grid-less/1-step kernel runs on one TensorCore; at bs=2 sharding the
    # batch across the second TC is not worth duplicating the weight DMAs.
    return pl.pallas_call(
        text_processor_kernel,
        out_shape=jax.ShapeDtypeStruct((bs, T, H), jnp.float32),
        grid_spec=grid_spec,
        compiler_params=pltpu.CompilerParams(dimension_semantics=("arbitrary",)),
        cost_estimate=pl.CostEstimate(flops=int(flops),
                                      transcendentals=int(transcendentals),
                                      bytes_accessed=int(bytes_accessed)),
    )(q_tok_flat, emb, wih, whh, b)


# --------------------------------------------------------------------------------------
# Parameter init (matches TextProcessor.__init__: xavier per gate chunk, biases zeroed,
# xavier on the full embedding table -- xavier runs AFTER construction, so even the
# padding_idx row carries xavier values in the reference forward).
# LSTM weights are stored in bf16 (fed to the MXU as-is); math stays in f32.
# --------------------------------------------------------------------------------------
def xavier_uniform(key, shape):
    fan_out, fan_in = shape
    bound = math.sqrt(6.0 / (fan_in + fan_out))
    return jax.random.uniform(key, shape, jnp.float32, minval=-bound, maxval=bound)


def init_params(key):
    k_emb, k_ih, k_hh = jax.random.split(key, 3)
    H, E = LSTM_FEATURES, EMB_FEATURES
    emb = xavier_uniform(k_emb, (EMB_TOKENS, E))
    w_ih = jnp.concatenate([xavier_uniform(k, (H, E)) for k in jax.random.split(k_ih, 4)], axis=0)
    w_hh = jnp.concatenate([xavier_uniform(k, (H, H)) for k in jax.random.split(k_hh, 4)], axis=0)
    b = jnp.zeros((1, 4 * H), jnp.float32)          # bias_ih_l0 + bias_hh_l0, both zeroed
    return dict(emb=emb,
                w_ih_t=w_ih.T.astype(jnp.bfloat16),
                w_hh_t=w_hh.T.astype(jnp.bfloat16),
                b_lstm=b)


# --------------------------------------------------------------------------------------
# Pure-JAX reference (f32 math on the same bf16-valued weights) for a sanity check.
# --------------------------------------------------------------------------------------
def text_processor_reference(params, q_tokens, q_mask):
    del q_mask
    H = params["w_hh_t"].shape[0]
    x = jnp.tanh(jnp.take(params["emb"], q_tokens, axis=0))            # (bs, T, E)
    wih_t = params["w_ih_t"].astype(jnp.float32)
    whh_t = params["w_hh_t"].astype(jnp.float32)
    b = params["b_lstm"]

    def step(carry, x_t):
        h, c = carry
        gates = x_t @ wih_t + h @ whh_t + b
        i = jax.nn.sigmoid(gates[:, 0 * H:1 * H])
        f = jax.nn.sigmoid(gates[:, 1 * H:2 * H])
        g = jnp.tanh(gates[:, 2 * H:3 * H])
        o = jax.nn.sigmoid(gates[:, 3 * H:4 * H])
        c = f * c + i * g
        h = o * jnp.tanh(c)
        return (h, c), h

    bs = q_tokens.shape[0]
    h0 = jnp.zeros((bs, H), jnp.float32)
    (_, _), hs = jax.lax.scan(step, (h0, h0), jnp.transpose(x, (1, 0, 2)))
    return jnp.transpose(hs, (1, 0, 2))                                 # (bs, T, H)


if __name__ == "__main__":
    key = jax.random.PRNGKey(0)
    k_params, k_tok = jax.random.split(key)
    params = init_params(k_params)

    bs, T = 2, 8
    q_tokens = jax.random.randint(k_tok, (bs, T), 0, EMB_TOKENS, dtype=jnp.int32)
    q_mask = jnp.array([[1.0] * 8,
                        [1.0] * 5 + [0.0] * 3], dtype=jnp.float32)

    h = jax.block_until_ready(text_processor_forward(params, q_tokens, q_mask))
    assert h.shape == (bs, T, LSTM_FEATURES) and h.dtype == jnp.float32
    assert bool(jnp.all(jnp.isfinite(h)))

    h_ref = jax.block_until_ready(text_processor_reference(params, q_tokens, q_mask))
    max_err = float(jnp.max(jnp.abs(h - h_ref)))
    assert max_err < 5e-2, f"mismatch vs reference: {max_err}"

    print("KERNEL_OK")
</pallas_src>

<mosaic_0001>
module attributes {stable_mosaic.version = 11 : i64} {
  func.func @text_processor_kernel(%arg0: i32, %arg1: memref<16xi32, #tpu.memory_space<smem>>, %arg2: memref<30522x300xf32, #tpu.memory_space<any>>, %arg3: memref<300x512xbf16, #tpu.memory_space<any>>, %arg4: memref<128x512xbf16, #tpu.memory_space<any>>, %arg5: memref<1x512xf32, #tpu.memory_space<vmem>>, %arg6: memref<2x8x128xf32, #tpu.memory_space<vmem>>, %arg7: memref<16x300xf32, #tpu.memory_space<vmem>>, %arg8: memref<300x512xbf16, #tpu.memory_space<vmem>>, %arg9: memref<128x512xbf16, #tpu.memory_space<vmem>>, %arg10: memref<16x!tpu.dma_semaphore, #tpu.memory_space<semaphore_mem>>, %arg11: memref<2x!tpu.dma_semaphore, #tpu.memory_space<semaphore_mem>>) attributes {dimension_semantics = [#tpu.dimension_semantics<arbitrary>], iteration_bounds = array<i64: 1>, scalar_prefetch = 1 : i64, scratch_operands = 5 : i64, tpu.core_type = #tpu.core_type<tc>, window_params = [{}, {}, {}, {pipeline_mode = #tpu.pipeline_mode<synchronous>, transform_indices = @transform_3, window_bounds = array<i64: 1, 512>}, {pipeline_mode = #tpu.pipeline_mode<synchronous>, transform_indices = @transform_4, window_bounds = array<i64: 2, 8, 128>}]} {
    %c0 = arith.constant 0 : index
    %0 = memref.load %arg1[%c0] : memref<16xi32, #tpu.memory_space<smem>>
    %c0_i32 = arith.constant 0 : i32
    %c0_i32_0 = arith.constant 0 : i32
    %1 = tpu.memref_slice %arg2[%0, %c0_i32_0] : memref<30522x300xf32, #tpu.memory_space<any>> -> memref<1x300xf32, #tpu.memory_space<any>>
    %c0_i32_1 = arith.constant 0 : i32
    %c0_i32_2 = arith.constant 0 : i32
    %2 = tpu.memref_slice %arg7[%c0_i32_1, %c0_i32_2] : memref<16x300xf32, #tpu.memory_space<vmem>> -> memref<1x300xf32, #tpu.memory_space<vmem>>
    %3 = tpu.memref_slice %arg10[%c0_i32] : memref<16x!tpu.dma_semaphore, #tpu.memory_space<semaphore_mem>> -> memref<1x!tpu.dma_semaphore, #tpu.memory_space<semaphore_mem>>
    %4 = tpu.memref_squeeze %3 : memref<1x!tpu.dma_semaphore, #tpu.memory_space<semaphore_mem>> -> memref<!tpu.dma_semaphore, #tpu.memory_space<semaphore_mem>>
    tpu.enqueue_dma source(%1 : memref<1x300xf32, #tpu.memory_space<any>>) target(%2 : memref<1x300xf32, #tpu.memory_space<vmem>>) target_semaphore(%4 : memref<!tpu.dma_semaphore, #tpu.memory_space<semaphore_mem>>)
    %c1 = arith.constant 1 : index
    %5 = memref.load %arg1[%c1] : memref<16xi32, #tpu.memory_space<smem>>
    %c1_i32 = arith.constant 1 : i32
    %c0_i32_3 = arith.constant 0 : i32
    %6 = tpu.memref_slice %arg2[%5, %c0_i32_3] : memref<30522x300xf32, #tpu.memory_space<any>> -> memref<1x300xf32, #tpu.memory_space<any>>
    %c1_i32_4 = arith.constant 1 : i32
    %c0_i32_5 = arith.constant 0 : i32
    %7 = tpu.memref_slice %arg7[%c1_i32_4, %c0_i32_5] : memref<16x300xf32, #tpu.memory_space<vmem>> -> memref<1x300xf32, #tpu.memory_space<vmem>>
    %8 = tpu.memref_slice %arg10[%c1_i32] : memref<16x!tpu.dma_semaphore, #tpu.memory_space<semaphore_mem>> -> memref<1x!tpu.dma_semaphore, #tpu.memory_space<semaphore_mem>>
    %9 = tpu.memref_squeeze %8 : memref<1x!tpu.dma_semaphore, #tpu.memory_space<semaphore_mem>> -> memref<!tpu.dma_semaphore, #tpu.memory_space<semaphore_mem>>
    tpu.enqueue_dma source(%6 : memref<1x300xf32, #tpu.memory_space<any>>) target(%7 : memref<1x300xf32, #tpu.memory_space<vmem>>) target_semaphore(%9 : memref<!tpu.dma_semaphore, #tpu.memory_space<semaphore_mem>>)
    %c2 = arith.constant 2 : index
    %10 = memref.load %arg1[%c2] : memref<16xi32, #tpu.memory_space<smem>>
    %c2_i32 = arith.constant 2 : i32
    %c0_i32_6 = arith.constant 0 : i32
    %11 = tpu.memref_slice %arg2[%10, %c0_i32_6] : memref<30522x300xf32, #tpu.memory_space<any>> -> memref<1x300xf32, #tpu.memory_space<any>>
    %c2_i32_7 = arith.constant 2 : i32
    %c0_i32_8 = arith.constant 0 : i32
    %12 = tpu.memref_slice %arg7[%c2_i32_7, %c0_i32_8] : memref<16x300xf32, #tpu.memory_space<vmem>> -> memref<1x300xf32, #tpu.memory_space<vmem>>
    %13 = tpu.memref_slice %arg10[%c2_i32] : memref<16x!tpu.dma_semaphore, #tpu.memory_space<semaphore_mem>> -> memref<1x!tpu.dma_semaphore, #tpu.memory_space<semaphore_mem>>
    %14 = tpu.memref_squeeze %13 : memref<1x!tpu.dma_semaphore, #tpu.memory_space<semaphore_mem>> -> memref<!tpu.dma_semaphore, #tpu.memory_space<semaphore_mem>>
    tpu.enqueue_dma source(%11 : memref<1x300xf32, #tpu.memory_space<any>>) target(%12 : memref<1x300xf32, #tpu.memory_space<vmem>>) target_semaphore(%14 : memref<!tpu.dma_semaphore, #tpu.memory_space<semaphore_mem>>)
    %c3 = arith.constant 3 : index
    %15 = memref.load %arg1[%c3] : memref<16xi32, #tpu.memory_space<smem>>
    %c3_i32 = arith.constant 3 : i32
    %c0_i32_9 = arith.constant 0 : i32
    %16 = tpu.memref_slice %arg2[%15, %c0_i32_9] : memref<30522x300xf32, #tpu.memory_space<any>> -> memref<1x300xf32, #tpu.memory_space<any>>
    %c3_i32_10 = arith.constant 3 : i32
    %c0_i32_11 = arith.constant 0 : i32
    %17 = tpu.memref_slice %arg7[%c3_i32_10, %c0_i32_11] : memref<16x300xf32, #tpu.memory_space<vmem>> -> memref<1x300xf32, #tpu.memory_space<vmem>>
    %18 = tpu.memref_slice %arg10[%c3_i32] : memref<16x!tpu.dma_semaphore, #tpu.memory_space<semaphore_mem>> -> memref<1x!tpu.dma_semaphore, #tpu.memory_space<semaphore_mem>>
    %19 = tpu.memref_squeeze %18 : memref<1x!tpu.dma_semaphore, #tpu.memory_space<semaphore_mem>> -> memref<!tpu.dma_semaphore, #tpu.memory_space<semaphore_mem>>
    tpu.enqueue_dma source(%16 : memref<1x300xf32, #tpu.memory_space<any>>) target(%17 : memref<1x300xf32, #tpu.memory_space<vmem>>) target_semaphore(%19 : memref<!tpu.dma_semaphore, #tpu.memory_space<semaphore_mem>>)
    %c4 = arith.constant 4 : index
    %20 = memref.load %arg1[%c4] : memref<16xi32, #tpu.memory_space<smem>>
    %c4_i32 = arith.constant 4 : i32
    %c0_i32_12 = arith.constant 0 : i32
    %21 = tpu.memref_slice %arg2[%20, %c0_i32_12] : memref<30522x300xf32, #tpu.memory_space<any>> -> memref<1x300xf32, #tpu.memory_space<any>>
    %c4_i32_13 = arith.constant 4 : i32
    %c0_i32_14 = arith.constant 0 : i32
    %22 = tpu.memref_slice %arg7[%c4_i32_13, %c0_i32_14] : memref<16x300xf32, #tpu.memory_space<vmem>> -> memref<1x300xf32, #tpu.memory_space<vmem>>
    %23 = tpu.memref_slice %arg10[%c4_i32] : memref<16x!tpu.dma_semaphore, #tpu.memory_space<semaphore_mem>> -> memref<1x!tpu.dma_semaphore, #tpu.memory_space<semaphore_mem>>
    %24 = tpu.memref_squeeze %23 : memref<1x!tpu.dma_semaphore, #tpu.memory_space<semaphore_mem>> -> memref<!tpu.dma_semaphore, #tpu.memory_space<semaphore_mem>>
    tpu.enqueue_dma source(%21 : memref<1x300xf32, #tpu.memory_space<any>>) target(%22 : memref<1x300xf32, #tpu.memory_space<vmem>>) target_semaphore(%24 : memref<!tpu.dma_semaphore, #tpu.memory_space<semaphore_mem>>)
    %c5 = arith.constant 5 : index
    %25 = memref.load %arg1[%c5] : memref<16xi32, #tpu.memory_space<smem>>
    %c5_i32 = arith.constant 5 : i32
    %c0_i32_15 = arith.constant 0 : i32
    %26 = tpu.memref_slice %arg2[%25, %c0_i32_15] : memref<30522x300xf32, #tpu.memory_space<any>> -> memref<1x300xf32, #tpu.memory_space<any>>
    %c5_i32_16 = arith.constant 5 : i32
    %c0_i32_17 = arith.constant 0 : i32
    %27 = tpu.memref_slice %arg7[%c5_i32_16, %c0_i32_17] : memref<16x300xf32, #tpu.memory_space<vmem>> -> memref<1x300xf32, #tpu.memory_space<vmem>>
    %28 = tpu.memref_slice %arg10[%c5_i32] : memref<16x!tpu.dma_semaphore, #tpu.memory_space<semaphore_mem>> -> memref<1x!tpu.dma_semaphore, #tpu.memory_space<semaphore_mem>>
    %29 = tpu.memref_squeeze %28 : memref<1x!tpu.dma_semaphore, #tpu.memory_space<semaphore_mem>> -> memref<!tpu.dma_semaphore, #tpu.memory_space<semaphore_mem>>
    tpu.enqueue_dma source(%26 : memref<1x300xf32, #tpu.memory_space<any>>) target(%27 : memref<1x300xf32, #tpu.memory_space<vmem>>) target_semaphore(%29 : memref<!tpu.dma_semaphore, #tpu.memory_space<semaphore_mem>>)
    %c6 = arith.constant 6 : index
    %30 = memref.load %arg1[%c6] : memref<16xi32, #tpu.memory_space<smem>>
    %c6_i32 = arith.constant 6 : i32
    %c0_i32_18 = arith.constant 0 : i32
    %31 = tpu.memref_slice %arg2[%30, %c0_i32_18] : memref<30522x300xf32, #tpu.memory_space<any>> -> memref<1x300xf32, #tpu.memory_space<any>>
    %c6_i32_19 = arith.constant 6 : i32
    %c0_i32_20 = arith.constant 0 : i32
    %32 = tpu.memref_slice %arg7[%c6_i32_19, %c0_i32_20] : memref<16x300xf32, #tpu.memory_space<vmem>> -> memref<1x300xf32, #tpu.memory_space<vmem>>
    %33 = tpu.memref_slice %arg10[%c6_i32] : memref<16x!tpu.dma_semaphore, #tpu.memory_space<semaphore_mem>> -> memref<1x!tpu.dma_semaphore, #tpu.memory_space<semaphore_mem>>
    %34 = tpu.memref_squeeze %33 : memref<1x!tpu.dma_semaphore, #tpu.memory_space<semaphore_mem>> -> memref<!tpu.dma_semaphore, #tpu.memory_space<semaphore_mem>>
    tpu.enqueue_dma source(%31 : memref<1x300xf32, #tpu.memory_space<any>>) target(%32 : memref<1x300xf32, #tpu.memory_space<vmem>>) target_semaphore(%34 : memref<!tpu.dma_semaphore, #tpu.memory_space<semaphore_mem>>)
    %c7 = arith.constant 7 : index
    %35 = memref.load %arg1[%c7] : memref<16xi32, #tpu.memory_space<smem>>
    %c7_i32 = arith.constant 7 : i32
    %c0_i32_21 = arith.constant 0 : i32
    %36 = tpu.memref_slice %arg2[%35, %c0_i32_21] : memref<30522x300xf32, #tpu.memory_space<any>> -> memref<1x300xf32, #tpu.memory_space<any>>
    %c7_i32_22 = arith.constant 7 : i32
    %c0_i32_23 = arith.constant 0 : i32
    %37 = tpu.memref_slice %arg7[%c7_i32_22, %c0_i32_23] : memref<16x300xf32, #tpu.memory_space<vmem>> -> memref<1x300xf32, #tpu.memory_space<vmem>>
    %38 = tpu.memref_slice %arg10[%c7_i32] : memref<16x!tpu.dma_semaphore, #tpu.memory_space<semaphore_mem>> -> memref<1x!tpu.dma_semaphore, #tpu.memory_space<semaphore_mem>>
    %39 = tpu.memref_squeeze %38 : memref<1x!tpu.dma_semaphore, #tpu.memory_space<semaphore_mem>> -> memref<!tpu.dma_semaphore, #tpu.memory_space<semaphore_mem>>
    tpu.enqueue_dma source(%36 : memref<1x300xf32, #tpu.memory_space<any>>) target(%37 : memref<1x300xf32, #tpu.memory_space<vmem>>) target_semaphore(%39 : memref<!tpu.dma_semaphore, #tpu.memory_space<semaphore_mem>>)
    %c8 = arith.constant 8 : index
    %40 = memref.load %arg1[%c8] : memref<16xi32, #tpu.memory_space<smem>>
    %c8_i32 = arith.constant 8 : i32
    %c0_i32_24 = arith.constant 0 : i32
    %41 = tpu.memref_slice %arg2[%40, %c0_i32_24] : memref<30522x300xf32, #tpu.memory_space<any>> -> memref<1x300xf32, #tpu.memory_space<any>>
    %c8_i32_25 = arith.constant 8 : i32
    %c0_i32_26 = arith.constant 0 : i32
    %42 = tpu.memref_slice %arg7[%c8_i32_25, %c0_i32_26] : memref<16x300xf32, #tpu.memory_space<vmem>> -> memref<1x300xf32, #tpu.memory_space<vmem>>
    %43 = tpu.memref_slice %arg10[%c8_i32] : memref<16x!tpu.dma_semaphore, #tpu.memory_space<semaphore_mem>> -> memref<1x!tpu.dma_semaphore, #tpu.memory_space<semaphore_mem>>
    %44 = tpu.memref_squeeze %43 : memref<1x!tpu.dma_semaphore, #tpu.memory_space<semaphore_mem>> -> memref<!tpu.dma_semaphore, #tpu.memory_space<semaphore_mem>>
    tpu.enqueue_dma source(%41 : memref<1x300xf32, #tpu.memory_space<any>>) target(%42 : memref<1x300xf32, #tpu.memory_space<vmem>>) target_semaphore(%44 : memref<!tpu.dma_semaphore, #tpu.memory_space<semaphore_mem>>)
    %c9 = arith.constant 9 : index
    %45 = memref.load %arg1[%c9] : memref<16xi32, #tpu.memory_space<smem>>
    %c9_i32 = arith.constant 9 : i32
    %c0_i32_27 = arith.constant 0 : i32
    %46 = tpu.memref_slice %arg2[%45, %c0_i32_27] : memref<30522x300xf32, #tpu.memory_space<any>> -> memref<1x300xf32, #tpu.memory_space<any>>
    %c9_i32_28 = arith.constant 9 : i32
    %c0_i32_29 = arith.constant 0 : i32
    %47 = tpu.memref_slice %arg7[%c9_i32_28, %c0_i32_29] : memref<16x300xf32, #tpu.memory_space<vmem>> -> memref<1x300xf32, #tpu.memory_space<vmem>>
    %48 = tpu.memref_slice %arg10[%c9_i32] : memref<16x!tpu.dma_semaphore, #tpu.memory_space<semaphore_mem>> -> memref<1x!tpu.dma_semaphore, #tpu.memory_space<semaphore_mem>>
    %49 = tpu.memref_squeeze %48 : memref<1x!tpu.dma_semaphore, #tpu.memory_space<semaphore_mem>> -> memref<!tpu.dma_semaphore, #tpu.memory_space<semaphore_mem>>
    tpu.enqueue_dma source(%46 : memref<1x300xf32, #tpu.memory_space<any>>) target(%47 : memref<1x300xf32, #tpu.memory_space<vmem>>) target_semaphore(%49 : memref<!tpu.dma_semaphore, #tpu.memory_space<semaphore_mem>>)
    %c10 = arith.constant 10 : index
    %50 = memref.load %arg1[%c10] : memref<16xi32, #tpu.memory_space<smem>>
    %c10_i32 = arith.constant 10 : i32
    %c0_i32_30 = arith.constant 0 : i32
    %51 = tpu.memref_slice %arg2[%50, %c0_i32_30] : memref<30522x300xf32, #tpu.memory_space<any>> -> memref<1x300xf32, #tpu.memory_space<any>>
    %c10_i32_31 = arith.constant 10 : i32
    %c0_i32_32 = arith.constant 0 : i32
    %52 = tpu.memref_slice %arg7[%c10_i32_31, %c0_i32_32] : memref<16x300xf32, #tpu.memory_space<vmem>> -> memref<1x300xf32, #tpu.memory_space<vmem>>
    %53 = tpu.memref_slice %arg10[%c10_i32] : memref<16x!tpu.dma_semaphore, #tpu.memory_space<semaphore_mem>> -> memref<1x!tpu.dma_semaphore, #tpu.memory_space<semaphore_mem>>
    %54 = tpu.memref_squeeze %53 : memref<1x!tpu.dma_semaphore, #tpu.memory_space<semaphore_mem>> -> memref<!tpu.dma_semaphore, #tpu.memory_space<semaphore_mem>>
    tpu.enqueue_dma source(%51 : memref<1x300xf32, #tpu.memory_space<any>>) target(%52 : memref<1x300xf32, #tpu.memory_space<vmem>>) target_semaphore(%54 : memref<!tpu.dma_semaphore, #tpu.memory_space<semaphore_mem>>)
    %c11 = arith.constant 11 : index
    %55 = memref.load %arg1[%c11] : memref<16xi32, #tpu.memory_space<smem>>
    %c11_i32 = arith.constant 11 : i32
    %c0_i32_33 = arith.constant 0 : i32
    %56 = tpu.memref_slice %arg2[%55, %c0_i32_33] : memref<30522x300xf32, #tpu.memory_space<any>> -> memref<1x300xf32, #tpu.memory_space<any>>
    %c11_i32_34 = arith.constant 11 : i32
    %c0_i32_35 = arith.constant 0 : i32
    %57 = tpu.memref_slice %arg7[%c11_i32_34, %c0_i32_35] : memref<16x300xf32, #tpu.memory_space<vmem>> -> memref<1x300xf32, #tpu.memory_space<vmem>>
    %58 = tpu.memref_slice %arg10[%c11_i32] : memref<16x!tpu.dma_semaphore, #tpu.memory_space<semaphore_mem>> -> memref<1x!tpu.dma_semaphore, #tpu.memory_space<semaphore_mem>>
    %59 = tpu.memref_squeeze %58 : memref<1x!tpu.dma_semaphore, #tpu.memory_space<semaphore_mem>> -> memref<!tpu.dma_semaphore, #tpu.memory_space<semaphore_mem>>
    tpu.enqueue_dma source(%56 : memref<1x300xf32, #tpu.memory_space<any>>) target(%57 : memref<1x300xf32, #tpu.memory_space<vmem>>) target_semaphore(%59 : memref<!tpu.dma_semaphore, #tpu.memory_space<semaphore_mem>>)
    %c12 = arith.constant 12 : index
    %60 = memref.load %arg1[%c12] : memref<16xi32, #tpu.memory_space<smem>>
    %c12_i32 = arith.constant 12 : i32
    %c0_i32_36 = arith.constant 0 : i32
    %61 = tpu.memref_slice %arg2[%60, %c0_i32_36] : memref<30522x300xf32, #tpu.memory_space<any>> -> memref<1x300xf32, #tpu.memory_space<any>>
    %c12_i32_37 = arith.constant 12 : i32
    %c0_i32_38 = arith.constant 0 : i32
    %62 = tpu.memref_slice %arg7[%c12_i32_37, %c0_i32_38] : memref<16x300xf32, #tpu.memory_space<vmem>> -> memref<1x300xf32, #tpu.memory_space<vmem>>
    %63 = tpu.memref_slice %arg10[%c12_i32] : memref<16x!tpu.dma_semaphore, #tpu.memory_space<semaphore_mem>> -> memref<1x!tpu.dma_semaphore, #tpu.memory_space<semaphore_mem>>
    %64 = tpu.memref_squeeze %63 : memref<1x!tpu.dma_semaphore, #tpu.memory_space<semaphore_mem>> -> memref<!tpu.dma_semaphore, #tpu.memory_space<semaphore_mem>>
    tpu.enqueue_dma source(%61 : memref<1x300xf32, #tpu.memory_space<any>>) target(%62 : memref<1x300xf32, #tpu.memory_space<vmem>>) target_semaphore(%64 : memref<!tpu.dma_semaphore, #tpu.memory_space<semaphore_mem>>)
    %c13 = arith.constant 13 : index
    %65 = memref.load %arg1[%c13] : memref<16xi32, #tpu.memory_space<smem>>
    %c13_i32 = arith.constant 13 : i32
    %c0_i32_39 = arith.constant 0 : i32
    %66 = tpu.memref_slice %arg2[%65, %c0_i32_39] : memref<30522x300xf32, #tpu.memory_space<any>> -> memref<1x300xf32, #tpu.memory_space<any>>
    %c13_i32_40 = arith.constant 13 : i32
    %c0_i32_41 = arith.constant 0 : i32
    %67 = tpu.memref_slice %arg7[%c13_i32_40, %c0_i32_41] : memref<16x300xf32, #tpu.memory_space<vmem>> -> memref<1x300xf32, #tpu.memory_space<vmem>>
    %68 = tpu.memref_slice %arg10[%c13_i32] : memref<16x!tpu.dma_semaphore, #tpu.memory_space<semaphore_mem>> -> memref<1x!tpu.dma_semaphore, #tpu.memory_space<semaphore_mem>>
    %69 = tpu.memref_squeeze %68 : memref<1x!tpu.dma_semaphore, #tpu.memory_space<semaphore_mem>> -> memref<!tpu.dma_semaphore, #tpu.memory_space<semaphore_mem>>
    tpu.enqueue_dma source(%66 : memref<1x300xf32, #tpu.memory_space<any>>) target(%67 : memref<1x300xf32, #tpu.memory_space<vmem>>) target_semaphore(%69 : memref<!tpu.dma_semaphore, #tpu.memory_space<semaphore_mem>>)
    %c14 = arith.constant 14 : index
    %70 = memref.load %arg1[%c14] : memref<16xi32, #tpu.memory_space<smem>>
    %c14_i32 = arith.constant 14 : i32
    %c0_i32_42 = arith.constant 0 : i32
    %71 = tpu.memref_slice %arg2[%70, %c0_i32_42] : memref<30522x300xf32, #tpu.memory_space<any>> -> memref<1x300xf32, #tpu.memory_space<any>>
    %c14_i32_43 = arith.constant 14 : i32
    %c0_i32_44 = arith.constant 0 : i32
    %72 = tpu.memref_slice %arg7[%c14_i32_43, %c0_i32_44] : memref<16x300xf32, #tpu.memory_space<vmem>> -> memref<1x300xf32, #tpu.memory_space<vmem>>
    %73 = tpu.memref_slice %arg10[%c14_i32] : memref<16x!tpu.dma_semaphore, #tpu.memory_space<semaphore_mem>> -> memref<1x!tpu.dma_semaphore, #tpu.memory_space<semaphore_mem>>
    %74 = tpu.memref_squeeze %73 : memref<1x!tpu.dma_semaphore, #tpu.memory_space<semaphore_mem>> -> memref<!tpu.dma_semaphore, #tpu.memory_space<semaphore_mem>>
    tpu.enqueue_dma source(%71 : memref<1x300xf32, #tpu.memory_space<any>>) target(%72 : memref<1x300xf32, #tpu.memory_space<vmem>>) target_semaphore(%74 : memref<!tpu.dma_semaphore, #tpu.memory_space<semaphore_mem>>)
    %c15 = arith.constant 15 : index
    %75 = memref.load %arg1[%c15] : memref<16xi32, #tpu.memory_space<smem>>
    %c15_i32 = arith.constant 15 : i32
    %c0_i32_45 = arith.constant 0 : i32
    %76 = tpu.memref_slice %arg2[%75, %c0_i32_45] : memref<30522x300xf32, #tpu.memory_space<any>> -> memref<1x300xf32, #tpu.memory_space<any>>
    %c15_i32_46 = arith.constant 15 : i32
    %c0_i32_47 = arith.constant 0 : i32
    %77 = tpu.memref_slice %arg7[%c15_i32_46, %c0_i32_47] : memref<16x300xf32, #tpu.memory_space<vmem>> -> memref<1x300xf32, #tpu.memory_space<vmem>>
    %78 = tpu.memref_slice %arg10[%c15_i32] : memref<16x!tpu.dma_semaphore, #tpu.memory_space<semaphore_mem>> -> memref<1x!tpu.dma_semaphore, #tpu.memory_space<semaphore_mem>>
    %79 = tpu.memref_squeeze %78 : memref<1x!tpu.dma_semaphore, #tpu.memory_space<semaphore_mem>> -> memref<!tpu.dma_semaphore, #tpu.memory_space<semaphore_mem>>
    tpu.enqueue_dma source(%76 : memref<1x300xf32, #tpu.memory_space<any>>) target(%77 : memref<1x300xf32, #tpu.memory_space<vmem>>) target_semaphore(%79 : memref<!tpu.dma_semaphore, #tpu.memory_space<semaphore_mem>>)
    %c0_i32_48 = arith.constant 0 : i32
    %80 = tpu.memref_slice %arg11[%c0_i32_48] : memref<2x!tpu.dma_semaphore, #tpu.memory_space<semaphore_mem>> -> memref<1x!tpu.dma_semaphore, #tpu.memory_space<semaphore_mem>>
    %81 = tpu.memref_squeeze %80 : memref<1x!tpu.dma_semaphore, #tpu.memory_space<semaphore_mem>> -> memref<!tpu.dma_semaphore, #tpu.memory_space<semaphore_mem>>
    tpu.enqueue_dma source(%arg3 : memref<300x512xbf16, #tpu.memory_space<any>>) target(%arg8 : memref<300x512xbf16, #tpu.memory_space<vmem>>) target_semaphore(%81 : memref<!tpu.dma_semaphore, #tpu.memory_space<semaphore_mem>>)
    %c1_i32_49 = arith.constant 1 : i32
    %82 = tpu.memref_slice %arg11[%c1_i32_49] : memref<2x!tpu.dma_semaphore, #tpu.memory_space<semaphore_mem>> -> memref<1x!tpu.dma_semaphore, #tpu.memory_space<semaphore_mem>>
    %83 = tpu.memref_squeeze %82 : memref<1x!tpu.dma_semaphore, #tpu.memory_space<semaphore_mem>> -> memref<!tpu.dma_semaphore, #tpu.memory_space<semaphore_mem>>
    tpu.enqueue_dma source(%arg4 : memref<128x512xbf16, #tpu.memory_space<any>>) target(%arg9 : memref<128x512xbf16, #tpu.memory_space<vmem>>) target_semaphore(%83 : memref<!tpu.dma_semaphore, #tpu.memory_space<semaphore_mem>>)
    %c0_i32_50 = arith.constant 0 : i32
    %c0_i32_51 = arith.constant 0 : i32
    %84 = tpu.memref_slice %arg2[%0, %c0_i32_51] : memref<30522x300xf32, #tpu.memory_space<any>> -> memref<1x300xf32, #tpu.memory_space<any>>
    %c0_i32_52 = arith.constant 0 : i32
    %c0_i32_53 = arith.constant 0 : i32
    %85 = tpu.memref_slice %arg7[%c0_i32_52, %c0_i32_53] : memref<16x300xf32, #tpu.memory_space<vmem>> -> memref<1x300xf32, #tpu.memory_space<vmem>>
    %86 = tpu.memref_slice %arg10[%c0_i32_50] : memref<16x!tpu.dma_semaphore, #tpu.memory_space<semaphore_mem>> -> memref<1x!tpu.dma_semaphore, #tpu.memory_space<semaphore_mem>>
    %87 = tpu.memref_squeeze %86 : memref<1x!tpu.dma_semaphore, #tpu.memory_space<semaphore_mem>> -> memref<!tpu.dma_semaphore, #tpu.memory_space<semaphore_mem>>
    tpu.wait_dma2 semaphore(%87 : memref<!tpu.dma_semaphore, #tpu.memory_space<semaphore_mem>>) src(%84 : memref<1x300xf32, #tpu.memory_space<any>>) dst(%85 : memref<1x300xf32, #tpu.memory_space<vmem>>)
    %c1_i32_54 = arith.constant 1 : i32
    %c0_i32_55 = arith.constant 0 : i32
    %88 = tpu.memref_slice %arg2[%5, %c0_i32_55] : memref<30522x300xf32, #tpu.memory_space<any>> -> memref<1x300xf32, #tpu.memory_space<any>>
    %c1_i32_56 = arith.constant 1 : i32
    %c0_i32_57 = arith.constant 0 : i32
    %89 = tpu.memref_slice %arg7[%c1_i32_56, %c0_i32_57] : memref<16x300xf32, #tpu.memory_space<vmem>> -> memref<1x300xf32, #tpu.memory_space<vmem>>
    %90 = tpu.memref_slice %arg10[%c1_i32_54] : memref<16x!tpu.dma_semaphore, #tpu.memory_space<semaphore_mem>> -> memref<1x!tpu.dma_semaphore, #tpu.memory_space<semaphore_mem>>
    %91 = tpu.memref_squeeze %90 : memref<1x!tpu.dma_semaphore, #tpu.memory_space<semaphore_mem>> -> memref<!tpu.dma_semaphore, #tpu.memory_space<semaphore_mem>>
    tpu.wait_dma2 semaphore(%91 : memref<!tpu.dma_semaphore, #tpu.memory_space<semaphore_mem>>) src(%88 : memref<1x300xf32, #tpu.memory_space<any>>) dst(%89 : memref<1x300xf32, #tpu.memory_space<vmem>>)
    %c2_i32_58 = arith.constant 2 : i32
    %c0_i32_59 = arith.constant 0 : i32
    %92 = tpu.memref_slice %arg2[%10, %c0_i32_59] : memref<30522x300xf32, #tpu.memory_space<any>> -> memref<1x300xf32, #tpu.memory_space<any>>
    %c2_i32_60 = arith.constant 2 : i32
    %c0_i32_61 = arith.constant 0 : i32
    %93 = tpu.memref_slice %arg7[%c2_i32_60, %c0_i32_61] : memref<16x300xf32, #tpu.memory_space<vmem>> -> memref<1x300xf32, #tpu.memory_space<vmem>>
    %94 = tpu.memref_slice %arg10[%c2_i32_58] : memref<16x!tpu.dma_semaphore, #tpu.memory_space<semaphore_mem>> -> memref<1x!tpu.dma_semaphore, #tpu.memory_space<semaphore_mem>>
    %95 = tpu.memref_squeeze %94 : memref<1x!tpu.dma_semaphore, #tpu.memory_space<semaphore_mem>> -> memref<!tpu.dma_semaphore, #tpu.memory_space<semaphore_mem>>
    tpu.wait_dma2 semaphore(%95 : memref<!tpu.dma_semaphore, #tpu.memory_space<semaphore_mem>>) src(%92 : memref<1x300xf32, #tpu.memory_space<any>>) dst(%93 : memref<1x300xf32, #tpu.memory_space<vmem>>)
    %c3_i32_62 = arith.constant 3 : i32
    %c0_i32_63 = arith.constant 0 : i32
    %96 = tpu.memref_slice %arg2[%15, %c0_i32_63] : memref<30522x300xf32, #tpu.memory_space<any>> -> memref<1x300xf32, #tpu.memory_space<any>>
    %c3_i32_64 = arith.constant 3 : i32
    %c0_i32_65 = arith.constant 0 : i32
    %97 = tpu.memref_slice %arg7[%c3_i32_64, %c0_i32_65] : memref<16x300xf32, #tpu.memory_space<vmem>> -> memref<1x300xf32, #tpu.memory_space<vmem>>
    %98 = tpu.memref_slice %arg10[%c3_i32_62] : memref<16x!tpu.dma_semaphore, #tpu.memory_space<semaphore_mem>> -> memref<1x!tpu.dma_semaphore, #tpu.memory_space<semaphore_mem>>
    %99 = tpu.memref_squeeze %98 : memref<1x!tpu.dma_semaphore, #tpu.memory_space<semaphore_mem>> -> memref<!tpu.dma_semaphore, #tpu.memory_space<semaphore_mem>>
    tpu.wait_dma2 semaphore(%99 : memref<!tpu.dma_semaphore, #tpu.memory_space<semaphore_mem>>) src(%96 : memref<1x300xf32, #tpu.memory_space<any>>) dst(%97 : memref<1x300xf32, #tpu.memory_space<vmem>>)
    %c4_i32_66 = arith.constant 4 : i32
    %c0_i32_67 = arith.constant 0 : i32
    %100 = tpu.memref_slice %arg2[%20, %c0_i32_67] : memref<30522x300xf32, #tpu.memory_space<any>> -> memref<1x300xf32, #tpu.memory_space<any>>
    %c4_i32_68 = arith.constant 4 : i32
    %c0_i32_69 = arith.constant 0 : i32
    %101 = tpu.memref_slice %arg7[%c4_i32_68, %c0_i32_69] : memref<16x300xf32, #tpu.memory_space<vmem>> -> memref<1x300xf32, #tpu.memory_space<vmem>>
    %102 = tpu.memref_slice %arg10[%c4_i32_66] : memref<16x!tpu.dma_semaphore, #tpu.memory_space<semaphore_mem>> -> memref<1x!tpu.dma_semaphore, #tpu.memory_space<semaphore_mem>>
    %103 = tpu.memref_squeeze %102 : memref<1x!tpu.dma_semaphore, #tpu.memory_space<semaphore_mem>> -> memref<!tpu.dma_semaphore, #tpu.memory_space<semaphore_mem>>
    tpu.wait_dma2 semaphore(%103 : memref<!tpu.dma_semaphore, #tpu.memory_space<semaphore_mem>>) src(%100 : memref<1x300xf32, #tpu.memory_space<any>>) dst(%101 : memref<1x300xf32, #tpu.memory_space<vmem>>)
    %c5_i32_70 = arith.constant 5 : i32
    %c0_i32_71 = arith.constant 0 : i32
    %104 = tpu.memref_slice %arg2[%25, %c0_i32_71] : memref<30522x300xf32, #tpu.memory_space<any>> -> memref<1x300xf32, #tpu.memory_space<any>>
    %c5_i32_72 = arith.constant 5 : i32
    %c0_i32_73 = arith.constant 0 : i32
    %105 = tpu.memref_slice %arg7[%c5_i32_72, %c0_i32_73] : memref<16x300xf32, #tpu.memory_space<vmem>> -> memref<1x300xf32, #tpu.memory_space<vmem>>
    %106 = tpu.memref_slice %arg10[%c5_i32_70] : memref<16x!tpu.dma_semaphore, #tpu.memory_space<semaphore_mem>> -> memref<1x!tpu.dma_semaphore, #tpu.memory_space<semaphore_mem>>
    %107 = tpu.memref_squeeze %106 : memref<1x!tpu.dma_semaphore, #tpu.memory_space<semaphore_mem>> -> memref<!tpu.dma_semaphore, #tpu.memory_space<semaphore_mem>>
    tpu.wait_dma2 semaphore(%107 : memref<!tpu.dma_semaphore, #tpu.memory_space<semaphore_mem>>) src(%104 : memref<1x300xf32, #tpu.memory_space<any>>) dst(%105 : memref<1x300xf32, #tpu.memory_space<vmem>>)
    %c6_i32_74 = arith.constant 6 : i32
    %c0_i32_75 = arith.constant 0 : i32
    %108 = tpu.memref_slice %arg2[%30, %c0_i32_75] : memref<30522x300xf32, #tpu.memory_space<any>> -> memref<1x300xf32, #tpu.memory_space<any>>
    %c6_i32_76 = arith.constant 6 : i32
    %c0_i32_77 = arith.constant 0 : i32
    %109 = tpu.memref_slice %arg7[%c6_i32_76, %c0_i32_77] : memref<16x300xf32, #tpu.memory_space<vmem>> -> memref<1x300xf32, #tpu.memory_space<vmem>>
    %110 = tpu.memref_slice %arg10[%c6_i32_74] : memref<16x!tpu.dma_semaphore, #tpu.memory_space<semaphore_mem>> -> memref<1x!tpu.dma_semaphore, #tpu.memory_space<semaphore_mem>>
    %111 = tpu.memref_squeeze %110 : memref<1x!tpu.dma_semaphore, #tpu.memory_space<semaphore_mem>> -> memref<!tpu.dma_semaphore, #tpu.memory_space<semaphore_mem>>
    tpu.wait_dma2 semaphore(%111 : memref<!tpu.dma_semaphore, #tpu.memory_space<semaphore_mem>>) src(%108 : memref<1x300xf32, #tpu.memory_space<any>>) dst(%109 : memref<1x300xf32, #tpu.memory_space<vmem>>)
    %c7_i32_78 = arith.constant 7 : i32
    %c0_i32_79 = arith.constant 0 : i32
    %112 = tpu.memref_slice %arg2[%35, %c0_i32_79] : memref<30522x300xf32, #tpu.memory_space<any>> -> memref<1x300xf32, #tpu.memory_space<any>>
    %c7_i32_80 = arith.constant 7 : i32
    %c0_i32_81 = arith.constant 0 : i32
    %113 = tpu.memref_slice %arg7[%c7_i32_80, %c0_i32_81] : memref<16x300xf32, #tpu.memory_space<vmem>> -> memref<1x300xf32, #tpu.memory_space<vmem>>
    %114 = tpu.memref_slice %arg10[%c7_i32_78] : memref<16x!tpu.dma_semaphore, #tpu.memory_space<semaphore_mem>> -> memref<1x!tpu.dma_semaphore, #tpu.memory_space<semaphore_mem>>
    %115 = tpu.memref_squeeze %114 : memref<1x!tpu.dma_semaphore, #tpu.memory_space<semaphore_mem>> -> memref<!tpu.dma_semaphore, #tpu.memory_space<semaphore_mem>>
    tpu.wait_dma2 semaphore(%115 : memref<!tpu.dma_semaphore, #tpu.memory_space<semaphore_mem>>) src(%112 : memref<1x300xf32, #tpu.memory_space<any>>) dst(%113 : memref<1x300xf32, #tpu.memory_space<vmem>>)
    %c8_i32_82 = arith.constant 8 : i32
    %c0_i32_83 = arith.constant 0 : i32
    %116 = tpu.memref_slice %arg2[%40, %c0_i32_83] : memref<30522x300xf32, #tpu.memory_space<any>> -> memref<1x300xf32, #tpu.memory_space<any>>
    %c8_i32_84 = arith.constant 8 : i32
    %c0_i32_85 = arith.constant 0 : i32
    %117 = tpu.memref_slice %arg7[%c8_i32_84, %c0_i32_85] : memref<16x300xf32, #tpu.memory_space<vmem>> -> memref<1x300xf32, #tpu.memory_space<vmem>>
    %118 = tpu.memref_slice %arg10[%c8_i32_82] : memref<16x!tpu.dma_semaphore, #tpu.memory_space<semaphore_mem>> -> memref<1x!tpu.dma_semaphore, #tpu.memory_space<semaphore_mem>>
    %119 = tpu.memref_squeeze %118 : memref<1x!tpu.dma_semaphore, #tpu.memory_space<semaphore_mem>> -> memref<!tpu.dma_semaphore, #tpu.memory_space<semaphore_mem>>
    tpu.wait_dma2 semaphore(%119 : memref<!tpu.dma_semaphore, #tpu.memory_space<semaphore_mem>>) src(%116 : memref<1x300xf32, #tpu.memory_space<any>>) dst(%117 : memref<1x300xf32, #tpu.memory_space<vmem>>)
    %c9_i32_86 = arith.constant 9 : i32
    %c0_i32_87 = arith.constant 0 : i32
    %120 = tpu.memref_slice %arg2[%45, %c0_i32_87] : memref<30522x300xf32, #tpu.memory_space<any>> -> memref<1x300xf32, #tpu.memory_space<any>>
    %c9_i32_88 = arith.constant 9 : i32
    %c0_i32_89 = arith.constant 0 : i32
    %121 = tpu.memref_slice %arg7[%c9_i32_88, %c0_i32_89] : memref<16x300xf32, #tpu.memory_space<vmem>> -> memref<1x300xf32, #tpu.memory_space<vmem>>
    %122 = tpu.memref_slice %arg10[%c9_i32_86] : memref<16x!tpu.dma_semaphore, #tpu.memory_space<semaphore_mem>> -> memref<1x!tpu.dma_semaphore, #tpu.memory_space<semaphore_mem>>
    %123 = tpu.memref_squeeze %122 : memref<1x!tpu.dma_semaphore, #tpu.memory_space<semaphore_mem>> -> memref<!tpu.dma_semaphore, #tpu.memory_space<semaphore_mem>>
    tpu.wait_dma2 semaphore(%123 : memref<!tpu.dma_semaphore, #tpu.memory_space<semaphore_mem>>) src(%120 : memref<1x300xf32, #tpu.memory_space<any>>) dst(%121 : memref<1x300xf32, #tpu.memory_space<vmem>>)
    %c10_i32_90 = arith.constant 10 : i32
    %c0_i32_91 = arith.constant 0 : i32
    %124 = tpu.memref_slice %arg2[%50, %c0_i32_91] : memref<30522x300xf32, #tpu.memory_space<any>> -> memref<1x300xf32, #tpu.memory_space<any>>
    %c10_i32_92 = arith.constant 10 : i32
    %c0_i32_93 = arith.constant 0 : i32
    %125 = tpu.memref_slice %arg7[%c10_i32_92, %c0_i32_93] : memref<16x300xf32, #tpu.memory_space<vmem>> -> memref<1x300xf32, #tpu.memory_space<vmem>>
    %126 = tpu.memref_slice %arg10[%c10_i32_90] : memref<16x!tpu.dma_semaphore, #tpu.memory_space<semaphore_mem>> -> memref<1x!tpu.dma_semaphore, #tpu.memory_space<semaphore_mem>>
    %127 = tpu.memref_squeeze %126 : memref<1x!tpu.dma_semaphore, #tpu.memory_space<semaphore_mem>> -> memref<!tpu.dma_semaphore, #tpu.memory_space<semaphore_mem>>
    tpu.wait_dma2 semaphore(%127 : memref<!tpu.dma_semaphore, #tpu.memory_space<semaphore_mem>>) src(%124 : memref<1x300xf32, #tpu.memory_space<any>>) dst(%125 : memref<1x300xf32, #tpu.memory_space<vmem>>)
    %c11_i32_94 = arith.constant 11 : i32
    %c0_i32_95 = arith.constant 0 : i32
    %128 = tpu.memref_slice %arg2[%55, %c0_i32_95] : memref<30522x300xf32, #tpu.memory_space<any>> -> memref<1x300xf32, #tpu.memory_space<any>>
    %c11_i32_96 = arith.constant 11 : i32
    %c0_i32_97 = arith.constant 0 : i32
    %129 = tpu.memref_slice %arg7[%c11_i32_96, %c0_i32_97] : memref<16x300xf32, #tpu.memory_space<vmem>> -> memref<1x300xf32, #tpu.memory_space<vmem>>
    %130 = tpu.memref_slice %arg10[%c11_i32_94] : memref<16x!tpu.dma_semaphore, #tpu.memory_space<semaphore_mem>> -> memref<1x!tpu.dma_semaphore, #tpu.memory_space<semaphore_mem>>
    %131 = tpu.memref_squeeze %130 : memref<1x!tpu.dma_semaphore, #tpu.memory_space<semaphore_mem>> -> memref<!tpu.dma_semaphore, #tpu.memory_space<semaphore_mem>>
    tpu.wait_dma2 semaphore(%131 : memref<!tpu.dma_semaphore, #tpu.memory_space<semaphore_mem>>) src(%128 : memref<1x300xf32, #tpu.memory_space<any>>) dst(%129 : memref<1x300xf32, #tpu.memory_space<vmem>>)
    %c12_i32_98 = arith.constant 12 : i32
    %c0_i32_99 = arith.constant 0 : i32
    %132 = tpu.memref_slice %arg2[%60, %c0_i32_99] : memref<30522x300xf32, #tpu.memory_space<any>> -> memref<1x300xf32, #tpu.memory_space<any>>
    %c12_i32_100 = arith.constant 12 : i32
    %c0_i32_101 = arith.constant 0 : i32
    %133 = tpu.memref_slice %arg7[%c12_i32_100, %c0_i32_101] : memref<16x300xf32, #tpu.memory_space<vmem>> -> memref<1x300xf32, #tpu.memory_space<vmem>>
    %134 = tpu.memref_slice %arg10[%c12_i32_98] : memref<16x!tpu.dma_semaphore, #tpu.memory_space<semaphore_mem>> -> memref<1x!tpu.dma_semaphore, #tpu.memory_space<semaphore_mem>>
    %135 = tpu.memref_squeeze %134 : memref<1x!tpu.dma_semaphore, #tpu.memory_space<semaphore_mem>> -> memref<!tpu.dma_semaphore, #tpu.memory_space<semaphore_mem>>
    tpu.wait_dma2 semaphore(%135 : memref<!tpu.dma_semaphore, #tpu.memory_space<semaphore_mem>>) src(%132 : memref<1x300xf32, #tpu.memory_space<any>>) dst(%133 : memref<1x300xf32, #tpu.memory_space<vmem>>)
    %c13_i32_102 = arith.constant 13 : i32
    %c0_i32_103 = arith.constant 0 : i32
    %136 = tpu.memref_slice %arg2[%65, %c0_i32_103] : memref<30522x300xf32, #tpu.memory_space<any>> -> memref<1x300xf32, #tpu.memory_space<any>>
    %c13_i32_104 = arith.constant 13 : i32
    %c0_i32_105 = arith.constant 0 : i32
    %137 = tpu.memref_slice %arg7[%c13_i32_104, %c0_i32_105] : memref<16x300xf32, #tpu.memory_space<vmem>> -> memref<1x300xf32, #tpu.memory_space<vmem>>
    %138 = tpu.memref_slice %arg10[%c13_i32_102] : memref<16x!tpu.dma_semaphore, #tpu.memory_space<semaphore_mem>> -> memref<1x!tpu.dma_semaphore, #tpu.memory_space<semaphore_mem>>
    %139 = tpu.memref_squeeze %138 : memref<1x!tpu.dma_semaphore, #tpu.memory_space<semaphore_mem>> -> memref<!tpu.dma_semaphore, #tpu.memory_space<semaphore_mem>>
    tpu.wait_dma2 semaphore(%139 : memref<!tpu.dma_semaphore, #tpu.memory_space<semaphore_mem>>) src(%136 : memref<1x300xf32, #tpu.memory_space<any>>) dst(%137 : memref<1x300xf32, #tpu.memory_space<vmem>>)
    %c14_i32_106 = arith.constant 14 : i32
    %c0_i32_107 = arith.constant 0 : i32
    %140 = tpu.memref_slice %arg2[%70, %c0_i32_107] : memref<30522x300xf32, #tpu.memory_space<any>> -> memref<1x300xf32, #tpu.memory_space<any>>
    %c14_i32_108 = arith.constant 14 : i32
    %c0_i32_109 = arith.constant 0 : i32
    %141 = tpu.memref_slice %arg7[%c14_i32_108, %c0_i32_109] : memref<16x300xf32, #tpu.memory_space<vmem>> -> memref<1x300xf32, #tpu.memory_space<vmem>>
    %142 = tpu.memref_slice %arg10[%c14_i32_106] : memref<16x!tpu.dma_semaphore, #tpu.memory_space<semaphore_mem>> -> memref<1x!tpu.dma_semaphore, #tpu.memory_space<semaphore_mem>>
    %143 = tpu.memref_squeeze %142 : memref<1x!tpu.dma_semaphore, #tpu.memory_space<semaphore_mem>> -> memref<!tpu.dma_semaphore, #tpu.memory_space<semaphore_mem>>
    tpu.wait_dma2 semaphore(%143 : memref<!tpu.dma_semaphore, #tpu.memory_space<semaphore_mem>>) src(%140 : memref<1x300xf32, #tpu.memory_space<any>>) dst(%141 : memref<1x300xf32, #tpu.memory_space<vmem>>)
    %c15_i32_110 = arith.constant 15 : i32
    %c0_i32_111 = arith.constant 0 : i32
    %144 = tpu.memref_slice %arg2[%75, %c0_i32_111] : memref<30522x300xf32, #tpu.memory_space<any>> -> memref<1x300xf32, #tpu.memory_space<any>>
    %c15_i32_112 = arith.constant 15 : i32
    %c0_i32_113 = arith.constant 0 : i32
    %145 = tpu.memref_slice %arg7[%c15_i32_112, %c0_i32_113] : memref<16x300xf32, #tpu.memory_space<vmem>> -> memref<1x300xf32, #tpu.memory_space<vmem>>
    %146 = tpu.memref_slice %arg10[%c15_i32_110] : memref<16x!tpu.dma_semaphore, #tpu.memory_space<semaphore_mem>> -> memref<1x!tpu.dma_semaphore, #tpu.memory_space<semaphore_mem>>
    %147 = tpu.memref_squeeze %146 : memref<1x!tpu.dma_semaphore, #tpu.memory_space<semaphore_mem>> -> memref<!tpu.dma_semaphore, #tpu.memory_space<semaphore_mem>>
    tpu.wait_dma2 semaphore(%147 : memref<!tpu.dma_semaphore, #tpu.memory_space<semaphore_mem>>) src(%144 : memref<1x300xf32, #tpu.memory_space<any>>) dst(%145 : memref<1x300xf32, #tpu.memory_space<vmem>>)
    %c0_114 = arith.constant 0 : index
    %c0_115 = arith.constant 0 : index
    %148 = vector.load %arg7[%c0_114, %c0_115] : memref<16x300xf32, #tpu.memory_space<vmem>>, vector<16x300xf32>
    %149 = math.tanh %148 : vector<16x300xf32>
    %150 = arith.truncf %149 : vector<16x300xf32> to vector<16x300xbf16>
    %c0_i32_116 = arith.constant 0 : i32
    %151 = tpu.memref_slice %arg11[%c0_i32_116] : memref<2x!tpu.dma_semaphore, #tpu.memory_space<semaphore_mem>> -> memref<1x!tpu.dma_semaphore, #tpu.memory_space<semaphore_mem>>
    %152 = tpu.memref_squeeze %151 : memref<1x!tpu.dma_semaphore, #tpu.memory_space<semaphore_mem>> -> memref<!tpu.dma_semaphore, #tpu.memory_space<semaphore_mem>>
    tpu.wait_dma2 semaphore(%152 : memref<!tpu.dma_semaphore, #tpu.memory_space<semaphore_mem>>) src(%arg3 : memref<300x512xbf16, #tpu.memory_space<any>>) dst(%arg8 : memref<300x512xbf16, #tpu.memory_space<vmem>>)
    %c0_117 = arith.constant 0 : index
    %c0_118 = arith.constant 0 : index
    %153 = vector.load %arg8[%c0_117, %c0_118] : memref<300x512xbf16, #tpu.memory_space<vmem>>, vector<300x512xbf16>
    %cst = arith.constant dense<0.000000e+00> : vector<16x512xf32>
    %154 = tpu.matmul %150, %153, %cst {dimension_numbers = #tpu.dot_dimension_numbers<[1], [0], [0], [1], [0, 0, 1, 1], [], []>} : vector<16x300xbf16>, vector<300x512xbf16>, vector<16x512xf32> -> vector<16x512xf32>
    %c0_119 = arith.constant 0 : index
    %c0_120 = arith.constant 0 : index
    %155 = vector.load %arg5[%c0_119, %c0_120] : memref<1x512xf32, #tpu.memory_space<vmem>>, vector<1x512xf32>
    %156 = vector.broadcast %155 : vector<1x512xf32> to vector<16x512xf32>
    %157 = arith.addf %154, %156 : vector<16x512xf32>
    %158 = vector.shape_cast %157 : vector<16x512xf32> to vector<2x8x512xf32>
    %c1_i32_121 = arith.constant 1 : i32
    %159 = tpu.memref_slice %arg11[%c1_i32_121] : memref<2x!tpu.dma_semaphore, #tpu.memory_space<semaphore_mem>> -> memref<1x!tpu.dma_semaphore, #tpu.memory_space<semaphore_mem>>
    %160 = tpu.memref_squeeze %159 : memref<1x!tpu.dma_semaphore, #tpu.memory_space<semaphore_mem>> -> memref<!tpu.dma_semaphore, #tpu.memory_space<semaphore_mem>>
    tpu.wait_dma2 semaphore(%160 : memref<!tpu.dma_semaphore, #tpu.memory_space<semaphore_mem>>) src(%arg4 : memref<128x512xbf16, #tpu.memory_space<any>>) dst(%arg9 : memref<128x512xbf16, #tpu.memory_space<vmem>>)
    %c0_122 = arith.constant 0 : index
    %c0_123 = arith.constant 0 : index
    %161 = vector.load %arg9[%c0_122, %c0_123] : memref<128x512xbf16, #tpu.memory_space<vmem>>, vector<128x512xbf16>
    %cst_124 = arith.constant 0.000000e+00 : f32
    %162 = vector.broadcast %cst_124 : f32 to vector<2x128xf32>
    %cst_125 = arith.constant 0.000000e+00 : f32
    %163 = vector.broadcast %cst_125 : f32 to vector<2x128xf32>
    %164 = vector.extract_strided_slice %158 {offsets = [0, 0, 0], sizes = [2, 1, 512], strides = [1, 1, 1]} : vector<2x8x512xf32> to vector<2x1x512xf32>
    %165 = vector.shape_cast %164 : vector<2x1x512xf32> to vector<2x512xf32>
    %166 = arith.truncf %162 : vector<2x128xf32> to vector<2x128xbf16>
    %cst_126 = arith.constant dense<0.000000e+00> : vector<2x512xf32>
    %167 = tpu.matmul %166, %161, %cst_126 {dimension_numbers = #tpu.dot_dimension_numbers<[1], [0], [0], [1], [0, 0, 1, 1], [], []>} : vector<2x128xbf16>, vector<128x512xbf16>, vector<2x512xf32> -> vector<2x512xf32>
    %168 = arith.addf %165, %167 : vector<2x512xf32>
    %169 = vector.extract_strided_slice %168 {offsets = [0, 0], sizes = [2, 128], strides = [1, 1]} : vector<2x512xf32> to vector<2x128xf32>
    %170 = arith.negf %169 : vector<2x128xf32>
    %171 = math.exp %170 : vector<2x128xf32>
    %cst_127 = arith.constant 1.000000e+00 : f32
    %172 = vector.broadcast %cst_127 : f32 to vector<2x128xf32>
    %173 = arith.addf %172, %171 : vector<2x128xf32>
    %174 = arith.divf %172, %173 : vector<2x128xf32>
    %175 = vector.extract_strided_slice %168 {offsets = [0, 128], sizes = [2, 128], strides = [1, 1]} : vector<2x512xf32> to vector<2x128xf32>
    %176 = arith.negf %175 : vector<2x128xf32>
    %177 = math.exp %176 : vector<2x128xf32>
    %cst_128 = arith.constant 1.000000e+00 : f32
    %178 = vector.broadcast %cst_128 : f32 to vector<2x128xf32>
    %179 = arith.addf %178, %177 : vector<2x128xf32>
    %180 = arith.divf %178, %179 : vector<2x128xf32>
    %181 = vector.extract_strided_slice %168 {offsets = [0, 256], sizes = [2, 128], strides = [1, 1]} : vector<2x512xf32> to vector<2x128xf32>
    %182 = math.tanh %181 : vector<2x128xf32>
    %183 = vector.extract_strided_slice %168 {offsets = [0, 384], sizes = [2, 128], strides = [1, 1]} : vector<2x512xf32> to vector<2x128xf32>
    %184 = arith.negf %183 : vector<2x128xf32>
    %185 = math.exp %184 : vector<2x128xf32>
    %cst_129 = arith.constant 1.000000e+00 : f32
    %186 = vector.broadcast %cst_129 : f32 to vector<2x128xf32>
    %187 = arith.addf %186, %185 : vector<2x128xf32>
    %188 = arith.divf %186, %187 : vector<2x128xf32>
    %189 = arith.mulf %180, %163 : vector<2x128xf32>
    %190 = arith.mulf %174, %182 : vector<2x128xf32>
    %191 = arith.addf %189, %190 : vector<2x128xf32>
    %192 = math.tanh %191 : vector<2x128xf32>
    %193 = arith.mulf %188, %192 : vector<2x128xf32>
    %c0_130 = arith.constant 0 : index
    %c0_131 = arith.constant 0 : index
    %c0_132 = arith.constant 0 : index
    %194 = vector.load %arg6[%c0_130, %c0_131, %c0_132] : memref<2x8x128xf32, #tpu.memory_space<vmem>>, vector<2x1x128xf32>
    %195 = vector.shape_cast %194 : vector<2x1x128xf32> to vector<2x128xf32>
    %196 = vector.shape_cast %193 : vector<2x128xf32> to vector<2x1x128xf32>
    tpu.vector_store %arg6[%c0_130, %c0_131, %c0_132], %196 {strides = array<i32>} : memref<2x8x128xf32, #tpu.memory_space<vmem>>, vector<2x1x128xf32>,
    %197 = vector.extract_strided_slice %158 {offsets = [0, 1, 0], sizes = [2, 1, 512], strides = [1, 1, 1]} : vector<2x8x512xf32> to vector<2x1x512xf32>
    %198 = vector.shape_cast %197 : vector<2x1x512xf32> to vector<2x512xf32>
    %199 = arith.truncf %193 : vector<2x128xf32> to vector<2x128xbf16>
    %cst_133 = arith.constant dense<0.000000e+00> : vector<2x512xf32>
    %200 = tpu.matmul %199, %161, %cst_133 {dimension_numbers = #tpu.dot_dimension_numbers<[1], [0], [0], [1], [0, 0, 1, 1], [], []>} : vector<2x128xbf16>, vector<128x512xbf16>, vector<2x512xf32> -> vector<2x512xf32>
    %201 = arith.addf %198, %200 : vector<2x512xf32>
    %202 = vector.extract_strided_slice %201 {offsets = [0, 0], sizes = [2, 128], strides = [1, 1]} : vector<2x512xf32> to vector<2x128xf32>
    %203 = arith.negf %202 : vector<2x128xf32>
    %204 = math.exp %203 : vector<2x128xf32>
    %cst_134 = arith.constant 1.000000e+00 : f32
    %205 = vector.broadcast %cst_134 : f32 to vector<2x128xf32>
    %206 = arith.addf %205, %204 : vector<2x128xf32>
    %207 = arith.divf %205, %206 : vector<2x128xf32>
    %208 = vector.extract_strided_slice %201 {offsets = [0, 128], sizes = [2, 128], strides = [1, 1]} : vector<2x512xf32> to vector<2x128xf32>
    %209 = arith.negf %208 : vector<2x128xf32>
    %210 = math.exp %209 : vector<2x128xf32>
    %cst_135 = arith.constant 1.000000e+00 : f32
    %211 = vector.broadcast %cst_135 : f32 to vector<2x128xf32>
    %212 = arith.addf %211, %210 : vector<2x128xf32>
    %213 = arith.divf %211, %212 : vector<2x128xf32>
    %214 = vector.extract_strided_slice %201 {offsets = [0, 256], sizes = [2, 128], strides = [1, 1]} : vector<2x512xf32> to vector<2x128xf32>
    %215 = math.tanh %214 : vector<2x128xf32>
    %216 = vector.extract_strided_slice %201 {offsets = [0, 384], sizes = [2, 128], strides = [1, 1]} : vector<2x512xf32> to vector<2x128xf32>
    %217 = arith.negf %216 : vector<2x128xf32>
    %218 = math.exp %217 : vector<2x128xf32>
    %cst_136 = arith.constant 1.000000e+00 : f32
    %219 = vector.broadcast %cst_136 : f32 to vector<2x128xf32>
    %220 = arith.addf %219, %218 : vector<2x128xf32>
    %221 = arith.divf %219, %220 : vector<2x128xf32>
    %222 = arith.mulf %213, %191 : vector<2x128xf32>
    %223 = arith.mulf %207, %215 : vector<2x128xf32>
    %224 = arith.addf %222, %223 : vector<2x128xf32>
    %225 = math.tanh %224 : vector<2x128xf32>
    %226 = arith.mulf %221, %225 : vector<2x128xf32>
    %c0_137 = arith.constant 0 : index
    %c1_138 = arith.constant 1 : index
    %c0_139 = arith.constant 0 : index
    %227 = vector.load %arg6[%c0_137, %c1_138, %c0_139] : memref<2x8x128xf32, #tpu.memory_space<vmem>>, vector<2x1x128xf32>
    %228 = vector.shape_cast %227 : vector<2x1x128xf32> to vector<2x128xf32>
    %229 = vector.shape_cast %226 : vector<2x128xf32> to vector<2x1x128xf32>
    tpu.vector_store %arg6[%c0_137, %c1_138, %c0_139], %229 {strides = array<i32>} : memref<2x8x128xf32, #tpu.memory_space<vmem>>, vector<2x1x128xf32>,
    %230 = vector.extract_strided_slice %158 {offsets = [0, 2, 0], sizes = [2, 1, 512], strides = [1, 1, 1]} : vector<2x8x512xf32> to vector<2x1x512xf32>
    %231 = vector.shape_cast %230 : vector<2x1x512xf32> to vector<2x512xf32>
    %232 = arith.truncf %226 : vector<2x128xf32> to vector<2x128xbf16>
    %cst_140 = arith.constant dense<0.000000e+00> : vector<2x512xf32>
    %233 = tpu.matmul %232, %161, %cst_140 {dimension_numbers = #tpu.dot_dimension_numbers<[1], [0], [0], [1], [0, 0, 1, 1], [], []>} : vector<2x128xbf16>, vector<128x512xbf16>, vector<2x512xf32> -> vector<2x512xf32>
    %234 = arith.addf %231, %233 : vector<2x512xf32>
    %235 = vector.extract_strided_slice %234 {offsets = [0, 0], sizes = [2, 128], strides = [1, 1]} : vector<2x512xf32> to vector<2x128xf32>
    %236 = arith.negf %235 : vector<2x128xf32>
    %237 = math.exp %236 : vector<2x128xf32>
    %cst_141 = arith.constant 1.000000e+00 : f32
    %238 = vector.broadcast %cst_141 : f32 to vector<2x128xf32>
    %239 = arith.addf %238, %237 : vector<2x128xf32>
    %240 = arith.divf %238, %239 : vector<2x128xf32>
    %241 = vector.extract_strided_slice %234 {offsets = [0, 128], sizes = [2, 128], strides = [1, 1]} : vector<2x512xf32> to vector<2x128xf32>
    %242 = arith.negf %241 : vector<2x128xf32>
    %243 = math.exp %242 : vector<2x128xf32>
    %cst_142 = arith.constant 1.000000e+00 : f32
    %244 = vector.broadcast %cst_142 : f32 to vector<2x128xf32>
    %245 = arith.addf %244, %243 : vector<2x128xf32>
    %246 = arith.divf %244, %245 : vector<2x128xf32>
    %247 = vector.extract_strided_slice %234 {offsets = [0, 256], sizes = [2, 128], strides = [1, 1]} : vector<2x512xf32> to vector<2x128xf32>
    %248 = math.tanh %247 : vector<2x128xf32>
    %249 = vector.extract_strided_slice %234 {offsets = [0, 384], sizes = [2, 128], strides = [1, 1]} : vector<2x512xf32> to vector<2x128xf32>
    %250 = arith.negf %249 : vector<2x128xf32>
    %251 = math.exp %250 : vector<2x128xf32>
    %cst_143 = arith.constant 1.000000e+00 : f32
    %252 = vector.broadcast %cst_143 : f32 to vector<2x128xf32>
    %253 = arith.addf %252, %251 : vector<2x128xf32>
    %254 = arith.divf %252, %253 : vector<2x128xf32>
    %255 = arith.mulf %246, %224 : vector<2x128xf32>
    %256 = arith.mulf %240, %248 : vector<2x128xf32>
    %257 = arith.addf %255, %256 : vector<2x128xf32>
    %258 = math.tanh %257 : vector<2x128xf32>
    %259 = arith.mulf %254, %258 : vector<2x128xf32>
    %c0_144 = arith.constant 0 : index
    %c2_145 = arith.constant 2 : index
    %c0_146 = arith.constant 0 : index
    %260 = vector.load %arg6[%c0_144, %c2_145, %c0_146] : memref<2x8x128xf32, #tpu.memory_space<vmem>>, vector<2x1x128xf32>
    %261 = vector.shape_cast %260 : vector<2x1x128xf32> to vector<2x128xf32>
    %262 = vector.shape_cast %259 : vector<2x128xf32> to vector<2x1x128xf32>
    tpu.vector_store %arg6[%c0_144, %c2_145, %c0_146], %262 {strides = array<i32>} : memref<2x8x128xf32, #tpu.memory_space<vmem>>, vector<2x1x128xf32>,
    %263 = vector.extract_strided_slice %158 {offsets = [0, 3, 0], sizes = [2, 1, 512], strides = [1, 1, 1]} : vector<2x8x512xf32> to vector<2x1x512xf32>
    %264 = vector.shape_cast %263 : vector<2x1x512xf32> to vector<2x512xf32>
    %265 = arith.truncf %259 : vector<2x128xf32> to vector<2x128xbf16>
    %cst_147 = arith.constant dense<0.000000e+00> : vector<2x512xf32>
    %266 = tpu.matmul %265, %161, %cst_147 {dimension_numbers = #tpu.dot_dimension_numbers<[1], [0], [0], [1], [0, 0, 1, 1], [], []>} : vector<2x128xbf16>, vector<128x512xbf16>, vector<2x512xf32> -> vector<2x512xf32>
    %267 = arith.addf %264, %266 : vector<2x512xf32>
    %268 = vector.extract_strided_slice %267 {offsets = [0, 0], sizes = [2, 128], strides = [1, 1]} : vector<2x512xf32> to vector<2x128xf32>
    %269 = arith.negf %268 : vector<2x128xf32>
    %270 = math.exp %269 : vector<2x128xf32>
    %cst_148 = arith.constant 1.000000e+00 : f32
    %271 = vector.broadcast %cst_148 : f32 to vector<2x128xf32>
    %272 = arith.addf %271, %270 : vector<2x128xf32>
    %273 = arith.divf %271, %272 : vector<2x128xf32>
    %274 = vector.extract_strided_slice %267 {offsets = [0, 128], sizes = [2, 128], strides = [1, 1]} : vector<2x512xf32> to vector<2x128xf32>
    %275 = arith.negf %274 : vector<2x128xf32>
    %276 = math.exp %275 : vector<2x128xf32>
    %cst_149 = arith.constant 1.000000e+00 : f32
    %277 = vector.broadcast %cst_149 : f32 to vector<2x128xf32>
    %278 = arith.addf %277, %276 : vector<2x128xf32>
    %279 = arith.divf %277, %278 : vector<2x128xf32>
    %280 = vector.extract_strided_slice %267 {offsets = [0, 256], sizes = [2, 128], strides = [1, 1]} : vector<2x512xf32> to vector<2x128xf32>
    %281 = math.tanh %280 : vector<2x128xf32>
    %282 = vector.extract_strided_slice %267 {offsets = [0, 384], sizes = [2, 128], strides = [1, 1]} : vector<2x512xf32> to vector<2x128xf32>
    %283 = arith.negf %282 : vector<2x128xf32>
    %284 = math.exp %283 : vector<2x128xf32>
    %cst_150 = arith.constant 1.000000e+00 : f32
    %285 = vector.broadcast %cst_150 : f32 to vector<2x128xf32>
    %286 = arith.addf %285, %284 : vector<2x128xf32>
    %287 = arith.divf %285, %286 : vector<2x128xf32>
    %288 = arith.mulf %279, %257 : vector<2x128xf32>
    %289 = arith.mulf %273, %281 : vector<2x128xf32>
    %290 = arith.addf %288, %289 : vector<2x128xf32>
    %291 = math.tanh %290 : vector<2x128xf32>
    %292 = arith.mulf %287, %291 : vector<2x128xf32>
    %c0_151 = arith.constant 0 : index
    %c3_152 = arith.constant 3 : index
    %c0_153 = arith.constant 0 : index
    %293 = vector.load %arg6[%c0_151, %c3_152, %c0_153] : memref<2x8x128xf32, #tpu.memory_space<vmem>>, vector<2x1x128xf32>
    %294 = vector.shape_cast %293 : vector<2x1x128xf32> to vector<2x128xf32>
    %295 = vector.shape_cast %292 : vector<2x128xf32> to vector<2x1x128xf32>
    tpu.vector_store %arg6[%c0_151, %c3_152, %c0_153], %295 {strides = array<i32>} : memref<2x8x128xf32, #tpu.memory_space<vmem>>, vector<2x1x128xf32>,
    %296 = vector.extract_strided_slice %158 {offsets = [0, 4, 0], sizes = [2, 1, 512], strides = [1, 1, 1]} : vector<2x8x512xf32> to vector<2x1x512xf32>
    %297 = vector.shape_cast %296 : vector<2x1x512xf32> to vector<2x512xf32>
    %298 = arith.truncf %292 : vector<2x128xf32> to vector<2x128xbf16>
    %cst_154 = arith.constant dense<0.000000e+00> : vector<2x512xf32>
    %299 = tpu.matmul %298, %161, %cst_154 {dimension_numbers = #tpu.dot_dimension_numbers<[1], [0], [0], [1], [0, 0, 1, 1], [], []>} : vector<2x128xbf16>, vector<128x512xbf16>, vector<2x512xf32> -> vector<2x512xf32>
    %300 = arith.addf %297, %299 : vector<2x512xf32>
    %301 = vector.extract_strided_slice %300 {offsets = [0, 0], sizes = [2, 128], strides = [1, 1]} : vector<2x512xf32> to vector<2x128xf32>
    %302 = arith.negf %301 : vector<2x128xf32>
    %303 = math.exp %302 : vector<2x128xf32>
    %cst_155 = arith.constant 1.000000e+00 : f32
    %304 = vector.broadcast %cst_155 : f32 to vector<2x128xf32>
    %305 = arith.addf %304, %303 : vector<2x128xf32>
    %306 = arith.divf %304, %305 : vector<2x128xf32>
    %307 = vector.extract_strided_slice %300 {offsets = [0, 128], sizes = [2, 128], strides = [1, 1]} : vector<2x512xf32> to vector<2x128xf32>
    %308 = arith.negf %307 : vector<2x128xf32>
    %309 = math.exp %308 : vector<2x128xf32>
    %cst_156 = arith.constant 1.000000e+00 : f32
    %310 = vector.broadcast %cst_156 : f32 to vector<2x128xf32>
    %311 = arith.addf %310, %309 : vector<2x128xf32>
    %312 = arith.divf %310, %311 : vector<2x128xf32>
    %313 = vector.extract_strided_slice %300 {offsets = [0, 256], sizes = [2, 128], strides = [1, 1]} : vector<2x512xf32> to vector<2x128xf32>
    %314 = math.tanh %313 : vector<2x128xf32>
    %315 = vector.extract_strided_slice %300 {offsets = [0, 384], sizes = [2, 128], strides = [1, 1]} : vector<2x512xf32> to vector<2x128xf32>
    %316 = arith.negf %315 : vector<2x128xf32>
    %317 = math.exp %316 : vector<2x128xf32>
    %cst_157 = arith.constant 1.000000e+00 : f32
    %318 = vector.broadcast %cst_157 : f32 to vector<2x128xf32>
    %319 = arith.addf %318, %317 : vector<2x128xf32>
    %320 = arith.divf %318, %319 : vector<2x128xf32>
    %321 = arith.mulf %312, %290 : vector<2x128xf32>
    %322 = arith.mulf %306, %314 : vector<2x128xf32>
    %323 = arith.addf %321, %322 : vector<2x128xf32>
    %324 = math.tanh %323 : vector<2x128xf32>
    %325 = arith.mulf %320, %324 : vector<2x128xf32>
    %c0_158 = arith.constant 0 : index
    %c4_159 = arith.constant 4 : index
    %c0_160 = arith.constant 0 : index
    %326 = vector.load %arg6[%c0_158, %c4_159, %c0_160] : memref<2x8x128xf32, #tpu.memory_space<vmem>>, vector<2x1x128xf32>
    %327 = vector.shape_cast %326 : vector<2x1x128xf32> to vector<2x128xf32>
    %328 = vector.shape_cast %325 : vector<2x128xf32> to vector<2x1x128xf32>
    tpu.vector_store %arg6[%c0_158, %c4_159, %c0_160], %328 {strides = array<i32>} : memref<2x8x128xf32, #tpu.memory_space<vmem>>, vector<2x1x128xf32>,
    %329 = vector.extract_strided_slice %158 {offsets = [0, 5, 0], sizes = [2, 1, 512], strides = [1, 1, 1]} : vector<2x8x512xf32> to vector<2x1x512xf32>
    %330 = vector.shape_cast %329 : vector<2x1x512xf32> to vector<2x512xf32>
    %331 = arith.truncf %325 : vector<2x128xf32> to vector<2x128xbf16>
    %cst_161 = arith.constant dense<0.000000e+00> : vector<2x512xf32>
    %332 = tpu.matmul %331, %161, %cst_161 {dimension_numbers = #tpu.dot_dimension_numbers<[1], [0], [0], [1], [0, 0, 1, 1], [], []>} : vector<2x128xbf16>, vector<128x512xbf16>, vector<2x512xf32> -> vector<2x512xf32>
    %333 = arith.addf %330, %332 : vector<2x512xf32>
    %334 = vector.extract_strided_slice %333 {offsets = [0, 0], sizes = [2, 128], strides = [1, 1]} : vector<2x512xf32> to vector<2x128xf32>
    %335 = arith.negf %334 : vector<2x128xf32>
    %336 = math.exp %335 : vector<2x128xf32>
    %cst_162 = arith.constant 1.000000e+00 : f32
    %337 = vector.broadcast %cst_162 : f32 to vector<2x128xf32>
    %338 = arith.addf %337, %336 : vector<2x128xf32>
    %339 = arith.divf %337, %338 : vector<2x128xf32>
    %340 = vector.extract_strided_slice %333 {offsets = [0, 128], sizes = [2, 128], strides = [1, 1]} : vector<2x512xf32> to vector<2x128xf32>
    %341 = arith.negf %340 : vector<2x128xf32>
    %342 = math.exp %341 : vector<2x128xf32>
    %cst_163 = arith.constant 1.000000e+00 : f32
    %343 = vector.broadcast %cst_163 : f32 to vector<2x128xf32>
    %344 = arith.addf %343, %342 : vector<2x128xf32>
    %345 = arith.divf %343, %344 : vector<2x128xf32>
    %346 = vector.extract_strided_slice %333 {offsets = [0, 256], sizes = [2, 128], strides = [1, 1]} : vector<2x512xf32> to vector<2x128xf32>
    %347 = math.tanh %346 : vector<2x128xf32>
    %348 = vector.extract_strided_slice %333 {offsets = [0, 384], sizes = [2, 128], strides = [1, 1]} : vector<2x512xf32> to vector<2x128xf32>
    %349 = arith.negf %348 : vector<2x128xf32>
    %350 = math.exp %349 : vector<2x128xf32>
    %cst_164 = arith.constant 1.000000e+00 : f32
    %351 = vector.broadcast %cst_164 : f32 to vector<2x128xf32>
    %352 = arith.addf %351, %350 : vector<2x128xf32>
    %353 = arith.divf %351, %352 : vector<2x128xf32>
    %354 = arith.mulf %345, %323 : vector<2x128xf32>
    %355 = arith.mulf %339, %347 : vector<2x128xf32>
    %356 = arith.addf %354, %355 : vector<2x128xf32>
    %357 = math.tanh %356 : vector<2x128xf32>
    %358 = arith.mulf %353, %357 : vector<2x128xf32>
    %c0_165 = arith.constant 0 : index
    %c5_166 = arith.constant 5 : index
    %c0_167 = arith.constant 0 : index
    %359 = vector.load %arg6[%c0_165, %c5_166, %c0_167] : memref<2x8x128xf32, #tpu.memory_space<vmem>>, vector<2x1x128xf32>
    %360 = vector.shape_cast %359 : vector<2x1x128xf32> to vector<2x128xf32>
    %361 = vector.shape_cast %358 : vector<2x128xf32> to vector<2x1x128xf32>
    tpu.vector_store %arg6[%c0_165, %c5_166, %c0_167], %361 {strides = array<i32>} : memref<2x8x128xf32, #tpu.memory_space<vmem>>, vector<2x1x128xf32>,
    %362 = vector.extract_strided_slice %158 {offsets = [0, 6, 0], sizes = [2, 1, 512], strides = [1, 1, 1]} : vector<2x8x512xf32> to vector<2x1x512xf32>
    %363 = vector.shape_cast %362 : vector<2x1x512xf32> to vector<2x512xf32>
    %364 = arith.truncf %358 : vector<2x128xf32> to vector<2x128xbf16>
    %cst_168 = arith.constant dense<0.000000e+00> : vector<2x512xf32>
    %365 = tpu.matmul %364, %161, %cst_168 {dimension_numbers = #tpu.dot_dimension_numbers<[1], [0], [0], [1], [0, 0, 1, 1], [], []>} : vector<2x128xbf16>, vector<128x512xbf16>, vector<2x512xf32> -> vector<2x512xf32>
    %366 = arith.addf %363, %365 : vector<2x512xf32>
    %367 = vector.extract_strided_slice %366 {offsets = [0, 0], sizes = [2, 128], strides = [1, 1]} : vector<2x512xf32> to vector<2x128xf32>
    %368 = arith.negf %367 : vector<2x128xf32>
    %369 = math.exp %368 : vector<2x128xf32>
    %cst_169 = arith.constant 1.000000e+00 : f32
    %370 = vector.broadcast %cst_169 : f32 to vector<2x128xf32>
    %371 = arith.addf %370, %369 : vector<2x128xf32>
    %372 = arith.divf %370, %371 : vector<2x128xf32>
    %373 = vector.extract_strided_slice %366 {offsets = [0, 128], sizes = [2, 128], strides = [1, 1]} : vector<2x512xf32> to vector<2x128xf32>
    %374 = arith.negf %373 : vector<2x128xf32>
    %375 = math.exp %374 : vector<2x128xf32>
    %cst_170 = arith.constant 1.000000e+00 : f32
    %376 = vector.broadcast %cst_170 : f32 to vector<2x128xf32>
    %377 = arith.addf %376, %375 : vector<2x128xf32>
    %378 = arith.divf %376, %377 : vector<2x128xf32>
    %379 = vector.extract_strided_slice %366 {offsets = [0, 256], sizes = [2, 128], strides = [1, 1]} : vector<2x512xf32> to vector<2x128xf32>
    %380 = math.tanh %379 : vector<2x128xf32>
    %381 = vector.extract_strided_slice %366 {offsets = [0, 384], sizes = [2, 128], strides = [1, 1]} : vector<2x512xf32> to vector<2x128xf32>
    %382 = arith.negf %381 : vector<2x128xf32>
    %383 = math.exp %382 : vector<2x128xf32>
    %cst_171 = arith.constant 1.000000e+00 : f32
    %384 = vector.broadcast %cst_171 : f32 to vector<2x128xf32>
    %385 = arith.addf %384, %383 : vector<2x128xf32>
    %386 = arith.divf %384, %385 : vector<2x128xf32>
    %387 = arith.mulf %378, %356 : vector<2x128xf32>
    %388 = arith.mulf %372, %380 : vector<2x128xf32>
    %389 = arith.addf %387, %388 : vector<2x128xf32>
    %390 = math.tanh %389 : vector<2x128xf32>
    %391 = arith.mulf %386, %390 : vector<2x128xf32>
    %c0_172 = arith.constant 0 : index
    %c6_173 = arith.constant 6 : index
    %c0_174 = arith.constant 0 : index
    %392 = vector.load %arg6[%c0_172, %c6_173, %c0_174] : memref<2x8x128xf32, #tpu.memory_space<vmem>>, vector<2x1x128xf32>
    %393 = vector.shape_cast %392 : vector<2x1x128xf32> to vector<2x128xf32>
    %394 = vector.shape_cast %391 : vector<2x128xf32> to vector<2x1x128xf32>
    tpu.vector_store %arg6[%c0_172, %c6_173, %c0_174], %394 {strides = array<i32>} : memref<2x8x128xf32, #tpu.memory_space<vmem>>, vector<2x1x128xf32>,
    %395 = vector.extract_strided_slice %158 {offsets = [0, 7, 0], sizes = [2, 1, 512], strides = [1, 1, 1]} : vector<2x8x512xf32> to vector<2x1x512xf32>
    %396 = vector.shape_cast %395 : vector<2x1x512xf32> to vector<2x512xf32>
    %397 = arith.truncf %391 : vector<2x128xf32> to vector<2x128xbf16>
    %cst_175 = arith.constant dense<0.000000e+00> : vector<2x512xf32>
    %398 = tpu.matmul %397, %161, %cst_175 {dimension_numbers = #tpu.dot_dimension_numbers<[1], [0], [0], [1], [0, 0, 1, 1], [], []>} : vector<2x128xbf16>, vector<128x512xbf16>, vector<2x512xf32> -> vector<2x512xf32>
    %399 = arith.addf %396, %398 : vector<2x512xf32>
    %400 = vector.extract_strided_slice %399 {offsets = [0, 0], sizes = [2, 128], strides = [1, 1]} : vector<2x512xf32> to vector<2x128xf32>
    %401 = arith.negf %400 : vector<2x128xf32>
    %402 = math.exp %401 : vector<2x128xf32>
    %cst_176 = arith.constant 1.000000e+00 : f32
    %403 = vector.broadcast %cst_176 : f32 to vector<2x128xf32>
    %404 = arith.addf %403, %402 : vector<2x128xf32>
    %405 = arith.divf %403, %404 : vector<2x128xf32>
    %406 = vector.extract_strided_slice %399 {offsets = [0, 128], sizes = [2, 128], strides = [1, 1]} : vector<2x512xf32> to vector<2x128xf32>
    %407 = arith.negf %406 : vector<2x128xf32>
    %408 = math.exp %407 : vector<2x128xf32>
    %cst_177 = arith.constant 1.000000e+00 : f32
    %409 = vector.broadcast %cst_177 : f32 to vector<2x128xf32>
    %410 = arith.addf %409, %408 : vector<2x128xf32>
    %411 = arith.divf %409, %410 : vector<2x128xf32>
    %412 = vector.extract_strided_slice %399 {offsets = [0, 256], sizes = [2, 128], strides = [1, 1]} : vector<2x512xf32> to vector<2x128xf32>
    %413 = math.tanh %412 : vector<2x128xf32>
    %414 = vector.extract_strided_slice %399 {offsets = [0, 384], sizes = [2, 128], strides = [1, 1]} : vector<2x512xf32> to vector<2x128xf32>
    %415 = arith.negf %414 : vector<2x128xf32>
    %416 = math.exp %415 : vector<2x128xf32>
    %cst_178 = arith.constant 1.000000e+00 : f32
    %417 = vector.broadcast %cst_178 : f32 to vector<2x128xf32>
    %418 = arith.addf %417, %416 : vector<2x128xf32>
    %419 = arith.divf %417, %418 : vector<2x128xf32>
    %420 = arith.mulf %411, %389 : vector<2x128xf32>
    %421 = arith.mulf %405, %413 : vector<2x128xf32>
    %422 = arith.addf %420, %421 : vector<2x128xf32>
    %423 = math.tanh %422 : vector<2x128xf32>
    %424 = arith.mulf %419, %423 : vector<2x128xf32>
    %c0_179 = arith.constant 0 : index
    %c7_180 = arith.constant 7 : index
    %c0_181 = arith.constant 0 : index
    %425 = vector.load %arg6[%c0_179, %c7_180, %c0_181] : memref<2x8x128xf32, #tpu.memory_space<vmem>>, vector<2x1x128xf32>
    %426 = vector.shape_cast %425 : vector<2x1x128xf32> to vector<2x128xf32>
    %427 = vector.shape_cast %424 : vector<2x128xf32> to vector<2x1x128xf32>
    tpu.vector_store %arg6[%c0_179, %c7_180, %c0_181], %427 {strides = array<i32>} : memref<2x8x128xf32, #tpu.memory_space<vmem>>, vector<2x1x128xf32>,
    return
  }
  func.func @transform_3(%arg0: i32, %arg1: memref<16xi32, #tpu.memory_space<smem>>) -> (i32, i32) {
    %c0_i32 = arith.constant 0 : i32
    %c0_i32_0 = arith.constant 0 : i32
    %c0_i32_1 = arith.constant 0 : i32
    return %c0_i32, %c0_i32_0 : i32, i32
  }
  func.func @transform_4(%arg0: i32, %arg1: memref<16xi32, #tpu.memory_space<smem>>) -> (i32, i32, i32) {
    %c0_i32 = arith.constant 0 : i32
    %c0_i32_0 = arith.constant 0 : i32
    %c0_i32_1 = arith.constant 0 : i32
    %c0_i32_2 = arith.constant 0 : i32
    return %c0_i32, %c0_i32_0, %c0_i32_1 : i32, i32, i32
  }
}

</mosaic_0001>

<bundles_post_ra>
// kernel: tpu_custom_call.1
= control target key start
LH: loop header
LB: loop body
LE: loop exit
PB: predicated region body
PF: predicated region fallthrough
CT: control target
= control target key end

     0   :  { %s5552_s0 = inlined_call_operand.vmem [shape: s32[16], index: 0, kind: input, shape index: {}]   ;;  %s5553_s1 = inlined_call_operand.hbm [shape: f32[30522,300], index: 1, kind: input, shape index: {}]   ;;  %s5554_s2 = inlined_call_operand.vmem [shape: bf16[300,512], index: 2, kind: input, shape index: {}]   ;;  %s5555_s3 = inlined_call_operand.vmem [shape: bf16[128,512], index: 3, kind: input, shape index: {}]   ;;  %s5556_s4 = inlined_call_operand.vmem [shape: f32[1,512], index: 4, kind: input, shape index: {}]   ;;  %s5557_s5 = inlined_call_operand.hbm [shape: f32[2,8,128], index: 5, kind: output, shape index: {}]  }
   0x1   :  { %5563 = sst [smem:[#allocation49_spill]] %s5556_s4  ;;  %s10_s20 = sshll.u32 %s5552_s0, 4  ;;  %s11_s20 = int_to_ptr.vmem [resolvable:$true] %s10_s20 }
   0x2   :  { %5564 = sst [smem:[#allocation50_spill]] %s5557_s5  ;;  %s3735_s21 = scalar_lea.vmem %s11_s20, 16 }
   0x3   :  { %p3736_p0 = scmp.ne.s32.totalorder %s11_s20, %s3735_s21  ;;  %p3740_p1 = scmp.lt.s32.totalorder %s11_s20, %s11_s20 }
   0x4   :  { %p3741_p2 = scmp.lt.s32.totalorder %s3735_s21, %s3735_s21 }
   0x6   :  { %p3742_p3 = por %p3741_p2, %p3740_p1 }
   0x8   :  { %p3743_p4 = pnand %p3742_p3, %p3736_p0 }
   0xa   :  { %3746 = shalt.err (!%p3743_p4)  }
   0xb   :  { %s4193_s22 = smov [#allocation8]  }
   0xc   :  { %13 = dma.vmem_to_smem %s11_s20, 16, %s4193_s22, [#allocation7] }
   0xd   :  { %4153 = dma.done.wait [#allocation7], 16 }
   0xe   :  { %4154 = vsyncadd [#allocation7], 4294967280 }
   0xf   :  { %15 = sfence }
  0x10   :  { %16 = vsyncpa [#allocation10], 0  ;;  %s4248_s23 = sld [smem:[#allocation8]]  ;;  %v274_v0 = vld [vmem:[%s5554_s2] sm:$0xff]  ;;  %s4194_s0 = smov [#allocation2]   ;;  %v276_v1 = vld [vmem:[%s5554_s2 + $0x8] sm:$0xff] }
  0x11   :  { %s28_s26 = sshll.u32 %s4194_s0, 4  ;;  %275 = vst [vmem:[#allocation3] sm:$0xff] %v274_v0  ;;  %v278_v2 = vld [vmem:[%s5554_s2 + $0x10] sm:$0xff]  ;;  %v280_v3 = vld [vmem:[%s5554_s2 + $0x18] sm:$0xff]  ;;  %277 = vst [vmem:[#allocation3 + $0x8] sm:$0xff] %v276_v1  ;;  %s4273_s14 = sld [smem:[#allocation8 + $0x1]]  ;;  %s4262_s26 = int_to_ptr.vmem [resolvable:$true] %s28_s26 }
  0x12   :  { %279 = vst [vmem:[#allocation3 + $0x10] sm:$0xff] %v278_v2  ;;  %281 = vst [vmem:[#allocation3 + $0x18] sm:$0xff] %v280_v3  ;;  %v282_v4 = vld [vmem:[%s5554_s2 + $0x20] sm:$0xff]  ;;  %v284_v5 = vld [vmem:[%s5554_s2 + $0x28] sm:$0xff]  ;;  %s4195_s21 = smov [#allocation2 + $0x1]   ;;  %s4284_s24 = sld [smem:[#allocation8 + $0x2]] }
  0x13   :  { %v286_v6 = vld [vmem:[%s5554_s2 + $0x30] sm:$0xff]  ;;  %283 = vst [vmem:[#allocation3 + $0x20] sm:$0xff] %v282_v4  ;;  %285 = vst [vmem:[#allocation3 + $0x28] sm:$0xff] %v284_v5  ;;  %v288_v7 = vld [vmem:[%s5554_s2 + $0x38] sm:$0xff]  ;;  %s42_s22 = sshll.u32 %s4195_s21, 4  ;;  %s4196_s25 = smov [#allocation2 + $0x2]   ;;  %s4295_s22 = int_to_ptr.vmem [resolvable:$true] %s42_s22 }
  0x14   :  { %287 = vst [vmem:[#allocation3 + $0x30] sm:$0xff] %v286_v6  ;;  %v290_v8 = vld [vmem:[%s5554_s2 + $0x40] sm:$0xff]  ;;  %v292_v9 = vld [vmem:[%s5554_s2 + $0x48] sm:$0xff]  ;;  %289 = vst [vmem:[#allocation3 + $0x38] sm:$0xff] %v288_v7  ;;  %s56_s0 = sshll.u32 %s4196_s25, 4  ;;  %s4328_s7 = sld [smem:[#allocation8 + $0x3]]  ;;  %s4326_s0 = int_to_ptr.vmem [resolvable:$true] %s56_s0 }
  0x15   :  { %291 = vst [vmem:[#allocation3 + $0x40] sm:$0xff] %v290_v8  ;;  %293 = vst [vmem:[#allocation3 + $0x48] sm:$0xff] %v292_v9  ;;  %v294_v10 = vld [vmem:[%s5554_s2 + $0x50] sm:$0xff]  ;;  %v296_v11 = vld [vmem:[%s5554_s2 + $0x58] sm:$0xff] }
  0x16   :  { %v298_v12 = vld [vmem:[%s5554_s2 + $0x60] sm:$0xff]  ;;  %295 = vst [vmem:[#allocation3 + $0x50] sm:$0xff] %v294_v10  ;;  %297 = vst [vmem:[#allocation3 + $0x58] sm:$0xff] %v296_v11  ;;  %v300_v13 = vld [vmem:[%s5554_s2 + $0x68] sm:$0xff]  ;;  %s21_s12 = sshrl.u32 %s4248_s23, 3  ;;  %s22_s13 = sand.u32 7, %s4248_s23  }
  0x17   :  { %299 = vst [vmem:[#allocation3 + $0x60] sm:$0xff] %v298_v12  ;;  %v302_v14 = vld [vmem:[%s5554_s2 + $0x70] sm:$0xff]  ;;  %v304_v15 = vld [vmem:[%s5554_s2 + $0x78] sm:$0xff]  ;;  %301 = vst [vmem:[#allocation3 + $0x68] sm:$0xff] %v300_v13  ;;  %s23_s21 = smul.u32 24, %s21_s12  ;;  %s33_s17 = sshrl.u32 %s4273_s14, 3 }
  0x18   :  { %303 = vst [vmem:[#allocation3 + $0x70] sm:$0xff] %v302_v14  ;;  %305 = vst [vmem:[#allocation3 + $0x78] sm:$0xff] %v304_v15  ;;  %v306_v16 = vld [vmem:[%s5554_s2 + $0x80] sm:$0xff]  ;;  %v308_v17 = vld [vmem:[%s5554_s2 + $0x88] sm:$0xff]  ;;  %s34_s29 = sand.u32 7, %s4273_s14   ;;  %s4364_s15 = smul.u32 24, %s33_s17 }
  0x19   :  { %v310_v18 = vld [vmem:[%s5554_s2 + $0x90] sm:$0xff]  ;;  %307 = vst [vmem:[#allocation3 + $0x80] sm:$0xff] %v306_v16  ;;  %309 = vst [vmem:[#allocation3 + $0x88] sm:$0xff] %v308_v17  ;;  %v312_v19 = vld [vmem:[%s5554_s2 + $0x98] sm:$0xff]  ;;  %s24_s16 = sadd.s32 %s23_s21, %s22_s13  ;;  %s4380_s13 = scalar_lea.hbm %s5553_s1, 1465344 }
  0x1a   :  { %311 = vst [vmem:[#allocation3 + $0x90] sm:$0xff] %v310_v18  ;;  %v314_v20 = vld [vmem:[%s5554_s2 + $0xa0] sm:$0xff]  ;;  %v316_v21 = vld [vmem:[%s5554_s2 + $0xa8] sm:$0xff]  ;;  %313 = vst [vmem:[#allocation3 + $0x98] sm:$0xff] %v312_v19  ;;  %s3106_s28 = sshll.u32 %s24_s16, 4 }
  0x1b   :  { %315 = vst [vmem:[#allocation3 + $0xa0] sm:$0xff] %v314_v20  ;;  %317 = vst [vmem:[#allocation3 + $0xa8] sm:$0xff] %v316_v21  ;;  %v318_v22 = vld [vmem:[%s5554_s2 + $0xb0] sm:$0xff]  ;;  %v320_v23 = vld [vmem:[%s5554_s2 + $0xb8] sm:$0xff]  ;;  %s4362_s12 = scalar_lea.hbm %s5553_s1, %s3106_s28 }
  0x1c   :  { %v322_v24 = vld [vmem:[%s5554_s2 + $0xc0] sm:$0xff]  ;;  %319 = vst [vmem:[#allocation3 + $0xb0] sm:$0xff] %v318_v22  ;;  %321 = vst [vmem:[#allocation3 + $0xb8] sm:$0xff] %v320_v23  ;;  %v324_v25 = vld [vmem:[%s5554_s2 + $0xc8] sm:$0xff]  ;;  %s3747_s27 = scalar_lea.hbm %s4362_s12, 48  ;;  %p3750_p6 = scmp.lt.u32.totalorder %s4362_s12, %s5553_s1 }
  0x1d   :  { %323 = vst [vmem:[#allocation3 + $0xc0] sm:$0xff] %v322_v24  ;;  %v326_v26 = vld [vmem:[%s5554_s2 + $0xd0] sm:$0xff]  ;;  %v328_v27 = vld [vmem:[%s5554_s2 + $0xd8] sm:$0xff]  ;;  %325 = vst [vmem:[#allocation3 + $0xc8] sm:$0xff] %v324_v25  ;;  %p3748_p5 = scmp.ne.s32.totalorder %s4362_s12, %s3747_s27  ;;  %p3751_p7 = scmp.lt.u32.totalorder %s4380_s13, %s3747_s27 }
  0x1e   :  { %327 = vst [vmem:[#allocation3 + $0xd0] sm:$0xff] %v326_v26  ;;  %329 = vst [vmem:[#allocation3 + $0xd8] sm:$0xff] %v328_v27  ;;  %v330_v28 = vld [vmem:[%s5554_s2 + $0xe0] sm:$0xff]  ;;  %v332_v29 = vld [vmem:[%s5554_s2 + $0xe8] sm:$0xff]  ;;  %p3753_p9 = scmp.lt.u32.totalorder %s3747_s27, %s4362_s12 }
  0x1f   :  { %v334_v30 = vld [vmem:[%s5554_s2 + $0xf0] sm:$0xff]  ;;  %331 = vst [vmem:[#allocation3 + $0xe0] sm:$0xff] %v330_v28  ;;  %333 = vst [vmem:[#allocation3 + $0xe8] sm:$0xff] %v332_v29  ;;  %v336_v31 = vld [vmem:[%s5554_s2 + $0xf8] sm:$0xff]  ;;  %p3752_p8 = por %p3751_p7, %p3750_p6 }
  0x20   :  { %335 = vst [vmem:[#allocation3 + $0xf0] sm:$0xff] %v334_v30  ;;  %v338_v32 = vld [vmem:[%s5554_s2 + $0x100] sm:$0xff]  ;;  %v340_v33 = vld [vmem:[%s5554_s2 + $0x108] sm:$0xff] }
  0x21   :  { %p3754_p10 = por %p3753_p9, %p3752_p8 }
  0x23   :  { %p3755_p11 = pnand %p3754_p10, %p3748_p5 }
  0x25   :  { %3758 = shalt.err (!%p3755_p11)  }
  0x26   :  { %s3759_s6 = scalar_lea.vmem %s4262_s26, 48  ;;  %s4391_s8 = scalar_lea.vmem %s4262_s26, 768 }
  0x27   :  { %p3760_p12 = scmp.ne.s32.totalorder %s4262_s26, %s3759_s6  ;;  %p3764_p13 = scmp.lt.s32.totalorder %s4262_s26, %s4262_s26 }
  0x28   :  { %p3765_p0 = scmp.lt.s32.totalorder %s4391_s8, %s3759_s6 }
  0x2a   :  { %p3766_p1 = por %p3765_p0, %p3764_p13 }
  0x2c   :  { %p3767_p2 = pnand %p3766_p1, %p3760_p12 }
  0x2e   :  { %3770 = shalt.err (!%p3767_p2)  }
  0x2f   :  { %s5558_s9 = smov 128   ;;  %s5560_s10 = smov 1   ;;  %337 = vst [vmem:[#allocation3 + $0xf8] sm:$0xff] %v336_v31  ;;  %339 = vst [vmem:[#allocation3 + $0x100] sm:$0xff] %v338_v32  ;;  %v342_v34 = vld [vmem:[%s5554_s2 + $0x110] sm:$0xff]  ;;  %v344_v35 = vld [vmem:[%s5554_s2 + $0x118] sm:$0xff] }
  0x30   :  { %31 = dma.hbm_to_vmem [thread:$0]  %s4362_s12, 48, %s4262_s26, [#allocation5], %s5558_s9, %s5558_s9, %s5560_s10  ;;  %341 = vst [vmem:[#allocation3 + $0x108] sm:$0xff] %v340_v33  ;;  %343 = vst [vmem:[#allocation3 + $0x110] sm:$0xff] %v342_v34 }
  0x31   :  { %s36_s11 = sadd.s32 %s4364_s15, %s34_s29  ;;  %s47_s16 = sshrl.u32 %s4284_s24, 3  ;;  %v346_v36 = vld [vmem:[%s5554_s2 + $0x120] sm:$0xff]  ;;  %345 = vst [vmem:[#allocation3 + $0x118] sm:$0xff] %v344_v35  ;;  %v348_v37 = vld [vmem:[%s5554_s2 + $0x128] sm:$0xff]  ;;  %v350_v38 = vld [vmem:[%s5554_s2 + $0x130] sm:$0xff] }
  0x32   :  { %s3108_s28 = sshll.u32 %s36_s11, 4  ;;  %s48_s12 = sand.u32 7, %s4284_s24   ;;  %347 = vst [vmem:[#allocation3 + $0x120] sm:$0xff] %v346_v36  ;;  %v352_v39 = vld [vmem:[%s5554_s2 + $0x138] sm:$0xff]  ;;  %349 = vst [vmem:[#allocation3 + $0x128] sm:$0xff] %v348_v37  ;;  %v354_v40 = vld [vmem:[%s5554_s2 + $0x140] sm:$0xff] }
  0x33   :  { %s38_s11 = scalar_lea.hbm %s5553_s1, %s3108_s28  ;;  %s49_s19 = smul.u32 24, %s47_s16  ;;  %351 = vst [vmem:[#allocation3 + $0x130] sm:$0xff] %v350_v38  ;;  %353 = vst [vmem:[#allocation3 + $0x138] sm:$0xff] %v352_v39  ;;  %v356_v41 = vld [vmem:[%s5554_s2 + $0x148] sm:$0xff]  ;;  %v358_v42 = vld [vmem:[%s5554_s2 + $0x150] sm:$0xff] }
  0x34   :  { %s3771_s15 = scalar_lea.hbm %s38_s11, 48  ;;  %p3774_p4 = scmp.lt.u32.totalorder %s38_s11, %s5553_s1 }
  0x35   :  { %p3772_p3 = scmp.ne.s32.totalorder %s38_s11, %s3771_s15  ;;  %p3775_p5 = scmp.lt.u32.totalorder %s4380_s13, %s3771_s15 }
  0x36   :  { %p3777_p7 = scmp.lt.u32.totalorder %s3771_s15, %s38_s11 }
  0x37   :  { %p3776_p6 = por %p3775_p5, %p3774_p4 }
  0x39   :  { %p3778_p8 = por %p3777_p7, %p3776_p6 }
  0x3b   :  { %p3779_p9 = pnand %p3778_p8, %p3772_p3 }
  0x3d   :  { %3782 = shalt.err (!%p3779_p9)  }
  0x3e   :  { %s3783_s16 = scalar_lea.vmem %s4295_s22, 48  ;;  %p3788_p11 = scmp.lt.s32.totalorder %s4295_s22, %s4262_s26 }
  0x3f   :  { %p3784_p10 = scmp.ne.s32.totalorder %s4295_s22, %s3783_s16  ;;  %p3789_p12 = scmp.lt.s32.totalorder %s4391_s8, %s3783_s16 }
  0x41   :  { %p3790_p13 = por %p3789_p12, %p3788_p11 }
  0x43   :  { %p3791_p0 = pnand %p3790_p13, %p3784_p10 }
  0x45   :  { %3794 = shalt.err (!%p3791_p0)  }
  0x46   :  { %45 = dma.hbm_to_vmem [thread:$0]  %s38_s11, 48, %s4295_s22, [#allocation5 + $0x1], %s5558_s9, %s5558_s9, %s5560_s10  ;;  %355 = vst [vmem:[#allocation3 + $0x140] sm:$0xff] %v354_v40  ;;  %357 = vst [vmem:[#allocation3 + $0x148] sm:$0xff] %v356_v41 }
  0x47   :  { %359 = vst [vmem:[#allocation3 + $0x150] sm:$0xff] %v358_v42  ;;  %s50_s21 = sadd.s32 %s49_s19, %s48_s12  ;;  %s61_s30 = sshrl.u32 %s4328_s7, 3  ;;  %v360_v43 = vld [vmem:[%s5554_s2 + $0x158] sm:$0xff]  ;;  %v362_v44 = vld [vmem:[%s5554_s2 + $0x160] sm:$0xff]  ;;  %v364_v45 = vld [vmem:[%s5554_s2 + $0x168] sm:$0xff] }
  0x48   :  { %s3110_s14 = sshll.u32 %s50_s21, 4  ;;  %s62_s22 = sand.u32 7, %s4328_s7   ;;  %361 = vst [vmem:[#allocation3 + $0x158] sm:$0xff] %v360_v43  ;;  %363 = vst [vmem:[#allocation3 + $0x160] sm:$0xff] %v362_v44  ;;  %v366_v46 = vld [vmem:[%s5554_s2 + $0x170] sm:$0xff]  ;;  %v368_v47 = vld [vmem:[%s5554_s2 + $0x178] sm:$0xff] }
  0x49   :  { %365 = vst [vmem:[#allocation3 + $0x168] sm:$0xff] %v364_v45  ;;  %v370_v48 = vld [vmem:[%s5554_s2 + $0x180] sm:$0xff]  ;;  %s52_s16 = scalar_lea.hbm %s5553_s1, %s3110_s14  ;;  %s63_s21 = smul.u32 24, %s61_s30  ;;  %367 = vst [vmem:[#allocation3 + $0x170] sm:$0xff] %v366_v46  ;;  %v372_v49 = vld [vmem:[%s5554_s2 + $0x188] sm:$0xff] }
  0x4a   :  { %369 = vst [vmem:[#allocation3 + $0x178] sm:$0xff] %v368_v47  ;;  %371 = vst [vmem:[#allocation3 + $0x180] sm:$0xff] %v370_v48  ;;  %v374_v50 = vld [vmem:[%s5554_s2 + $0x190] sm:$0xff]  ;;  %v376_v51 = vld [vmem:[%s5554_s2 + $0x198] sm:$0xff]  ;;  %s3795_s24 = scalar_lea.hbm %s52_s16, 48  ;;  %p3798_p2 = scmp.lt.u32.totalorder %s52_s16, %s5553_s1 }
  0x4b   :  { %p3796_p1 = scmp.ne.s32.totalorder %s52_s16, %s3795_s24  ;;  %p3799_p3 = scmp.lt.u32.totalorder %s4380_s13, %s3795_s24 }
  0x4c   :  { %p3801_p5 = scmp.lt.u32.totalorder %s3795_s24, %s52_s16 }
  0x4d   :  { %p3800_p4 = por %p3799_p3, %p3798_p2 }
  0x4f   :  { %p3802_p6 = por %p3801_p5, %p3800_p4 }
  0x51   :  { %p3803_p7 = pnand %p3802_p6, %p3796_p1 }
  0x53   :  { %3806 = shalt.err (!%p3803_p7)  }
  0x54   :  { %s3807_s30 = scalar_lea.vmem %s4326_s0, 48  ;;  %p3812_p9 = scmp.lt.s32.totalorder %s4326_s0, %s4262_s26 }
  0x55   :  { %p3808_p8 = scmp.ne.s32.totalorder %s4326_s0, %s3807_s30  ;;  %p3813_p10 = scmp.lt.s32.totalorder %s4391_s8, %s3807_s30 }
  0x57   :  { %p3814_p11 = por %p3813_p10, %p3812_p9 }
  0x59   :  { %p3815_p12 = pnand %p3814_p11, %p3808_p8 }
  0x5b   :  { %3818 = shalt.err (!%p3815_p12)  }
  0x5c   :  { %59 = dma.hbm_to_vmem [thread:$0]  %s52_s16, 48, %s4326_s0, [#allocation5 + $0x2], %s5558_s9, %s5558_s9, %s5560_s10  ;;  %373 = vst [vmem:[#allocation3 + $0x188] sm:$0xff] %v372_v49  ;;  %375 = vst [vmem:[#allocation3 + $0x190] sm:$0xff] %v374_v50 }
  0x5d   :  { %377 = vst [vmem:[#allocation3 + $0x198] sm:$0xff] %v376_v51  ;;  %s64_s11 = sadd.s32 %s63_s21, %s62_s22  ;;  %v378_v52 = vld [vmem:[%s5554_s2 + $0x1a0] sm:$0xff]  ;;  %v380_v53 = vld [vmem:[%s5554_s2 + $0x1a8] sm:$0xff]  ;;  %v382_v54 = vld [vmem:[%s5554_s2 + $0x1b0] sm:$0xff]  ;;  %s4199_s20 = smov [#allocation2 + $0x3]  }
  0x5e   :  { %s3112_s18 = sshll.u32 %s64_s11, 4  ;;  %s70_s0 = sshll.u32 %s4199_s20, 4  ;;  %379 = vst [vmem:[#allocation3 + $0x1a0] sm:$0xff] %v378_v52  ;;  %381 = vst [vmem:[#allocation3 + $0x1a8] sm:$0xff] %v380_v53  ;;  %v384_v55 = vld [vmem:[%s5554_s2 + $0x1b8] sm:$0xff]  ;;  %v386_v56 = vld [vmem:[%s5554_s2 + $0x1c0] sm:$0xff]  ;;  %s71_s0 = int_to_ptr.vmem [resolvable:$true] %s70_s0 }
  0x5f   :  { %383 = vst [vmem:[#allocation3 + $0x1b0] sm:$0xff] %v382_v54  ;;  %v388_v57 = vld [vmem:[%s5554_s2 + $0x1c8] sm:$0xff]  ;;  %s66_s12 = scalar_lea.hbm %s5553_s1, %s3112_s18  ;;  %385 = vst [vmem:[#allocation3 + $0x1b8] sm:$0xff] %v384_v55  ;;  %v390_v58 = vld [vmem:[%s5554_s2 + $0x1d0] sm:$0xff] }
  0x60   :  { %387 = vst [vmem:[#allocation3 + $0x1c0] sm:$0xff] %v386_v56  ;;  %389 = vst [vmem:[#allocation3 + $0x1c8] sm:$0xff] %v388_v57  ;;  %v392_v59 = vld [vmem:[%s5554_s2 + $0x1d8] sm:$0xff]  ;;  %v394_v60 = vld [vmem:[%s5554_s2 + $0x1e0] sm:$0xff]  ;;  %s3819_s17 = scalar_lea.hbm %s66_s12, 48  ;;  %p3822_p0 = scmp.lt.u32.totalorder %s66_s12, %s5553_s1 }
  0x61   :  { %p3820_p13 = scmp.ne.s32.totalorder %s66_s12, %s3819_s17  ;;  %p3823_p1 = scmp.lt.u32.totalorder %s4380_s13, %s3819_s17 }
  0x62   :  { %p3825_p3 = scmp.lt.u32.totalorder %s3819_s17, %s66_s12 }
  0x63   :  { %p3824_p2 = por %p3823_p1, %p3822_p0 }
  0x65   :  { %p3826_p4 = por %p3825_p3, %p3824_p2 }
  0x67   :  { %p3827_p5 = pnand %p3826_p4, %p3820_p13 }
  0x69   :  { %3830 = shalt.err (!%p3827_p5)  }
  0x6a   :  { %s3831_s18 = scalar_lea.vmem %s71_s0, 48  ;;  %p3836_p7 = scmp.lt.s32.totalorder %s71_s0, %s4262_s26 }
  0x6b   :  { %p3832_p6 = scmp.ne.s32.totalorder %s71_s0, %s3831_s18  ;;  %p3837_p8 = scmp.lt.s32.totalorder %s4391_s8, %s3831_s18 }
  0x6d   :  { %p3838_p9 = por %p3837_p8, %p3836_p7 }
  0x6f   :  { %p3839_p10 = pnand %p3838_p9, %p3832_p6 }
  0x71   :  { %3842 = shalt.err (!%p3839_p10)  }
  0x72   :  { %73 = dma.hbm_to_vmem [thread:$0]  %s66_s12, 48, %s71_s0, [#allocation5 + $0x3], %s5558_s9, %s5558_s9, %s5560_s10  ;;  %391 = vst [vmem:[#allocation3 + $0x1d0] sm:$0xff] %v390_v58  ;;  %393 = vst [vmem:[#allocation3 + $0x1d8] sm:$0xff] %v392_v59 }
  0x73   :  { %395 = vst [vmem:[#allocation3 + $0x1e0] sm:$0xff] %v394_v60  ;;  %s4537_s20 = sld [smem:[#allocation8 + $0x4]]  ;;  %v396_v61 = vld [vmem:[%s5554_s2 + $0x1e8] sm:$0xff]  ;;  %v398_v62 = vld [vmem:[%s5554_s2 + $0x1f0] sm:$0xff]  ;;  %v400_v63 = vld [vmem:[%s5554_s2 + $0x1f8] sm:$0xff]  ;;  %s4200_s27 = smov [#allocation2 + $0x4]  }
  0x74   :  { %s84_s24 = sshll.u32 %s4200_s27, 4  ;;  %s4548_s0 = sld [smem:[#allocation8 + $0x5]]  ;;  %397 = vst [vmem:[#allocation3 + $0x1e8] sm:$0xff] %v396_v61  ;;  %399 = vst [vmem:[#allocation3 + $0x1f0] sm:$0xff] %v398_v62  ;;  %v402_v0 = vld [vmem:[%s5554_s2 + $0x200] sm:$0xff]  ;;  %v404_v1 = vld [vmem:[%s5554_s2 + $0x208] sm:$0xff]  ;;  %s4559_s24 = int_to_ptr.vmem [resolvable:$true] %s84_s24 }
  0x75   :  { %401 = vst [vmem:[#allocation3 + $0x1f8] sm:$0xff] %v400_v63  ;;  %v406_v2 = vld [vmem:[%s5554_s2 + $0x210] sm:$0xff]  ;;  %403 = vst [vmem:[#allocation3 + $0x200] sm:$0xff] %v402_v0  ;;  %v408_v3 = vld [vmem:[%s5554_s2 + $0x218] sm:$0xff]  ;;  %s4201_s22 = smov [#allocation2 + $0x5]   ;;  %s4570_s21 = sld [smem:[#allocation8 + $0x6]] }
  0x76   :  { %405 = vst [vmem:[#allocation3 + $0x208] sm:$0xff] %v404_v1  ;;  %407 = vst [vmem:[#allocation3 + $0x210] sm:$0xff] %v406_v2  ;;  %v410_v4 = vld [vmem:[%s5554_s2 + $0x220] sm:$0xff]  ;;  %v412_v5 = vld [vmem:[%s5554_s2 + $0x228] sm:$0xff]  ;;  %s98_s16 = sshll.u32 %s4201_s22, 4  ;;  %s4202_s6 = smov [#allocation2 + $0x6]   ;;  %s4581_s16 = int_to_ptr.vmem [resolvable:$true] %s98_s16 }
  0x77   :  { %409 = vst [vmem:[#allocation3 + $0x218] sm:$0xff] %v408_v3  ;;  %411 = vst [vmem:[#allocation3 + $0x220] sm:$0xff] %v410_v4  ;;  %v414_v6 = vld [vmem:[%s5554_s2 + $0x230] sm:$0xff]  ;;  %v416_v7 = vld [vmem:[%s5554_s2 + $0x238] sm:$0xff]  ;;  %s4592_s18 = sshll.u32 %s4202_s6, 4  ;;  %s4594_s7 = sld [smem:[#allocation8 + $0x7]]  ;;  %s113_s18 = int_to_ptr.vmem [resolvable:$true] %s4592_s18 }
  0x78   :  { %413 = vst [vmem:[#allocation3 + $0x228] sm:$0xff] %v412_v5  ;;  %v418_v8 = vld [vmem:[%s5554_s2 + $0x240] sm:$0xff]  ;;  %415 = vst [vmem:[#allocation3 + $0x230] sm:$0xff] %v414_v6  ;;  %v420_v9 = vld [vmem:[%s5554_s2 + $0x248] sm:$0xff] }
  0x79   :  { %417 = vst [vmem:[#allocation3 + $0x238] sm:$0xff] %v416_v7  ;;  %419 = vst [vmem:[#allocation3 + $0x240] sm:$0xff] %v418_v8  ;;  %v422_v10 = vld [vmem:[%s5554_s2 + $0x250] sm:$0xff]  ;;  %v424_v11 = vld [vmem:[%s5554_s2 + $0x258] sm:$0xff]  ;;  %s75_s22 = sshrl.u32 %s4537_s20, 3  ;;  %s76_s25 = sand.u32 7, %s4537_s20  }
  0x7a   :  { %421 = vst [vmem:[#allocation3 + $0x248] sm:$0xff] %v420_v9  ;;  %423 = vst [vmem:[#allocation3 + $0x250] sm:$0xff] %v422_v10  ;;  %s77_s23 = smul.u32 24, %s75_s22  ;;  %s89_s27 = sshrl.u32 %s4548_s0, 3 }
  0x7b   :  { %425 = vst [vmem:[#allocation3 + $0x258] sm:$0xff] %v424_v11  ;;  %s90_s12 = sand.u32 7, %s4548_s0   ;;  %s91_s14 = smul.u32 24, %s89_s27 }
  0x7c   :  { %s78_s30 = sadd.s32 %s77_s23, %s76_s25  ;;  %s103_s11 = sshrl.u32 %s4570_s21, 3 }
  0x7d   :  { %s3114_s19 = sshll.u32 %s78_s30, 4  ;;  %s92_s29 = sadd.s32 %s91_s14, %s90_s12 }
  0x7e   :  { %s80_s17 = scalar_lea.hbm %s5553_s1, %s3114_s19  ;;  %s3116_s28 = sshll.u32 %s92_s29, 4 }
  0x7f   :  { %s3843_s6 = scalar_lea.hbm %s80_s17, 48  ;;  %p3846_p12 = scmp.lt.u32.totalorder %s80_s17, %s5553_s1 }
  0x80   :  { %p3844_p11 = scmp.ne.s32.totalorder %s80_s17, %s3843_s6  ;;  %p3847_p13 = scmp.lt.u32.totalorder %s4380_s13, %s3843_s6 }
  0x81   :  { %p3849_p1 = scmp.lt.u32.totalorder %s3843_s6, %s80_s17 }
  0x82   :  { %p3848_p0 = por %p3847_p13, %p3846_p12 }
  0x84   :  { %p3850_p2 = por %p3849_p1, %p3848_p0 }
  0x86   :  { %p3851_p3 = pnand %p3850_p2, %p3844_p11 }
  0x88   :  { %3854 = shalt.err (!%p3851_p3)  }
  0x89   :  { %s3855_s20 = scalar_lea.vmem %s4559_s24, 48  ;;  %p3860_p5 = scmp.lt.s32.totalorder %s4559_s24, %s4262_s26 }
  0x8a   :  { %p3856_p4 = scmp.ne.s32.totalorder %s4559_s24, %s3855_s20  ;;  %p3861_p6 = scmp.lt.s32.totalorder %s4391_s8, %s3855_s20 }
  0x8c   :  { %p3862_p7 = por %p3861_p6, %p3860_p5 }
  0x8e   :  { %p3863_p8 = pnand %p3862_p7, %p3856_p4 }
  0x90   :  { %3866 = shalt.err (!%p3863_p8)  }
  0x91   :  { %s5565_s9 = smov 1   ;;  %s5566_s10 = smov 128  }
  0x92   :  { %87 = dma.hbm_to_vmem [thread:$0]  %s80_s17, 48, %s4559_s24, [#allocation5 + $0x4], %s5566_s10, %s5566_s10, %s5565_s9 }
  0x93   :  { %s94_s25 = scalar_lea.hbm %s5553_s1, %s3116_s28  ;;  %s104_s23 = sand.u32 7, %s4570_s21  }
  0x94   :  { %s3867_s27 = scalar_lea.hbm %s94_s25, 48  ;;  %p3870_p10 = scmp.lt.u32.totalorder %s94_s25, %s5553_s1 }
  0x95   :  { %p3868_p9 = scmp.ne.s32.totalorder %s94_s25, %s3867_s27  ;;  %p3871_p11 = scmp.lt.u32.totalorder %s4380_s13, %s3867_s27 }
  0x96   :  { %p3873_p13 = scmp.lt.u32.totalorder %s3867_s27, %s94_s25 }
  0x97   :  { %p3872_p12 = por %p3871_p11, %p3870_p10 }
  0x99   :  { %p3874_p0 = por %p3873_p13, %p3872_p12 }
  0x9b   :  { %p3875_p1 = pnand %p3874_p0, %p3868_p9 }
  0x9d   :  { %3878 = shalt.err (!%p3875_p1)  }
  0x9e   :  { %s3879_s24 = scalar_lea.vmem %s4581_s16, 48  ;;  %p3884_p3 = scmp.lt.s32.totalorder %s4581_s16, %s4262_s26 }
  0x9f   :  { %p3880_p2 = scmp.ne.s32.totalorder %s4581_s16, %s3879_s24  ;;  %p3885_p4 = scmp.lt.s32.totalorder %s4391_s8, %s3879_s24 }
  0xa1   :  { %p3886_p5 = por %p3885_p4, %p3884_p3 }
  0xa3   :  { %p3887_p6 = pnand %p3886_p5, %p3880_p2 }
  0xa5   :  { %3890 = shalt.err (!%p3887_p6)  }
  0xa6   :  { %101 = dma.hbm_to_vmem [thread:$0]  %s94_s25, 48, %s4581_s16, [#allocation5 + $0x5], %s5566_s10, %s5566_s10, %s5565_s9 }
  0xa7   :  { %s105_s30 = smul.u32 24, %s103_s11  ;;  %s117_s19 = sshrl.u32 %s4594_s7, 3 }
  0xa8   :  { %s118_s29 = sand.u32 7, %s4594_s7   ;;  %s119_s15 = smul.u32 24, %s117_s19 }
  0xa9   :  { %s106_s2 = sadd.s32 %s105_s30, %s104_s23 }
  0xaa   :  { %s3118_s17 = sshll.u32 %s106_s2, 4  ;;  %s120_s0 = sadd.s32 %s119_s15, %s118_s29 }
  0xab   :  { %s108_s20 = scalar_lea.hbm %s5553_s1, %s3118_s17 }
  0xac   :  { %s3891_s22 = scalar_lea.hbm %s108_s20, 48  ;;  %p3894_p8 = scmp.lt.u32.totalorder %s108_s20, %s5553_s1 }
  0xad   :  { %p3892_p7 = scmp.ne.s32.totalorder %s108_s20, %s3891_s22  ;;  %p3895_p9 = scmp.lt.u32.totalorder %s4380_s13, %s3891_s22 }
  0xae   :  { %p3897_p11 = scmp.lt.u32.totalorder %s3891_s22, %s108_s20 }
  0xaf   :  { %p3896_p10 = por %p3895_p9, %p3894_p8 }
  0xb1   :  { %p3898_p12 = por %p3897_p11, %p3896_p10 }
  0xb3   :  { %p3899_p13 = pnand %p3898_p12, %p3892_p7 }
  0xb5   :  { %3902 = shalt.err (!%p3899_p13)  }
  0xb6   :  { %s3903_s16 = scalar_lea.vmem %s113_s18, 48  ;;  %p3908_p1 = scmp.lt.s32.totalorder %s113_s18, %s4262_s26 }
  0xb7   :  { %p3904_p0 = scmp.ne.s32.totalorder %s113_s18, %s3903_s16  ;;  %p3909_p2 = scmp.lt.s32.totalorder %s4391_s8, %s3903_s16 }
  0xb9   :  { %p3910_p3 = por %p3909_p2, %p3908_p1 }
  0xbb   :  { %p3911_p4 = pnand %p3910_p3, %p3904_p0 }
  0xbd   :  { %3914 = shalt.err (!%p3911_p4)  }
  0xbe   :  { %115 = dma.hbm_to_vmem [thread:$0]  %s108_s20, 48, %s113_s18, [#allocation5 + $0x6], %s5566_s10, %s5566_s10, %s5565_s9 }
  0xbf   :  { %s3120_s21 = sshll.u32 %s120_s0, 4  ;;  %s4203_s7 = smov [#allocation2 + $0x7]  }
  0xc0   :  { %s126_s11 = sshll.u32 %s4203_s7, 4  ;;  %s122_s14 = scalar_lea.hbm %s5553_s1, %s3120_s21  ;;  %s127_s11 = int_to_ptr.vmem [resolvable:$true] %s126_s11 }
  0xc1   :  { %s3915_s24 = scalar_lea.hbm %s122_s14, 48  ;;  %p3918_p6 = scmp.lt.u32.totalorder %s122_s14, %s5553_s1 }
  0xc2   :  { %p3916_p5 = scmp.ne.s32.totalorder %s122_s14, %s3915_s24  ;;  %p3919_p7 = scmp.lt.u32.totalorder %s4380_s13, %s3915_s24 }
  0xc3   :  { %p3921_p9 = scmp.lt.u32.totalorder %s3915_s24, %s122_s14 }
  0xc4   :  { %p3920_p8 = por %p3919_p7, %p3918_p6 }
  0xc6   :  { %p3922_p10 = por %p3921_p9, %p3920_p8 }
  0xc8   :  { %p3923_p11 = pnand %p3922_p10, %p3916_p5 }
  0xca   :  { %3926 = shalt.err (!%p3923_p11)  }
  0xcb   :  { %s3927_s18 = scalar_lea.vmem %s127_s11, 48  ;;  %p3932_p13 = scmp.lt.s32.totalorder %s127_s11, %s4262_s26 }
  0xcc   :  { %p3928_p12 = scmp.ne.s32.totalorder %s127_s11, %s3927_s18  ;;  %p3933_p0 = scmp.lt.s32.totalorder %s4391_s8, %s3927_s18 }
  0xce   :  { %p3934_p1 = por %p3933_p0, %p3932_p13 }
  0xd0   :  { %p3935_p2 = pnand %p3934_p1, %p3928_p12 }
  0xd2   :  { %3938 = shalt.err (!%p3935_p2)  }
  0xd3   :  { %129 = dma.hbm_to_vmem [thread:$0]  %s122_s14, 48, %s127_s11, [#allocation5 + $0x7], %s5566_s10, %s5566_s10, %s5565_s9 }
  0xd4   :  { %s3121_s29 = sld [smem:[#allocation8 + $0x8]]  ;;  %s4204_s2 = smov [#allocation2 + $0x18]  }
  0xd5   :  { %s140_s15 = sshll.u32 %s4204_s2, 4  ;;  %s3123_s17 = sld [smem:[#allocation8 + $0x9]]  ;;  %s4663_s15 = int_to_ptr.vmem [resolvable:$true] %s140_s15 }
  0xd6   :  { %s4205_s28 = smov [#allocation2 + $0x19]   ;;  %s4665_s20 = sld [smem:[#allocation8 + $0xa]] }
  0xd7   :  { %s154_s6 = sshll.u32 %s4205_s28, 4  ;;  %s4206_s0 = smov [#allocation2 + $0x1a]   ;;  %s4667_s6 = int_to_ptr.vmem [resolvable:$true] %s154_s6 }
  0xd8   :  { %s4669_s22 = sshll.u32 %s4206_s0, 4  ;;  %s4671_s27 = sld [smem:[#allocation8 + $0xb]]  ;;  %s169_s22 = int_to_ptr.vmem [resolvable:$true] %s4669_s22 }
  0xda   :  { %s131_s12 = sshrl.u32 %s3121_s29, 3  ;;  %s132_s16 = sand.u32 7, %s3121_s29  }
  0xdb   :  { %s133_s21 = smul.u32 24, %s131_s12  ;;  %s145_s7 = sshrl.u32 %s3123_s17, 3 }
  0xdc   :  { %s146_s11 = sand.u32 7, %s3123_s17   ;;  %s147_s25 = smul.u32 24, %s145_s7 }
  0xdd   :  { %s134_s23 = sadd.s32 %s133_s21, %s132_s16  ;;  %s159_s14 = sshrl.u32 %s4665_s20, 3 }
  0xde   :  { %s3122_s24 = sshll.u32 %s134_s23, 4  ;;  %s148_s30 = sadd.s32 %s147_s25, %s146_s11 }
  0xdf   :  { %s136_s2 = scalar_lea.hbm %s5553_s1, %s3122_s24  ;;  %s3124_s28 = sshll.u32 %s148_s30, 4 }
  0xe0   :  { %s3939_s0 = scalar_lea.hbm %s136_s2, 48  ;;  %p3942_p4 = scmp.lt.u32.totalorder %s136_s2, %s5553_s1 }
  0xe1   :  { %p3940_p3 = scmp.ne.s32.totalorder %s136_s2, %s3939_s0  ;;  %p3943_p5 = scmp.lt.u32.totalorder %s4380_s13, %s3939_s0 }
  0xe2   :  { %p3945_p7 = scmp.lt.u32.totalorder %s3939_s0, %s136_s2 }
  0xe3   :  { %p3944_p6 = por %p3943_p5, %p3942_p4 }
  0xe5   :  { %p3946_p8 = por %p3945_p7, %p3944_p6 }
  0xe7   :  { %p3947_p9 = pnand %p3946_p8, %p3940_p3 }
  0xe9   :  { %3950 = shalt.err (!%p3947_p9)  }
  0xea   :  { %s3951_s29 = scalar_lea.vmem %s4663_s15, 48  ;;  %p3956_p11 = scmp.lt.s32.totalorder %s4663_s15, %s4262_s26 }
  0xeb   :  { %p3952_p10 = scmp.ne.s32.totalorder %s4663_s15, %s3951_s29  ;;  %p3957_p12 = scmp.lt.s32.totalorder %s4391_s8, %s3951_s29 }
  0xed   :  { %p3958_p13 = por %p3957_p12, %p3956_p11 }
  0xef   :  { %p3959_p0 = pnand %p3958_p13, %p3952_p10 }
  0xf1   :  { %3962 = shalt.err (!%p3959_p0)  }
  0xf2   :  { %143 = dma.hbm_to_vmem [thread:$0]  %s136_s2, 48, %s4663_s15, [#allocation5 + $0x8], %s5566_s10, %s5566_s10, %s5565_s9 }
  0xf3   :  { %s150_s17 = scalar_lea.hbm %s5553_s1, %s3124_s28  ;;  %s160_s12 = sand.u32 7, %s4665_s20  }
  0xf4   :  { %s3963_s16 = scalar_lea.hbm %s150_s17, 48  ;;  %p3966_p2 = scmp.lt.u32.totalorder %s150_s17, %s5553_s1 }
  0xf5   :  { %p3964_p1 = scmp.ne.s32.totalorder %s150_s17, %s3963_s16  ;;  %p3967_p3 = scmp.lt.u32.totalorder %s4380_s13, %s3963_s16 }
  0xf6   :  { %p3969_p5 = scmp.lt.u32.totalorder %s3963_s16, %s150_s17 }
  0xf7   :  { %p3968_p4 = por %p3967_p3, %p3966_p2 }
  0xf9   :  { %p3970_p6 = por %p3969_p5, %p3968_p4 }
  0xfb   :  { %p3971_p7 = pnand %p3970_p6, %p3964_p1 }
  0xfd   :  { %3974 = shalt.err (!%p3971_p7)  }
  0xfe   :  { %s3975_s15 = scalar_lea.vmem %s4667_s6, 48  ;;  %p3980_p9 = scmp.lt.s32.totalorder %s4667_s6, %s4262_s26 }
  0xff   :  { %p3976_p8 = scmp.ne.s32.totalorder %s4667_s6, %s3975_s15  ;;  %p3981_p10 = scmp.lt.s32.totalorder %s4391_s8, %s3975_s15 }
 0x101   :  { %p3982_p11 = por %p3981_p10, %p3980_p9 }
 0x103   :  { %p3983_p12 = pnand %p3982_p11, %p3976_p8 }
 0x105   :  { %3986 = shalt.err (!%p3983_p12)  }
 0x106   :  { %157 = dma.hbm_to_vmem [thread:$0]  %s150_s17, 48, %s4667_s6, [#allocation5 + $0x9], %s5566_s10, %s5566_s10, %s5565_s9 }
 0x107   :  { %s161_s11 = smul.u32 24, %s159_s14  ;;  %s173_s25 = sshrl.u32 %s4671_s27, 3 }
 0x108   :  { %s174_s23 = sand.u32 7, %s4671_s27   ;;  %s175_s30 = smul.u32 24, %s173_s25 }
 0x109   :  { %s162_s24 = sadd.s32 %s161_s11, %s160_s12 }
 0x10a   :  { %s3126_s19 = sshll.u32 %s162_s24, 4  ;;  %s176_s0 = sadd.s32 %s175_s30, %s174_s23 }
 0x10b   :  { %s164_s28 = scalar_lea.hbm %s5553_s1, %s3126_s19 }
 0x10c   :  { %s3987_s29 = scalar_lea.hbm %s164_s28, 48  ;;  %p3990_p0 = scmp.lt.u32.totalorder %s164_s28, %s5553_s1 }
 0x10d   :  { %p3988_p13 = scmp.ne.s32.totalorder %s164_s28, %s3987_s29  ;;  %p3991_p1 = scmp.lt.u32.totalorder %s4380_s13, %s3987_s29 }
 0x10e   :  { %p3993_p3 = scmp.lt.u32.totalorder %s3987_s29, %s164_s28 }
 0x10f   :  { %p3992_p2 = por %p3991_p1, %p3990_p0 }
 0x111   :  { %p3994_p4 = por %p3993_p3, %p3992_p2 }
 0x113   :  { %p3995_p5 = pnand %p3994_p4, %p3988_p13 }
 0x115   :  { %3998 = shalt.err (!%p3995_p5)  }
 0x116   :  { %s3999_s6 = scalar_lea.vmem %s169_s22, 48  ;;  %p4004_p7 = scmp.lt.s32.totalorder %s169_s22, %s4262_s26 }
 0x117   :  { %p4000_p6 = scmp.ne.s32.totalorder %s169_s22, %s3999_s6  ;;  %p4005_p8 = scmp.lt.s32.totalorder %s4391_s8, %s3999_s6 }
 0x119   :  { %p4006_p9 = por %p4005_p8, %p4004_p7 }
 0x11b   :  { %p4007_p10 = pnand %p4006_p9, %p4000_p6 }
 0x11d   :  { %4010 = shalt.err (!%p4007_p10)  }
 0x11e   :  { %171 = dma.hbm_to_vmem [thread:$0]  %s164_s28, 48, %s169_s22, [#allocation5 + $0xa], %s5566_s10, %s5566_s10, %s5565_s9 }
 0x11f   :  { %s3128_s20 = sshll.u32 %s176_s0, 4  ;;  %s4207_s27 = smov [#allocation2 + $0x1b]  }
 0x120   :  { %s182_s14 = sshll.u32 %s4207_s27, 4  ;;  %s178_s16 = scalar_lea.hbm %s5553_s1, %s3128_s20  ;;  %s183_s14 = int_to_ptr.vmem [resolvable:$true] %s182_s14 }
 0x121   :  { %s4011_s21 = scalar_lea.hbm %s178_s16, 48  ;;  %p4014_p12 = scmp.lt.u32.totalorder %s178_s16, %s5553_s1 }
 0x122   :  { %p4012_p11 = scmp.ne.s32.totalorder %s178_s16, %s4011_s21  ;;  %p4015_p13 = scmp.lt.u32.totalorder %s4380_s13, %s4011_s21 }
 0x123   :  { %p4017_p1 = scmp.lt.u32.totalorder %s4011_s21, %s178_s16 }
 0x124   :  { %p4016_p0 = por %p4015_p13, %p4014_p12 }
 0x126   :  { %p4018_p2 = por %p4017_p1, %p4016_p0 }
 0x128   :  { %p4019_p3 = pnand %p4018_p2, %p4012_p11 }
 0x12a   :  { %4022 = shalt.err (!%p4019_p3)  }
 0x12b   :  { %s4023_s22 = scalar_lea.vmem %s183_s14, 48  ;;  %p4028_p5 = scmp.lt.s32.totalorder %s183_s14, %s4262_s26 }
 0x12c   :  { %p4024_p4 = scmp.ne.s32.totalorder %s183_s14, %s4023_s22  ;;  %p4029_p6 = scmp.lt.s32.totalorder %s4391_s8, %s4023_s22 }
 0x12e   :  { %p4030_p7 = por %p4029_p6, %p4028_p5 }
 0x130   :  { %p4031_p8 = pnand %p4030_p7, %p4024_p4 }
 0x132   :  { %4034 = shalt.err (!%p4031_p8)  }
 0x133   :  { %185 = dma.hbm_to_vmem [thread:$0]  %s178_s16, 48, %s183_s14, [#allocation5 + $0xb], %s5566_s10, %s5566_s10, %s5565_s9 }
 0x134   :  { %s3129_s11 = sld [smem:[#allocation8 + $0xc]]  ;;  %s4208_s25 = smov [#allocation2 + $0x1c]  }
 0x135   :  { %s196_s23 = sshll.u32 %s4208_s25, 4  ;;  %s3131_s24 = sld [smem:[#allocation8 + $0xd]]  ;;  %s4736_s23 = int_to_ptr.vmem [resolvable:$true] %s196_s23 }
 0x136   :  { %s4209_s30 = smov [#allocation2 + $0x1d]   ;;  %s4738_s18 = sld [smem:[#allocation8 + $0xe]] }
 0x137   :  { %s210_s19 = sshll.u32 %s4209_s30, 4  ;;  %s4210_s2 = smov [#allocation2 + $0x1e]   ;;  %s4740_s19 = int_to_ptr.vmem [resolvable:$true] %s210_s19 }
 0x138   :  { %s4742_s28 = sshll.u32 %s4210_s2, 4  ;;  %s4744_s0 = sld [smem:[#allocation8 + $0xf]]  ;;  %s225_s28 = int_to_ptr.vmem [resolvable:$true] %s4742_s28 }
 0x13a   :  { %s187_s29 = sshrl.u32 %s3129_s11, 3  ;;  %s188_s4 = sand.u32 7, %s3129_s11  }
 0x13b   :  { %s189_s5 = smul.u32 24, %s187_s29  ;;  %s201_s6 = sshrl.u32 %s3131_s24, 3 }
 0x13c   :  { %s202_s20 = sand.u32 7, %s3131_s24   ;;  %s203_s27 = smul.u32 24, %s201_s6 }
 0x13d   :  { %s190_s14 = sadd.s32 %s189_s5, %s188_s4  ;;  %s215_s17 = sshrl.u32 %s4738_s18, 3 }
 0x13e   :  { %s3130_s12 = sshll.u32 %s190_s14, 4  ;;  %s204_s16 = sadd.s32 %s203_s27, %s202_s20 }
 0x13f   :  { %s192_s15 = scalar_lea.hbm %s5553_s1, %s3130_s12  ;;  %s3132_s22 = sshll.u32 %s204_s16, 4 }
 0x140   :  { %s4035_s25 = scalar_lea.hbm %s192_s15, 48  ;;  %p4038_p10 = scmp.lt.u32.totalorder %s192_s15, %s5553_s1 }
 0x141   :  { %p4036_p9 = scmp.ne.s32.totalorder %s192_s15, %s4035_s25  ;;  %p4039_p11 = scmp.lt.u32.totalorder %s4380_s13, %s4035_s25 }
 0x142   :  { %p4041_p13 = scmp.lt.u32.totalorder %s4035_s25, %s192_s15 }
 0x143   :  { %p4040_p12 = por %p4039_p11, %p4038_p10 }
 0x145   :  { %p4042_p0 = por %p4041_p13, %p4040_p12 }
 0x147   :  { %p4043_p1 = pnand %p4042_p0, %p4036_p9 }
 0x149   :  { %4046 = shalt.err (!%p4043_p1)  }
 0x14a   :  { %s4047_s11 = scalar_lea.vmem %s4736_s23, 48  ;;  %p4052_p3 = scmp.lt.s32.totalorder %s4736_s23, %s4262_s26 }
 0x14b   :  { %p4048_p2 = scmp.ne.s32.totalorder %s4736_s23, %s4047_s11  ;;  %p4053_p4 = scmp.lt.s32.totalorder %s4391_s8, %s4047_s11 }
 0x14d   :  { %p4054_p5 = por %p4053_p4, %p4052_p3 }
 0x14f   :  { %p4055_p6 = pnand %p4054_p5, %p4048_p2 }
 0x151   :  { %4058 = shalt.err (!%p4055_p6)  }
 0x152   :  { %199 = dma.hbm_to_vmem [thread:$0]  %s192_s15, 48, %s4736_s23, [#allocation5 + $0xc], %s5566_s10, %s5566_s10, %s5565_s9 }
 0x153   :  { %s206_s4 = scalar_lea.hbm %s5553_s1, %s3132_s22  ;;  %s216_s5 = sand.u32 7, %s4738_s18  }
 0x154   :  { %s4059_s6 = scalar_lea.hbm %s206_s4, 48  ;;  %p4062_p8 = scmp.lt.u32.totalorder %s206_s4, %s5553_s1 }
 0x155   :  { %p4060_p7 = scmp.ne.s32.totalorder %s206_s4, %s4059_s6  ;;  %p4063_p9 = scmp.lt.u32.totalorder %s4380_s13, %s4059_s6 }
 0x156   :  { %p4065_p11 = scmp.lt.u32.totalorder %s4059_s6, %s206_s4 }
 0x157   :  { %p4064_p10 = por %p4063_p9, %p4062_p8 }
 0x159   :  { %p4066_p12 = por %p4065_p11, %p4064_p10 }
 0x15b   :  { %p4067_p13 = pnand %p4066_p12, %p4060_p7 }
 0x15d   :  { %4070 = shalt.err (!%p4067_p13)  }
 0x15e   :  { %s4071_s23 = scalar_lea.vmem %s4740_s19, 48  ;;  %p4076_p1 = scmp.lt.s32.totalorder %s4740_s19, %s4262_s26 }
 0x15f   :  { %p4072_p0 = scmp.ne.s32.totalorder %s4740_s19, %s4071_s23  ;;  %p4077_p2 = scmp.lt.s32.totalorder %s4391_s8, %s4071_s23 }
 0x161   :  { %p4078_p3 = por %p4077_p2, %p4076_p1 }
 0x163   :  { %p4079_p4 = pnand %p4078_p3, %p4072_p0 }
 0x165   :  { %4082 = shalt.err (!%p4079_p4)  }
 0x166   :  { %213 = dma.hbm_to_vmem [thread:$0]  %s206_s4, 48, %s4740_s19, [#allocation5 + $0xd], %s5566_s10, %s5566_s10, %s5565_s9 }
 0x167   :  { %s217_s14 = smul.u32 24, %s215_s17  ;;  %s229_s12 = sshrl.u32 %s4744_s0, 3 }
 0x168   :  { %s230_s16 = sand.u32 7, %s4744_s0   ;;  %s231_s7 = smul.u32 24, %s229_s12 }
 0x169   :  { %s218_s21 = sadd.s32 %s217_s14, %s216_s5 }
 0x16a   :  { %s3134_s15 = sshll.u32 %s218_s21, 4  ;;  %s232_s2 = sadd.s32 %s231_s7, %s230_s16 }
 0x16b   :  { %s220_s30 = scalar_lea.hbm %s5553_s1, %s3134_s15 }
 0x16c   :  { %s4083_s11 = scalar_lea.hbm %s220_s30, 48  ;;  %p4086_p6 = scmp.lt.u32.totalorder %s220_s30, %s5553_s1 }
 0x16d   :  { %p4084_p5 = scmp.ne.s32.totalorder %s220_s30, %s4083_s11  ;;  %p4087_p7 = scmp.lt.u32.totalorder %s4380_s13, %s4083_s11 }
 0x16e   :  { %p4089_p9 = scmp.lt.u32.totalorder %s4083_s11, %s220_s30 }
 0x16f   :  { %p4088_p8 = por %p4087_p7, %p4086_p6 }
 0x171   :  { %p4090_p10 = por %p4089_p9, %p4088_p8 }
 0x173   :  { %p4091_p11 = pnand %p4090_p10, %p4084_p5 }
 0x175   :  { %4094 = shalt.err (!%p4091_p11)  }
 0x176   :  { %s4095_s19 = scalar_lea.vmem %s225_s28, 48  ;;  %p4100_p13 = scmp.lt.s32.totalorder %s225_s28, %s4262_s26 }
 0x177   :  { %p4096_p12 = scmp.ne.s32.totalorder %s225_s28, %s4095_s19  ;;  %p4101_p0 = scmp.lt.s32.totalorder %s4391_s8, %s4095_s19 }
 0x179   :  { %p4102_p1 = por %p4101_p0, %p4100_p13 }
 0x17b   :  { %p4103_p2 = pnand %p4102_p1, %p4096_p12 }
 0x17d   :  { %4106 = shalt.err (!%p4103_p2)  }
 0x17e   :  { %227 = dma.hbm_to_vmem [thread:$0]  %s220_s30, 48, %s225_s28, [#allocation5 + $0xe], %s5566_s10, %s5566_s10, %s5565_s9 }
 0x17f   :  { %s3136_s18 = sshll.u32 %s232_s2, 4  ;;  %s4211_s0 = smov [#allocation2 + $0x1f]  }
 0x180   :  { %s238_s17 = sshll.u32 %s4211_s0, 4  ;;  %s234_s6 = scalar_lea.hbm %s5553_s1, %s3136_s18  ;;  %s239_s17 = int_to_ptr.vmem [resolvable:$true] %s238_s17 }
 0x181   :  { %s4107_s20 = scalar_lea.hbm %s234_s6, 48  ;;  %p4110_p4 = scmp.lt.u32.totalorder %s234_s6, %s5553_s1 }
 0x182   :  { %p4108_p3 = scmp.ne.s32.totalorder %s234_s6, %s4107_s20  ;;  %p4111_p5 = scmp.lt.u32.totalorder %s4380_s13, %s4107_s20 }
 0x183   :  { %p4113_p7 = scmp.lt.u32.totalorder %s4107_s20, %s234_s6 }
 0x184   :  { %p4112_p6 = por %p4111_p5, %p4110_p4 }
 0x186   :  { %p4114_p8 = por %p4113_p7, %p4112_p6 }
 0x188   :  { %p4115_p9 = pnand %p4114_p8, %p4108_p3 }
 0x18a   :  { %4118 = shalt.err (!%p4115_p9)  }
 0x18b   :  { %s4119_s28 = scalar_lea.vmem %s239_s17, 48  ;;  %p4124_p11 = scmp.lt.s32.totalorder %s239_s17, %s4262_s26 }
 0x18c   :  { %p4120_p10 = scmp.ne.s32.totalorder %s239_s17, %s4119_s28  ;;  %p4125_p12 = scmp.lt.s32.totalorder %s4391_s8, %s4119_s28 }
 0x18e   :  { %p4126_p13 = por %p4125_p12, %p4124_p11 }
 0x190   :  { %p4127_p0 = pnand %p4126_p13, %p4120_p10 }
 0x192   :  { %4130 = shalt.err (!%p4127_p0)  }
 0x193   :  { %241 = dma.hbm_to_vmem [thread:$0]  %s234_s6, 48, %s239_s17, [#allocation5 + $0xf], %s5566_s10, %s5566_s10, %s5565_s9 }
 0x194   :  { %433 = vsyncadd [#allocation6], 9728  ;;  %v452_v12 = vld [vmem:[%s5555_s3] sm:$0xf]  ;;  %v454_v13 = vld [vmem:[%s5555_s3 + $0x10] sm:$0xf] }
 0x195   :  { %453 = vst [vmem:[#allocation4] sm:$0xf] %v452_v12  ;;  %455 = vst [vmem:[#allocation4 + $0x4] sm:$0xf] %v454_v13  ;;  %v456_v14 = vld [vmem:[%s5555_s3 + $0x4] sm:$0xf] }
 0x196   :  { %v458_v15 = vld [vmem:[%s5555_s3 + $0x14] sm:$0xf]  ;;  %v460_v16 = vld [vmem:[%s5555_s3 + $0x8] sm:$0xf]  ;;  %457 = vst [vmem:[#allocation4 + $0x8] sm:$0xf] %v456_v14 }
 0x197   :  { %459 = vst [vmem:[#allocation4 + $0xc] sm:$0xf] %v458_v15  ;;  %461 = vst [vmem:[#allocation4 + $0x10] sm:$0xf] %v460_v16  ;;  %v462_v17 = vld [vmem:[%s5555_s3 + $0x18] sm:$0xf] }
 0x198   :  { %v464_v18 = vld [vmem:[%s5555_s3 + $0xc] sm:$0xf]  ;;  %v466_v19 = vld [vmem:[%s5555_s3 + $0x1c] sm:$0xff]   ;;  %463 = vst [vmem:[#allocation4 + $0x14] sm:$0xf] %v462_v17 }
 0x199   :  { %465 = vst [vmem:[#allocation4 + $0x18] sm:$0xf] %v464_v18  ;;  %467 = vst [vmem:[#allocation4 + $0x1c] sm:$0xff] %v466_v19   ;;  %v470_v20 = vld [vmem:[%s5555_s3 + $0x30] sm:$0xf]  ;;  %v482_v26 = vld [vmem:[%s5555_s3 + $0x3c] sm:$0xff]  }
 0x19a   :  { %v472_v21 = vld [vmem:[%s5555_s3 + $0x24] sm:$0xf]  ;;  %v474_v22 = vld [vmem:[%s5555_s3 + $0x34] sm:$0xf]  ;;  %471 = vst [vmem:[#allocation4 + $0x24] sm:$0xf] %v470_v20 }
 0x19b   :  { %473 = vst [vmem:[#allocation4 + $0x28] sm:$0xf] %v472_v21  ;;  %475 = vst [vmem:[#allocation4 + $0x2c] sm:$0xf] %v474_v22  ;;  %v476_v23 = vld [vmem:[%s5555_s3 + $0x28] sm:$0xf] }
 0x19c   :  { %v478_v24 = vld [vmem:[%s5555_s3 + $0x38] sm:$0xf]  ;;  %v480_v25 = vld [vmem:[%s5555_s3 + $0x2c] sm:$0xf]  ;;  %477 = vst [vmem:[#allocation4 + $0x30] sm:$0xf] %v476_v23 }
 0x19d   :  { %479 = vst [vmem:[#allocation4 + $0x34] sm:$0xf] %v478_v24  ;;  %481 = vst [vmem:[#allocation4 + $0x38] sm:$0xf] %v480_v25  ;;  %v486_v27 = vld [vmem:[%s5555_s3 + $0x50] sm:$0xf] }
 0x19e   :  { %v488_v28 = vld [vmem:[%s5555_s3 + $0x44] sm:$0xf]  ;;  %483 = vst [vmem:[#allocation4 + $0x3c] sm:$0xff] %v482_v26   ;;  %487 = vst [vmem:[#allocation4 + $0x44] sm:$0xf] %v486_v27  ;;  %v498_v33 = vld [vmem:[%s5555_s3 + $0x5c] sm:$0xff]  }
 0x19f   :  { %489 = vst [vmem:[#allocation4 + $0x48] sm:$0xf] %v488_v28  ;;  %v490_v29 = vld [vmem:[%s5555_s3 + $0x54] sm:$0xf]  ;;  %v492_v30 = vld [vmem:[%s5555_s3 + $0x48] sm:$0xf] }
 0x1a0   :  { %v494_v31 = vld [vmem:[%s5555_s3 + $0x58] sm:$0xf]  ;;  %491 = vst [vmem:[#allocation4 + $0x4c] sm:$0xf] %v490_v29  ;;  %493 = vst [vmem:[#allocation4 + $0x50] sm:$0xf] %v492_v30 }
 0x1a1   :  { %495 = vst [vmem:[#allocation4 + $0x54] sm:$0xf] %v494_v31  ;;  %v496_v32 = vld [vmem:[%s5555_s3 + $0x4c] sm:$0xf]  ;;  %v502_v34 = vld [vmem:[%s5555_s3 + $0x70] sm:$0xf] }
 0x1a2   :  { %497 = vst [vmem:[#allocation4 + $0x58] sm:$0xf] %v496_v32  ;;  %499 = vst [vmem:[#allocation4 + $0x5c] sm:$0xff] %v498_v33   ;;  %v504_v35 = vld [vmem:[%s5555_s3 + $0x64] sm:$0xf]  ;;  %v514_v40 = vld [vmem:[%s5555_s3 + $0x7c] sm:$0xff]  }
 0x1a3   :  { %503 = vst [vmem:[#allocation4 + $0x64] sm:$0xf] %v502_v34  ;;  %v506_v36 = vld [vmem:[%s5555_s3 + $0x74] sm:$0xf]  ;;  %v508_v37 = vld [vmem:[%s5555_s3 + $0x68] sm:$0xf] }
 0x1a4   :  { %505 = vst [vmem:[#allocation4 + $0x68] sm:$0xf] %v504_v35  ;;  %507 = vst [vmem:[#allocation4 + $0x6c] sm:$0xf] %v506_v36  ;;  %v510_v38 = vld [vmem:[%s5555_s3 + $0x78] sm:$0xf] }
 0x1a5   :  { %509 = vst [vmem:[#allocation4 + $0x70] sm:$0xf] %v508_v37  ;;  %v512_v39 = vld [vmem:[%s5555_s3 + $0x6c] sm:$0xf]  ;;  %511 = vst [vmem:[#allocation4 + $0x74] sm:$0xf] %v510_v38 }
 0x1a6   :  { %513 = vst [vmem:[#allocation4 + $0x78] sm:$0xf] %v512_v39  ;;  %515 = vst [vmem:[#allocation4 + $0x7c] sm:$0xff] %v514_v40   ;;  %v518_v41 = vld [vmem:[%s5555_s3 + $0x90] sm:$0xf]  ;;  %v530_v47 = vld [vmem:[%s5555_s3 + $0x9c] sm:$0xff]  }
 0x1a7   :  { %v520_v42 = vld [vmem:[%s5555_s3 + $0x84] sm:$0xf]  ;;  %v522_v43 = vld [vmem:[%s5555_s3 + $0x94] sm:$0xf]  ;;  %519 = vst [vmem:[#allocation4 + $0x84] sm:$0xf] %v518_v41 }
 0x1a8   :  { %521 = vst [vmem:[#allocation4 + $0x88] sm:$0xf] %v520_v42  ;;  %523 = vst [vmem:[#allocation4 + $0x8c] sm:$0xf] %v522_v43  ;;  %v524_v44 = vld [vmem:[%s5555_s3 + $0x88] sm:$0xf] }
 0x1a9   :  { %v526_v45 = vld [vmem:[%s5555_s3 + $0x98] sm:$0xf]  ;;  %v528_v46 = vld [vmem:[%s5555_s3 + $0x8c] sm:$0xf]  ;;  %525 = vst [vmem:[#allocation4 + $0x90] sm:$0xf] %v524_v44 }
 0x1aa   :  { %527 = vst [vmem:[#allocation4 + $0x94] sm:$0xf] %v526_v45  ;;  %529 = vst [vmem:[#allocation4 + $0x98] sm:$0xf] %v528_v46  ;;  %v534_v48 = vld [vmem:[%s5555_s3 + $0xb0] sm:$0xf] }
 0x1ab   :  { %v536_v49 = vld [vmem:[%s5555_s3 + $0xa4] sm:$0xf]  ;;  %531 = vst [vmem:[#allocation4 + $0x9c] sm:$0xff] %v530_v47   ;;  %535 = vst [vmem:[#allocation4 + $0xa4] sm:$0xf] %v534_v48  ;;  %v546_v54 = vld [vmem:[%s5555_s3 + $0xbc] sm:$0xff]  }
 0x1ac   :  { %537 = vst [vmem:[#allocation4 + $0xa8] sm:$0xf] %v536_v49  ;;  %v538_v50 = vld [vmem:[%s5555_s3 + $0xb4] sm:$0xf]  ;;  %v540_v51 = vld [vmem:[%s5555_s3 + $0xa8] sm:$0xf] }
 0x1ad   :  { %v542_v52 = vld [vmem:[%s5555_s3 + $0xb8] sm:$0xf]  ;;  %539 = vst [vmem:[#allocation4 + $0xac] sm:$0xf] %v538_v50  ;;  %541 = vst [vmem:[#allocation4 + $0xb0] sm:$0xf] %v540_v51 }
 0x1ae   :  { %543 = vst [vmem:[#allocation4 + $0xb4] sm:$0xf] %v542_v52  ;;  %v544_v53 = vld [vmem:[%s5555_s3 + $0xac] sm:$0xf]  ;;  %v550_v55 = vld [vmem:[%s5555_s3 + $0xd0] sm:$0xf] }
 0x1af   :  { %545 = vst [vmem:[#allocation4 + $0xb8] sm:$0xf] %v544_v53  ;;  %547 = vst [vmem:[#allocation4 + $0xbc] sm:$0xff] %v546_v54   ;;  %v552_v56 = vld [vmem:[%s5555_s3 + $0xc4] sm:$0xf]  ;;  %v562_v61 = vld [vmem:[%s5555_s3 + $0xdc] sm:$0xff]  }
 0x1b0   :  { %551 = vst [vmem:[#allocation4 + $0xc4] sm:$0xf] %v550_v55  ;;  %v554_v57 = vld [vmem:[%s5555_s3 + $0xd4] sm:$0xf]  ;;  %v556_v58 = vld [vmem:[%s5555_s3 + $0xc8] sm:$0xf] }
 0x1b1   :  { %553 = vst [vmem:[#allocation4 + $0xc8] sm:$0xf] %v552_v56  ;;  %555 = vst [vmem:[#allocation4 + $0xcc] sm:$0xf] %v554_v57  ;;  %v558_v59 = vld [vmem:[%s5555_s3 + $0xd8] sm:$0xf] }
 0x1b2   :  { %557 = vst [vmem:[#allocation4 + $0xd0] sm:$0xf] %v556_v58  ;;  %v560_v60 = vld [vmem:[%s5555_s3 + $0xcc] sm:$0xf]  ;;  %559 = vst [vmem:[#allocation4 + $0xd4] sm:$0xf] %v558_v59 }
 0x1b3   :  { %561 = vst [vmem:[#allocation4 + $0xd8] sm:$0xf] %v560_v60  ;;  %563 = vst [vmem:[#allocation4 + $0xdc] sm:$0xff] %v562_v61   ;;  %v566_v62 = vld [vmem:[%s5555_s3 + $0xf0] sm:$0xf] }
 0x1b4   :  { %v568_v63 = vld [vmem:[%s5555_s3 + $0xe4] sm:$0xf]  ;;  %v570_v0 = vld [vmem:[%s5555_s3 + $0xf4] sm:$0xf]  ;;  %567 = vst [vmem:[#allocation4 + $0xe4] sm:$0xf] %v566_v62 }
 0x1b5   :  { %569 = vst [vmem:[#allocation4 + $0xe8] sm:$0xf] %v568_v63  ;;  %571 = vst [vmem:[#allocation4 + $0xec] sm:$0xf] %v570_v0  ;;  %v572_v1 = vld [vmem:[%s5555_s3 + $0xe8] sm:$0xf] }
 0x1b6   :  { %v574_v2 = vld [vmem:[%s5555_s3 + $0xf8] sm:$0xf]  ;;  %v576_v3 = vld [vmem:[%s5555_s3 + $0xec] sm:$0xf]  ;;  %573 = vst [vmem:[#allocation4 + $0xf0] sm:$0xf] %v572_v1 }
 0x1b7   :  { %575 = vst [vmem:[#allocation4 + $0xf4] sm:$0xf] %v574_v2  ;;  %577 = vst [vmem:[#allocation4 + $0xf8] sm:$0xf] %v576_v3  ;;  %v578_v4 = vld [vmem:[%s5555_s3 + $0xfc] sm:$0xf] }
 0x1b8   :  { %579 = vst [vmem:[#allocation4 + $0xfc] sm:$0xf] %v578_v4 }
 0x1b9   :  { %738 = vsyncadd [#allocation6 + $0x1], 4096 }
 0x1ba   :  { %4155 = dma.done.wait [#allocation5], 48 }
 0x1bb   :  { %4156 = vsyncadd [#allocation5], 4294967248 }
 0x1bc   :  { %4157 = dma.done.wait [#allocation5 + $0x1], 48 }
 0x1bd   :  { %4158 = vsyncadd [#allocation5 + $0x1], 4294967248 }
 0x1be   :  { %4159 = dma.done.wait [#allocation5 + $0x2], 48 }
 0x1bf   :  { %4160 = vsyncadd [#allocation5 + $0x2], 4294967248 }
 0x1c0   :  { %4161 = dma.done.wait [#allocation5 + $0x3], 48 }
 0x1c1   :  { %4162 = vsyncadd [#allocation5 + $0x3], 4294967248 }
 0x1c2   :  { %4163 = dma.done.wait [#allocation5 + $0x4], 48 }
 0x1c3   :  { %4164 = vsyncadd [#allocation5 + $0x4], 4294967248 }
 0x1c4   :  { %4165 = dma.done.wait [#allocation5 + $0x5], 48 }
 0x1c5   :  { %4166 = vsyncadd [#allocation5 + $0x5], 4294967248 }
 0x1c6   :  { %4167 = dma.done.wait [#allocation5 + $0x6], 48 }
 0x1c7   :  { %4168 = vsyncadd [#allocation5 + $0x6], 4294967248 }
 0x1c8   :  { %4169 = dma.done.wait [#allocation5 + $0x7], 48 }
 0x1c9   :  { %4170 = vsyncadd [#allocation5 + $0x7], 4294967248 }
 0x1ca   :  { %4171 = dma.done.wait [#allocation5 + $0x8], 48 }
 0x1cb   :  { %4172 = vsyncadd [#allocation5 + $0x8], 4294967248 }
 0x1cc   :  { %4173 = dma.done.wait [#allocation5 + $0x9], 48 }
 0x1cd   :  { %4174 = vsyncadd [#allocation5 + $0x9], 4294967248 }
 0x1ce   :  { %4175 = dma.done.wait [#allocation5 + $0xa], 48 }
 0x1cf   :  { %4176 = vsyncadd [#allocation5 + $0xa], 4294967248 }
 0x1d0   :  { %4177 = dma.done.wait [#allocation5 + $0xb], 48 }
 0x1d1   :  { %4178 = vsyncadd [#allocation5 + $0xb], 4294967248 }
 0x1d2   :  { %4179 = dma.done.wait [#allocation5 + $0xc], 48 }
 0x1d3   :  { %4180 = vsyncadd [#allocation5 + $0xc], 4294967248 }
 0x1d4   :  { %4181 = dma.done.wait [#allocation5 + $0xd], 48 }
 0x1d5   :  { %4182 = vsyncadd [#allocation5 + $0xd], 4294967248 }
 0x1d6   :  { %4183 = dma.done.wait [#allocation5 + $0xe], 48 }
 0x1d7   :  { %4184 = vsyncadd [#allocation5 + $0xe], 4294967248 }
 0x1d8   :  { %4185 = dma.done.wait [#allocation5 + $0xf], 48 }
 0x1d9   :  { %4186 = vsyncadd [#allocation5 + $0xf], 4294967248  ;;  %v772_v5 = vld [vmem:[#allocation2] sm:$0xff]  ;;  %v773_v6 = vld [vmem:[#allocation2 + $0x8] sm:$0xff] }
 0x1da   :  { %v774_v7 = vld [vmem:[#allocation2 + $0x10] sm:$0xff]  ;;  %v775_v8 = vld [vmem:[#allocation2 + $0x18] sm:$0xff]  ;;  %3321 = vtanh.f32 %v772_v5  ;;  %v776_v9 = vld [vmem:[#allocation2 + $0x20] sm:$0xff] }
 0x1db   :  { %3323 = vtanh.f32 %v773_v6  ;;  %v777_v10 = vld [vmem:[#allocation2 + $0x28] sm:$0xff] }
 0x1dc   :  { %3325 = vtanh.f32 %v774_v7 }
 0x1dd   :  { %3327 = vtanh.f32 %v775_v8 }
 0x1de   :  { %3329 = vtanh.f32 %v776_v9 }
 0x1df   :  { %3331 = vtanh.f32 %v777_v10 }
 0x1e4   :  { %v3322_v11 = vpop.eup %3321 }
 0x1e5   :  { %v3324_v12 = vpop.eup %3323 }
 0x1e6   :  { %v3326_v13 = vpop.eup %3325 }
 0x1e7   :  { %v3328_v14 = vpop.eup %3327 }
 0x1e8   :  { %v3330_v15 = vpop.eup %3329  ;;  %v4980_v16 = vpack.c.bf16 %v3328_v14, %v3322_v11 }
 0x1e9   :  { %v3332_v17 = vpop.eup %3331  ;;  %v785_v18 = vpack.c.bf16 %v3330_v15, %v3324_v12 }
 0x1ea   :  { %v4982_v19 = vpack.c.bf16 %v3332_v17, %v3326_v13 }
 0x1eb   :  { %4187 = dma.done.wait [#allocation6], 9728 }
 0x1ec   :  { %4188 = vsyncadd [#allocation6], 4294957568  ;;  %1314 = vmatprep.mubr.bf16.mxu0 %v785_v18  ;;  %1400 = vmatprep.mubr.bf16.mxu1 %v785_v18  ;;  %v3333_v20 = vld [vmem:[#allocation3 + $0x4] ss:$16 sps:$4 sm:$0xff]   ;;  %v3335_v21 = vld [vmem:[#allocation3 + $0xc] ss:$16 sps:$4 sm:$0xff]  }
 0x1ed   :  { %1282 = vmatprep.subr.bf16.mxu0 %v3333_v20  ;;  %v3337_v22 = vld [vmem:[#allocation3] ss:$16 sps:$4 sm:$0xff]   ;;  %v3338_v23 = vld [vmem:[#allocation3 + $0x8] ss:$16 sps:$4 sm:$0xff]   ;;  %1368 = vmatprep.subr.bf16.mxu1 %v3335_v21  ;;  %v3339_v24 = vld [vmem:[#allocation3 + $0x24] ss:$16 sps:$4 sm:$0xff]  }
 0x1ee   :  { %1283 = vmatpush1.bf16.msra.mxu0 %v3337_v22  ;;  %1369 = vmatpush1.bf16.msra.mxu1 %v3338_v23  ;;  %v3341_v25 = vld [vmem:[#allocation3 + $0x2c] ss:$16 sps:$4 sm:$0xff]   ;;  %v3343_v26 = vld [vmem:[#allocation3 + $0x20] ss:$16 sps:$4 sm:$0xff]   ;;  %v3344_v27 = vld [vmem:[#allocation3 + $0x28] ss:$16 sps:$4 sm:$0xff]  }
 0x1ef   :  { %1284 = vmatprep.subr.bf16.mxu0 %v3339_v24  ;;  %1370 = vmatprep.subr.bf16.mxu1 %v3341_v25  ;;  %v3345_v28 = vld [vmem:[#allocation3 + $0x44] ss:$16 sps:$4 sm:$0xff]   ;;  %v3347_v29 = vld [vmem:[#allocation3 + $0x4c] ss:$16 sps:$4 sm:$0xff]   ;;  %v3349_v30 = vld [vmem:[#allocation3 + $0x40] ss:$16 sps:$4 sm:$0xff]  }
 0x1f0   :  { %v3350_v31 = vld [vmem:[#allocation3 + $0x48] ss:$16 sps:$4 sm:$0xff]   ;;  %v3351_v32 = vld [vmem:[#allocation3 + $0x64] ss:$16 sps:$4 sm:$0xff]   ;;  %v3353_v33 = vld [vmem:[#allocation3 + $0x6c] ss:$16 sps:$4 sm:$0xff]  }
 0x1f1   :  { %v3355_v34 = vld [vmem:[#allocation3 + $0x60] ss:$16 sps:$4 sm:$0xff]   ;;  %v3356_v35 = vld [vmem:[#allocation3 + $0x68] ss:$16 sps:$4 sm:$0xff]   ;;  %v3357_v36 = vld [vmem:[#allocation3 + $0x84] ss:$16 sps:$4 sm:$0xff]  }
 0x1f2   :  { %1285 = vmatpush1.bf16.msra.mxu0 %v3343_v26  ;;  %1371 = vmatpush1.bf16.msra.mxu1 %v3344_v27  ;;  %v3359_v37 = vld [vmem:[#allocation3 + $0x8c] ss:$16 sps:$4 sm:$0xff]   ;;  %v3361_v38 = vld [vmem:[#allocation3 + $0x80] ss:$16 sps:$4 sm:$0xff]   ;;  %v3362_v39 = vld [vmem:[#allocation3 + $0x88] ss:$16 sps:$4 sm:$0xff]  }
 0x1f3   :  { %1286 = vmatprep.subr.bf16.mxu0 %v3345_v28  ;;  %1372 = vmatprep.subr.bf16.mxu1 %v3347_v29  ;;  %v3363_v40 = vld [vmem:[#allocation3 + $0xa4] ss:$16 sps:$4 sm:$0xff]   ;;  %v3365_v41 = vld [vmem:[#allocation3 + $0xac] ss:$16 sps:$4 sm:$0xff]   ;;  %v3367_v42 = vld [vmem:[#allocation3 + $0xa0] ss:$16 sps:$4 sm:$0xff]  }
 0x1f4   :  { %v3368_v43 = vld [vmem:[#allocation3 + $0xa8] ss:$16 sps:$4 sm:$0xff]   ;;  %v3369_v44 = vld [vmem:[#allocation3 + $0xc4] ss:$16 sps:$4 sm:$0xff]   ;;  %v3371_v45 = vld [vmem:[#allocation3 + $0xcc] ss:$16 sps:$4 sm:$0xff]  }
 0x1f5   :  { %v3373_v46 = vld [vmem:[#allocation3 + $0xc0] ss:$16 sps:$4 sm:$0xff]   ;;  %v3374_v47 = vld [vmem:[#allocation3 + $0xc8] ss:$16 sps:$4 sm:$0xff]   ;;  %v3375_v48 = vld [vmem:[#allocation3 + $0xe4] ss:$16 sps:$4 sm:$0xff]  }
 0x1f6   :  { %1287 = vmatpush1.bf16.msra.mxu0 %v3349_v30  ;;  %1373 = vmatpush1.bf16.msra.mxu1 %v3350_v31  ;;  %v3377_v49 = vld [vmem:[#allocation3 + $0xec] ss:$16 sps:$4 sm:$0xff]   ;;  %v3379_v50 = vld [vmem:[#allocation3 + $0xe0] ss:$16 sps:$4 sm:$0xff]   ;;  %v3380_v51 = vld [vmem:[#allocation3 + $0xe8] ss:$16 sps:$4 sm:$0xff]  }
 0x1f7   :  { %1288 = vmatprep.subr.bf16.mxu0 %v3351_v32  ;;  %1374 = vmatprep.subr.bf16.mxu1 %v3353_v33  ;;  %v3381_v52 = vld [vmem:[#allocation3 + $0x104] ss:$16 sps:$4 sm:$0xff]   ;;  %v3383_v53 = vld [vmem:[#allocation3 + $0x10c] ss:$16 sps:$4 sm:$0xff]   ;;  %v3385_v54 = vld [vmem:[#allocation3 + $0x100] ss:$16 sps:$4 sm:$0xff]  }
 0x1f8   :  { %v3386_v55 = vld [vmem:[#allocation3 + $0x108] ss:$16 sps:$4 sm:$0xff]   ;;  %v3387_v56 = vld [vmem:[#allocation3 + $0x124] ss:$16 sps:$4 sm:$0xff]   ;;  %v3389_v57 = vld [vmem:[#allocation3 + $0x12c] ss:$16 sps:$4 sm:$0xff]  }
 0x1f9   :  { %v3391_v58 = vld [vmem:[#allocation3 + $0x120] ss:$16 sps:$4 sm:$0xff]   ;;  %v3392_v59 = vld [vmem:[#allocation3 + $0x128] ss:$16 sps:$4 sm:$0xff]   ;;  %v3393_v60 = vld [vmem:[#allocation3 + $0x144] ss:$16 sps:$4 sm:$0xff]  }
 0x1fa   :  { %1289 = vmatpush1.bf16.msra.mxu0 %v3355_v34  ;;  %1375 = vmatpush1.bf16.msra.mxu1 %v3356_v35  ;;  %v3395_v61 = vld [vmem:[#allocation3 + $0x14c] ss:$16 sps:$4 sm:$0xff]   ;;  %v3397_v62 = vld [vmem:[#allocation3 + $0x140] ss:$16 sps:$4 sm:$0xff]   ;;  %v3398_v63 = vld [vmem:[#allocation3 + $0x148] ss:$16 sps:$4 sm:$0xff]  }
 0x1fb   :  { %1290 = vmatprep.subr.bf16.mxu0 %v3357_v36  ;;  %1376 = vmatprep.subr.bf16.mxu1 %v3359_v37  ;;  %v3399_v0 = vld [vmem:[#allocation3 + $0x164] ss:$16 sps:$4 sm:$0xff]   ;;  %v3401_v1 = vld [vmem:[#allocation3 + $0x16c] ss:$16 sps:$4 sm:$0xff]   ;;  %v3403_v2 = vld [vmem:[#allocation3 + $0x160] ss:$16 sps:$4 sm:$0xff]   ;;  %v869_v36 = vlaneseq }
 0x1fc   :  { %v3404_v3 = vld [vmem:[#allocation3 + $0x168] ss:$16 sps:$4 sm:$0xff]   ;;  %v3405_v4 = vld [vmem:[#allocation3 + $0x184] ss:$16 sps:$4 sm:$0xff]   ;;  %v3407_v5 = vld [vmem:[#allocation3 + $0x18c] ss:$16 sps:$4 sm:$0xff]  }
 0x1fd   :  { %v3409_v6 = vld [vmem:[#allocation3 + $0x180] ss:$16 sps:$4 sm:$0xff]   ;;  %v3410_v7 = vld [vmem:[#allocation3 + $0x188] ss:$16 sps:$4 sm:$0xff]   ;;  %v3411_v8 = vld [vmem:[#allocation3 + $0x1a4] ss:$16 sps:$4 sm:$0xff]  }
 0x1fe   :  { %1291 = vmatpush1.bf16.msra.mxu0 %v3361_v38  ;;  %1377 = vmatpush1.bf16.msra.mxu1 %v3362_v39  ;;  %v3413_v9 = vld [vmem:[#allocation3 + $0x1ac] ss:$16 sps:$4 sm:$0xff]   ;;  %v3415_v10 = vld [vmem:[#allocation3 + $0x1a0] ss:$16 sps:$4 sm:$0xff]   ;;  %v3416_v11 = vld [vmem:[#allocation3 + $0x1a8] ss:$16 sps:$4 sm:$0xff]  }
 0x1ff   :  { %1292 = vmatprep.subr.bf16.mxu0 %v3363_v40  ;;  %1378 = vmatprep.subr.bf16.mxu1 %v3365_v41  ;;  %v3417_v12 = vld [vmem:[#allocation3 + $0x1c4] ss:$16 sps:$4 sm:$0xff]   ;;  %v3419_v13 = vld [vmem:[#allocation3 + $0x1cc] ss:$16 sps:$4 sm:$0xff]   ;;  %v3421_v14 = vld [vmem:[#allocation3 + $0x1c0] ss:$16 sps:$4 sm:$0xff]  }
 0x200   :  { %v3422_v15 = vld [vmem:[#allocation3 + $0x1c8] ss:$16 sps:$4 sm:$0xff]   ;;  %v3423_v17 = vld [vmem:[#allocation3 + $0x1e4] ss:$16 sps:$4 sm:$0xff]   ;;  %v3425_v18 = vld [vmem:[#allocation3 + $0x1ec] ss:$16 sps:$4 sm:$0xff]  }
 0x201   :  { %v3427_v20 = vld [vmem:[#allocation3 + $0x1e0] ss:$16 sps:$4 sm:$0xff]   ;;  %v3428_v21 = vld [vmem:[#allocation3 + $0x1e8] ss:$16 sps:$4 sm:$0xff]   ;;  %v3431_v22 = vld [vmem:[#allocation3 + $0x204] ss:$16 sps:$4 sm:$0xff]  }
 0x202   :  { %1293 = vmatpush1.bf16.msra.mxu0 %v3367_v42  ;;  %1379 = vmatpush1.bf16.msra.mxu1 %v3368_v43  ;;  %v3434_v23 = vld [vmem:[#allocation3 + $0x20c] ss:$16 sps:$4 sm:$0xff]   ;;  %v3429_v24 = vld [vmem:[#allocation3 + $0x200] ss:$16 sps:$4 sm:$0xff]   ;;  %v3432_v25 = vld [vmem:[#allocation3 + $0x208] ss:$16 sps:$4 sm:$0xff]  }
 0x203   :  { %1294 = vmatprep.subr.bf16.mxu0 %v3369_v44  ;;  %1380 = vmatprep.subr.bf16.mxu1 %v3371_v45  ;;  %v3437_v26 = vld [vmem:[#allocation3 + $0x224] ss:$16 sps:$4 sm:$0xff]   ;;  %v3440_v27 = vld [vmem:[#allocation3 + $0x22c] ss:$16 sps:$4 sm:$0xff]   ;;  %v3435_v28 = vld [vmem:[#allocation3 + $0x220] ss:$16 sps:$4 sm:$0xff]  }
 0x204   :  { %v3438_v29 = vld [vmem:[#allocation3 + $0x228] ss:$16 sps:$4 sm:$0xff]   ;;  %v3441_v30 = vld [vmem:[#allocation3 + $0x244] ss:$16 sps:$4 sm:$0x3f]   ;;  %vm1269_vm0 = vcmask 1045504  }
 0x205   :  { %v3443_v31 = vld [vmem:[#allocation3 + $0x24c] ss:$16 sps:$4 sm:$0x3f]   ;;  %v3445_v32 = vld [vmem:[#allocation3 + $0x240] ss:$16 sps:$4 sm:$0x3f]  }
 0x206   :  { %1295 = vmatpush1.bf16.msra.mxu0 %v3373_v46  ;;  %1381 = vmatpush1.bf16.msra.mxu1 %v3374_v47  ;;  %v3446_v33 = vld [vmem:[#allocation3 + $0x248] ss:$16 sps:$4 sm:$0x3f]   ;;  %v4212_v34 = vmov 0   ;;  %vm1265_vm1 = vcmask 359424   ;;  %v870_v37 = vshrl.u32 %v869_v36, 7 }
 0x207   :  { %1296 = vmatprep.subr.bf16.mxu0 %v3375_v48  ;;  %1382 = vmatprep.subr.bf16.mxu1 %v3377_v49  ;;  %v1277_v35 = vsel %vm1269_vm0, %v3446_v33, 0  ;;  %s5567_s28 = sld [smem:[#allocation49_spill]] }
 0x208   :  { %v871_v38 = vsub.s32 0, %v870_v37  ;;  %v879_v39 = vsub.s32 2, %v870_v37  ;;  %v875_v41 = vsub.s32 1, %v870_v37  ;;  %v883_v42 = vsub.s32 3, %v870_v37 }
 0x20a   :  { %1297 = vmatpush1.bf16.msra.mxu0 %v3379_v50  ;;  %1383 = vmatpush1.bf16.msra.mxu1 %v3380_v51 }
 0x20b   :  { %1298 = vmatprep.subr.bf16.mxu0 %v3381_v52  ;;  %1384 = vmatprep.subr.bf16.mxu1 %v3383_v53 }
 0x20d   :  { %v867_v40 = vld [vmem:[%s5567_s28] sm:$0xf] }
 0x20e   :  { %1299 = vmatpush1.bf16.msra.mxu0 %v3385_v54  ;;  %1385 = vmatpush1.bf16.msra.mxu1 %v3386_v55  ;;  %v872_v43 = vrot.slane %v867_v40, %v871_v38  ;;  %v880_v44 = vrot.slane %v867_v40, %v879_v39  ;;  %v876_v45 = vrot.slane %v867_v40, %v875_v41 }
 0x20f   :  { %1300 = vmatprep.subr.bf16.mxu0 %v3387_v56  ;;  %1386 = vmatprep.subr.bf16.mxu1 %v3389_v57  ;;  %v884_v46 = vrot.slane %v867_v40, %v883_v42 }
 0x212   :  { %1301 = vmatpush1.bf16.msra.mxu0 %v3391_v58  ;;  %1387 = vmatpush1.bf16.msra.mxu1 %v3392_v59 }
 0x213   :  { %1302 = vmatprep.subr.bf16.mxu0 %v3393_v60  ;;  %1388 = vmatprep.subr.bf16.mxu1 %v3395_v61 }
 0x216   :  { %1303 = vmatpush1.bf16.msra.mxu0 %v3397_v62  ;;  %1389 = vmatpush1.bf16.msra.mxu1 %v3398_v63 }
 0x217   :  { %1304 = vmatprep.subr.bf16.mxu0 %v3399_v0  ;;  %1390 = vmatprep.subr.bf16.mxu1 %v3401_v1 }
 0x21a   :  { %1305 = vmatpush1.bf16.msra.mxu0 %v3403_v2  ;;  %1391 = vmatpush1.bf16.msra.mxu1 %v3404_v3 }
 0x21b   :  { %1306 = vmatprep.subr.bf16.mxu0 %v3405_v4  ;;  %1392 = vmatprep.subr.bf16.mxu1 %v3407_v5 }
 0x21e   :  { %1307 = vmatpush1.bf16.msra.mxu0 %v3409_v6  ;;  %1393 = vmatpush1.bf16.msra.mxu1 %v3410_v7 }
 0x21f   :  { %1308 = vmatprep.subr.bf16.mxu0 %v3411_v8  ;;  %1394 = vmatprep.subr.bf16.mxu1 %v3413_v9 }
 0x222   :  { %1309 = vmatpush1.bf16.msra.mxu0 %v3415_v10  ;;  %1395 = vmatpush1.bf16.msra.mxu1 %v3416_v11 }
 0x223   :  { %1310 = vmatprep.subr.bf16.mxu0 %v3417_v12  ;;  %1396 = vmatprep.subr.bf16.mxu1 %v3419_v13 }
 0x226   :  { %1311 = vmatpush1.bf16.msra.mxu0 %v3421_v14  ;;  %1397 = vmatpush1.bf16.msra.mxu1 %v3422_v15 }
 0x227   :  { %1312 = vmatprep.subr.bf16.mxu0 %v3423_v17  ;;  %1398 = vmatprep.subr.bf16.mxu1 %v3425_v18 }
 0x22a   :  { %1313 = vmatpush1.bf16.msra.mxu0 %v3427_v20  ;;  %1399 = vmatpush1.bf16.msra.mxu1 %v3428_v21 }
 0x22b   :  { %1325 = vmatprep.subr.bf16.mxu0 %v3431_v22  ;;  %1411 = vmatprep.subr.bf16.mxu1 %v3434_v23 }
 0x22d   :  { %1315 = vmatmul.mubr.bf16.vlgmr.msra.gmra.mrb[0].mxu0 %v4980_v16  ;;  %1401 = vmatmul.mubr.bf16.vlgmr.msra.gmra.mrb[0].mxu1 %v4980_v16  ;;  %v1271_v16 = vsel %vm1269_vm0, %v3445_v32, 0 }
 0x22e   :  { %1326 = vmatpush1.bf16.msra.mxu0 %v3429_v24  ;;  %1412 = vmatpush1.bf16.msra.mxu1 %v3432_v25 }
 0x22f   :  { %1327 = vmatprep.subr.bf16.mxu0 %v3437_v26  ;;  %1413 = vmatprep.subr.bf16.mxu1 %v3440_v27 }
 0x230   :  { %1357 = vmatprep.mubr.bf16.mxu0 %v4212_v34  ;;  %1443 = vmatprep.mubr.bf16.mxu1 %v4212_v34 }
 0x232   :  { %1328 = vmatpush1.bf16.msra.mxu0 %v3435_v28  ;;  %1414 = vmatpush1.bf16.msra.mxu1 %v3438_v29 }
 0x233   :  { %3213 = vmatprep.subr.msk.bf16.mxu0 %vm1269_vm0, %v3441_v30  ;;  %3215 = vmatprep.subr.msk.bf16.mxu1 %vm1269_vm0, %v3443_v31 }
 0x236   :  { %1330 = vmatpush1.bf16.msra.mxu0 %v1271_v16  ;;  %1416 = vmatpush1.bf16.msra.mxu1 %v1277_v35 }
 0x239   :  { %3214 = vmatmul.mubr.msk.bf16.vlgmr.msra.gmra.mrb[0].mxu0 %vm1265_vm1, %v4982_v19  ;;  %3216 = vmatmul.mubr.msk.bf16.vlgmr.msra.gmra.mrb[0].mxu1 %vm1265_vm1, %v4982_v19 }
 0x30c   :  { %v1359_v47 = vpop.f32.mrb[0].mxu0  ;;  %v1445_v48 = vpop.f32.mrb[0].mxu1 }
 0x30d   :  { %v4993_v49 = vadd.f32 %v1359_v47, %v872_v43  ;;  %v4995_v50 = vadd.f32 %v1445_v48, %v880_v44  ;;  %v1361_v19 = vpop.f32.mrb[1].mxu0  ;;  %v1447_v51 = vpop.f32.mrb[1].mxu1 }
 0x30e   :  { %v4997_v52 = vadd.f32 %v1361_v19, %v876_v45  ;;  %v4999_v53 = vadd.f32 %v1447_v51, %v884_v46  ;;  %v1363_v54 = vpop.f32.mrb[2].mxu0  ;;  %v1449_v55 = vpop.f32.mrb[2].mxu1 }
 0x30f   :  { %v5001_v56 = vadd.f32 %v1363_v54, %v872_v43  ;;  %v5003_v57 = vadd.f32 %v1449_v55, %v880_v44  ;;  %v1365_v58 = vpop.f32.mrb[3].mxu0  ;;  %v1451_v59 = vpop.f32.mrb[3].mxu1 }
 0x310   :  { %v5005_v60 = vadd.f32 %v1365_v58, %v876_v45  ;;  %v5007_v61 = vadd.f32 %v1451_v59, %v884_v46 }
 0x311   :  { %4189 = dma.done.wait [#allocation6 + $0x1], 4096 }
 0x312   :  { %4190 = vsyncadd [#allocation6 + $0x1], 4294963200  ;;  %1522 = vmatprep.mubr.bf16.mxu0 %v4212_v34  ;;  %1563 = vmatprep.mubr.bf16.mxu1 %v4212_v34  ;;  %v5011_v62 = vld [vmem:[#allocation4 + $0x8] sm:$0xff]  ;;  %v5013_v63 = vld [vmem:[#allocation4] sm:$0xff]  ;;  %vm1653_vm2 = vcmask 1041409   ;;  %s4213_s1 = smov [#allocation9]  }
 0x313   :  { %v5015_v0 = vld [vmem:[#allocation4 + $0x28] sm:$0xff]  ;;  %1490 = vmatprep.subr.bf16.mxu0 %v5011_v62  ;;  %v5019_v1 = vld [vmem:[#allocation4 + $0x18] sm:$0xff]  ;;  %v5022_v2 = vld [vmem:[#allocation4 + $0x20] sm:$0xff]  ;;  %s2885_s13 = sshll.u32 %s4213_s1, 4  ;;  %s2886_s13 = int_to_ptr.vmem [resolvable:$true] %s2885_s13 }
 0x314   :  { %1491 = vmatpush1.bf16.msra.mxu0 %v5013_v63  ;;  %1531 = vmatprep.subr.bf16.mxu1 %v5019_v1  ;;  %v5025_v3 = vld [vmem:[#allocation4 + $0x10] sm:$0xff]  ;;  %v5027_v4 = vld [vmem:[#allocation4 + $0x38] sm:$0xff]  ;;  %v5029_v5 = vld [vmem:[#allocation4 + $0x48] sm:$0xff]  ;;  %s4131_s14 = scalar_lea.vmem %s2886_s13, 256  ;;  %p4136_p2 = scmp.lt.s32.totalorder %s2886_s13, %s2886_s13 }
 0x315   :  { %1492 = vmatprep.subr.bf16.mxu0 %v5015_v0  ;;  %1532 = vmatpush1.bf16.msra.mxu1 %v5025_v3  ;;  %v5033_v6 = vld [vmem:[#allocation4 + $0x30] sm:$0xff]  ;;  %v5036_v7 = vld [vmem:[#allocation4 + $0x58] sm:$0xff]  ;;  %v5039_v8 = vld [vmem:[#allocation4 + $0x40] sm:$0xff]  ;;  %p4132_p1 = scmp.ne.s32.totalorder %s2886_s13, %s4131_s14  ;;  %p4137_p3 = scmp.lt.s32.totalorder %s4131_s14, %s4131_s14 }
 0x316   :  { %1533 = vmatprep.subr.bf16.mxu1 %v5027_v4  ;;  %v5041_v9 = vld [vmem:[#allocation4 + $0x68] sm:$0xff]  ;;  %v5045_v10 = vld [vmem:[#allocation4 + $0x50] sm:$0xff]  ;;  %v5048_v11 = vld [vmem:[#allocation4 + $0x78] sm:$0xff] }
 0x317   :  { %v5051_v12 = vld [vmem:[#allocation4 + $0x60] sm:$0xff]  ;;  %v5053_v13 = vld [vmem:[#allocation4 + $0x88] sm:$0xff]  ;;  %v5057_v14 = vld [vmem:[#allocation4 + $0x70] sm:$0xff]  ;;  %p4138_p4 = por %p4137_p3, %p4136_p2 }
 0x318   :  { %1493 = vmatpush1.bf16.msra.mxu0 %v5022_v2  ;;  %v5060_v15 = vld [vmem:[#allocation4 + $0x98] sm:$0xff]  ;;  %v5063_v17 = vld [vmem:[#allocation4 + $0x80] sm:$0xff]  ;;  %v5065_v18 = vld [vmem:[#allocation4 + $0xa8] sm:$0xff] }
 0x319   :  { %1494 = vmatprep.subr.bf16.mxu0 %v5029_v5  ;;  %1534 = vmatpush1.bf16.msra.mxu1 %v5033_v6  ;;  %v5069_v20 = vld [vmem:[#allocation4 + $0x90] sm:$0xff]  ;;  %v5072_v21 = vld [vmem:[#allocation4 + $0xb8] sm:$0xff]  ;;  %v5075_v22 = vld [vmem:[#allocation4 + $0xa0] sm:$0xff]  ;;  %p4139_p5 = pnand %p4138_p4, %p4132_p1 }
 0x31a   :  { %1535 = vmatprep.subr.bf16.mxu1 %v5036_v7  ;;  %v5077_v23 = vld [vmem:[#allocation4 + $0xc8] sm:$0xff]  ;;  %v5081_v24 = vld [vmem:[#allocation4 + $0xb0] sm:$0xff]  ;;  %v5084_v25 = vld [vmem:[#allocation4 + $0xd8] sm:$0xff] }
 0x31b   :  { %v5087_v26 = vld [vmem:[#allocation4 + $0xc0] sm:$0xff]  ;;  %v5089_v27 = vld [vmem:[#allocation4 + $0xe8] sm:$0xff]  ;;  %v5093_v28 = vld [vmem:[#allocation4 + $0xd0] sm:$0xff] }
 0x31c   :  { %1495 = vmatpush1.bf16.msra.mxu0 %v5039_v8  ;;  %v5096_v29 = vld [vmem:[#allocation4 + $0xf8] sm:$0xff]  ;;  %v5099_v30 = vld [vmem:[#allocation4 + $0xe0] sm:$0xff]  ;;  %v5103_v31 = vld [vmem:[#allocation4 + $0xf0] sm:$0xff] }
 0x31d   :  { %1496 = vmatprep.subr.bf16.mxu0 %v5041_v9  ;;  %1536 = vmatpush1.bf16.msra.mxu1 %v5045_v10 }
 0x31e   :  { %1537 = vmatprep.subr.bf16.mxu1 %v5048_v11 }
 0x320   :  { %1497 = vmatpush1.bf16.msra.mxu0 %v5051_v12 }
 0x321   :  { %1498 = vmatprep.subr.bf16.mxu0 %v5053_v13  ;;  %1538 = vmatpush1.bf16.msra.mxu1 %v5057_v14 }
 0x322   :  { %1539 = vmatprep.subr.bf16.mxu1 %v5060_v15 }
 0x324   :  { %1499 = vmatpush1.bf16.msra.mxu0 %v5063_v17 }
 0x325   :  { %1500 = vmatprep.subr.bf16.mxu0 %v5065_v18  ;;  %1540 = vmatpush1.bf16.msra.mxu1 %v5069_v20 }
 0x326   :  { %1541 = vmatprep.subr.bf16.mxu1 %v5072_v21 }
 0x328   :  { %1501 = vmatpush1.bf16.msra.mxu0 %v5075_v22 }
 0x329   :  { %1502 = vmatprep.subr.bf16.mxu0 %v5077_v23  ;;  %1542 = vmatpush1.bf16.msra.mxu1 %v5081_v24 }
 0x32a   :  { %1543 = vmatprep.subr.bf16.mxu1 %v5084_v25 }
 0x32c   :  { %1503 = vmatpush1.bf16.msra.mxu0 %v5087_v26 }
 0x32d   :  { %1504 = vmatprep.subr.bf16.mxu0 %v5089_v27  ;;  %1544 = vmatpush1.bf16.msra.mxu1 %v5093_v28 }
 0x32e   :  { %1545 = vmatprep.subr.bf16.mxu1 %v5096_v29 }
 0x330   :  { %1505 = vmatpush1.bf16.msra.mxu0 %v5099_v30 }
 0x331   :  { %1657 = vmatprep.subr.bf16.mxu0 %v5011_v62  ;;  %1546 = vmatpush1.bf16.msra.mxu1 %v5103_v31 }
 0x332   :  { %1698 = vmatprep.subr.bf16.mxu1 %v5019_v1 }
 0x333   :  { %1523 = vmatmul.mubr.bf16.vlgmr.msra.gmra.mrb[4].mxu0 %v4212_v34 }
 0x334   :  { %1658 = vmatpush1.bf16.msra.mxu0 %v5013_v63  ;;  %1689 = vmatprep.mubr.bf16.mxu0 %v4212_v34 }
 0x335   :  { %1564 = vmatmul.mubr.bf16.vlgmr.msra.gmra.mrb[4].mxu1 %v4212_v34  ;;  %1659 = vmatprep.subr.bf16.mxu0 %v5015_v0 }
 0x336   :  { %1699 = vmatpush1.bf16.msra.mxu1 %v5025_v3  ;;  %1730 = vmatprep.mubr.bf16.mxu1 %v4212_v34 }
 0x337   :  { %1700 = vmatprep.subr.bf16.mxu1 %v5027_v4 }
 0x338   :  { %1660 = vmatpush1.bf16.msra.mxu0 %v5022_v2 }
 0x339   :  { %1661 = vmatprep.subr.bf16.mxu0 %v5029_v5 }
 0x33a   :  { %1701 = vmatpush1.bf16.msra.mxu1 %v5033_v6 }
 0x33b   :  { %1702 = vmatprep.subr.bf16.mxu1 %v5036_v7 }
 0x33c   :  { %1662 = vmatpush1.bf16.msra.mxu0 %v5039_v8 }
 0x33d   :  { %1663 = vmatprep.subr.bf16.mxu0 %v5041_v9 }
 0x33e   :  { %1703 = vmatpush1.bf16.msra.mxu1 %v5045_v10 }
 0x33f   :  { %1704 = vmatprep.subr.bf16.mxu1 %v5048_v11 }
 0x340   :  { %1664 = vmatpush1.bf16.msra.mxu0 %v5051_v12 }
 0x341   :  { %1665 = vmatprep.subr.bf16.mxu0 %v5053_v13 }
 0x342   :  { %1705 = vmatpush1.bf16.msra.mxu1 %v5057_v14 }
 0x343   :  { %1706 = vmatprep.subr.bf16.mxu1 %v5060_v15 }
 0x344   :  { %1666 = vmatpush1.bf16.msra.mxu0 %v5063_v17 }
 0x345   :  { %1667 = vmatprep.subr.bf16.mxu0 %v5065_v18 }
 0x346   :  { %1707 = vmatpush1.bf16.msra.mxu1 %v5069_v20 }
 0x347   :  { %1708 = vmatprep.subr.bf16.mxu1 %v5072_v21 }
 0x348   :  { %1668 = vmatpush1.bf16.msra.mxu0 %v5075_v22 }
 0x349   :  { %1669 = vmatprep.subr.bf16.mxu0 %v5077_v23 }
 0x34a   :  { %1709 = vmatpush1.bf16.msra.mxu1 %v5081_v24 }
 0x34b   :  { %1710 = vmatprep.subr.bf16.mxu1 %v5084_v25 }
 0x34c   :  { %1670 = vmatpush1.bf16.msra.mxu0 %v5087_v26 }
 0x34d   :  { %1671 = vmatprep.subr.bf16.mxu0 %v5089_v27 }
 0x34e   :  { %1711 = vmatpush1.bf16.msra.mxu1 %v5093_v28 }
 0x34f   :  { %1712 = vmatprep.subr.bf16.mxu1 %v5096_v29 }
 0x350   :  { %1672 = vmatpush1.bf16.msra.mxu0 %v5099_v30 }
 0x351   :  { %1829 = vmatprep.subr.bf16.mxu0 %v5011_v62 }
 0x352   :  { %1713 = vmatpush1.bf16.msra.mxu1 %v5103_v31 }
 0x353   :  { %1870 = vmatprep.subr.bf16.mxu1 %v5019_v1 }
 0x406   :  { %v1524_v32 = vpop.f32.mrb[4].mxu0 }
 0x407   :  { %v1576_v33 = vrot.slane %v1524_v32, 1  ;;  %v1588_v16 = vadd.f32 %v4993_v49, %v1524_v32  ;;  %v1526_v35 = vpop.f32.mrb[5].mxu0 }
 0x408   :  { %v1577_v36 = vrot.slane %v1526_v35, 1  ;;  %v1589_v37 = vadd.f32 %v4997_v52, %v1526_v35  ;;  %v1528_v38 = vpop.f32.mrb[6].mxu0  ;;  %v1565_v39 = vpop.f32.mrb[4].mxu1 }
 0x409   :  { %v1592_v40 = vadd.f32 %v5001_v56, %v1576_v33  ;;  %v3217_v41 = vmul.f32 -1.442695, %v1588_v16  ;;  %v1529_v42 = vpop.f32.mrb[7].mxu0  ;;  %v1567_v43 = vpop.f32.mrb[5].mxu1  ;;  %v1578_v58 = vrot.slane %v1565_v39, 1  ;;  %v1590_v59 = vadd.f32 %v4995_v50, %v1565_v39 }
 0x40a   :  { %v1593_v44 = vadd.f32 %v5005_v60, %v1577_v36  ;;  %v3219_v45 = vmul.f32 -1.442695, %v1589_v37  ;;  %v1579_v46 = vrot.slane %v1567_v43, 1  ;;  %v1569_v47 = vpop.f32.mrb[6].mxu1  ;;  %v1591_v54 = vadd.f32 %v4999_v53, %v1567_v43 }
 0x40b   :  { %3447 = vpow2.f32 %v3217_v41  ;;  %v3218_v48 = vmul.f32 -1.442695, %v1592_v40  ;;  %v1570_v19 = vpop.f32.mrb[7].mxu1  ;;  %v1594_v16 = vadd.f32 %v5003_v57, %v1578_v58 }
 0x40c   :  { %3449 = vpow2.f32 %v3219_v45  ;;  %v3220_v51 = vmul.f32 -1.442695, %v1593_v44  ;;  %v1595_v55 = vadd.f32 %v5007_v61, %v1579_v46  ;;  %v3221_v32 = vmul.f32 -1.442695, %v1591_v54 }
 0x40d   :  { %3451 = vpow2.f32 %v3218_v48 }
 0x40e   :  { %3453 = vpow2.f32 %v3220_v51  ;;  %v3222_v33 = vmul.f32 -1.442695, %v1595_v55 }
 0x40f   :  { %3455 = vtanh.f32 %v1590_v59 }
 0x410   :  { %3457 = vpow2.f32 %v3221_v32 }
 0x411   :  { %3459 = vpow2.f32 %v3222_v33 }
 0x412   :  { %3461 = vtanh.f32 %v1594_v16 }
 0x415   :  { %v3448_v35 = vpop.eup %3447 }
 0x416   :  { %v3450_v36 = vpop.eup %3449  ;;  %v1602_v37 = vadd.f32 1.0, %v3448_v35 }
 0x417   :  { %v3452_v38 = vpop.eup %3451  ;;  %v1614_v40 = vadd.f32 1.0, %v3450_v36 }
 0x418   :  { %v3454_v41 = vpop.eup %3453  ;;  %v1603_v42 = vadd.f32 1.0, %v3452_v38  ;;  %3463 = vrcp.f32 %v1602_v37 }
 0x419   :  { %v1615_v43 = vadd.f32 1.0, %v3454_v41  ;;  %3465 = vrcp.f32 %v1614_v40  ;;  %v3456_v39 = vpop.eup %3455 }
 0x41a   :  { %3467 = vrcp.f32 %v1603_v42  ;;  %v3458_v44 = vpop.eup %3457 }
 0x41b   :  { %3469 = vrcp.f32 %v1615_v43  ;;  %v3460_v45 = vpop.eup %3459  ;;  %v1628_v48 = vadd.f32 1.0, %v3458_v44 }
 0x41c   :  { %v3462_v46 = vpop.eup %3461  ;;  %v1629_v54 = vadd.f32 1.0, %v3460_v45 }
 0x41d   :  { %3471 = vrcp.f32 %v1628_v48 }
 0x41e   :  { %3473 = vrcp.f32 %v1629_v54 }
 0x422   :  { %v3464_v47 = vpop.eup %3463 }
 0x423   :  { %v3466_v19 = vpop.eup %3465  ;;  %v1636_v51 = vmul.f32 %v3464_v47, %v3456_v39 }
 0x424   :  { %v3468_v55 = vpop.eup %3467  ;;  %v1634_v58 = vmul.f32 0.0, %v3466_v19 }
 0x425   :  { %v3470_v59 = vpop.eup %3469  ;;  %v1637_v32 = vmul.f32 %v3468_v55, %v3462_v46 }
 0x426   :  { %v1635_v33 = vmul.f32 0.0, %v3470_v59  ;;  %v5153_v16 = vadd.f32 %v1636_v51, %v1634_v58 }
 0x427   :  { %v3472_v36 = vpop.eup %3471 }
 0x428   :  { %v5155_v35 = vadd.f32 %v1637_v32, %v1635_v33  ;;  %3475 = vtanh.f32 %v5153_v16  ;;  %v3474_v37 = vpop.eup %3473 }
 0x42a   :  { %3477 = vtanh.f32 %v5155_v35 }
 0x432   :  { %v3476_v38 = vpop.eup %3475 }
 0x433   :  { %v1642_v40 = vmul.f32 %v3476_v38, %v3472_v36 }
 0x434   :  { %v3478_v41 = vpop.eup %3477 }
 0x435   :  { %v1643_v42 = vmul.f32 %v3478_v41, %v3474_v37  ;;  %1644 = vst [vmem:[#allocation9] sm:$0x1] %v1642_v40  ;;  %v1646_v43 = vpack.c.bf16 %v1642_v40, %v1642_v40 }
 0x437   :  { %1645 = vst [vmem:[#allocation9 + $0x8] sm:$0x1] %v1643_v42  ;;  %v1647_v39 = vpack.c.bf16 %v1643_v42, %v1643_v42  ;;  %v1650_v45 = vunpack.c.l.b16 %v1646_v43 }
 0x439   :  { %v1651_v44 = vunpack.c.l.b16 %v1647_v39 }
 0x43b   :  { %v1652_v46 = vrot.slane %v1651_v44, 7 }
 0x43d   :  { %v1654_v47 = vsel %vm1653_vm2, %v1652_v46, %v1650_v45 }
 0x43e   :  { %v1655_v48 = vpack.c.b16 %v1654_v47, %v1654_v47 }
 0x440   :  { %1690 = vmatmul.mubr.bf16.vlgmr.msra.gmra.mrb[8].mxu0 %v1655_v48  ;;  %1731 = vmatmul.mubr.bf16.vlgmr.msra.gmra.mrb[8].mxu1 %v1655_v48 }
 0x441   :  { %1830 = vmatpush1.bf16.msra.mxu0 %v5013_v63  ;;  %1871 = vmatpush1.bf16.msra.mxu1 %v5025_v3 }
 0x442   :  { %1831 = vmatprep.subr.bf16.mxu0 %v5015_v0  ;;  %1872 = vmatprep.subr.bf16.mxu1 %v5027_v4 }
 0x443   :  { %1861 = vmatprep.mubr.bf16.mxu0 %v4212_v34  ;;  %1902 = vmatprep.mubr.bf16.mxu1 %v4212_v34 }
 0x445   :  { %1832 = vmatpush1.bf16.msra.mxu0 %v5022_v2  ;;  %1873 = vmatpush1.bf16.msra.mxu1 %v5033_v6 }
 0x446   :  { %1833 = vmatprep.subr.bf16.mxu0 %v5029_v5  ;;  %1874 = vmatprep.subr.bf16.mxu1 %v5036_v7 }
 0x449   :  { %1834 = vmatpush1.bf16.msra.mxu0 %v5039_v8  ;;  %1875 = vmatpush1.bf16.msra.mxu1 %v5045_v10 }
 0x44a   :  { %1835 = vmatprep.subr.bf16.mxu0 %v5041_v9  ;;  %1876 = vmatprep.subr.bf16.mxu1 %v5048_v11 }
 0x44d   :  { %1836 = vmatpush1.bf16.msra.mxu0 %v5051_v12  ;;  %1877 = vmatpush1.bf16.msra.mxu1 %v5057_v14 }
 0x44e   :  { %1837 = vmatprep.subr.bf16.mxu0 %v5053_v13  ;;  %1878 = vmatprep.subr.bf16.mxu1 %v5060_v15 }
 0x451   :  { %1838 = vmatpush1.bf16.msra.mxu0 %v5063_v17  ;;  %1879 = vmatpush1.bf16.msra.mxu1 %v5069_v20 }
 0x452   :  { %1839 = vmatprep.subr.bf16.mxu0 %v5065_v18  ;;  %1880 = vmatprep.subr.bf16.mxu1 %v5072_v21 }
 0x455   :  { %1840 = vmatpush1.bf16.msra.mxu0 %v5075_v22  ;;  %1881 = vmatpush1.bf16.msra.mxu1 %v5081_v24 }
 0x456   :  { %1841 = vmatprep.subr.bf16.mxu0 %v5077_v23  ;;  %1882 = vmatprep.subr.bf16.mxu1 %v5084_v25 }
 0x459   :  { %1842 = vmatpush1.bf16.msra.mxu0 %v5087_v26  ;;  %1883 = vmatpush1.bf16.msra.mxu1 %v5093_v28 }
 0x45a   :  { %1843 = vmatprep.subr.bf16.mxu0 %v5089_v27  ;;  %1884 = vmatprep.subr.bf16.mxu1 %v5096_v29 }
 0x45d   :  { %1844 = vmatpush1.bf16.msra.mxu0 %v5099_v30  ;;  %1885 = vmatpush1.bf16.msra.mxu1 %v5103_v31 }
 0x45e   :  { %2006 = vmatprep.subr.bf16.mxu0 %v5011_v62  ;;  %2047 = vmatprep.subr.bf16.mxu1 %v5019_v1 }
 0x513   :  { %v1691_v19 = vpop.f32.mrb[8].mxu0  ;;  %v1732_v51 = vpop.f32.mrb[8].mxu1 }
 0x514   :  { %v1743_v54 = vrot.slane %v1691_v19, 7  ;;  %v1759_v55 = vadd.f32 %v5001_v56, %v1691_v19  ;;  %v1693_v58 = vpop.f32.mrb[9].mxu0  ;;  %v1734_v59 = vpop.f32.mrb[9].mxu1  ;;  %v1745_v19 = vrot.slane %v1732_v51, 7 }
 0x515   :  { %v1744_v32 = vrot.slane %v1693_v58, 7  ;;  %v1760_v33 = vadd.f32 %v5005_v60, %v1693_v58  ;;  %v1695_v36 = vpop.f32.mrb[10].mxu0  ;;  %v1736_v37 = vpop.f32.mrb[10].mxu1  ;;  %v1746_v39 = vrot.slane %v1734_v59, 7  ;;  %v1762_v48 = vadd.f32 %v5007_v61, %v1734_v59 }
 0x516   :  { %v1755_v38 = vadd.f32 %v4993_v49, %v1743_v54  ;;  %v3224_v40 = vmul.f32 -1.442695, %v1759_v55  ;;  %v1696_v41 = vpop.f32.mrb[11].mxu0  ;;  %v1737_v42 = vpop.f32.mrb[11].mxu1  ;;  %v1761_v54 = vadd.f32 %v5003_v57, %v1732_v51 }
 0x517   :  { %v1756_v43 = vadd.f32 %v4997_v52, %v1744_v32  ;;  %v3226_v45 = vmul.f32 -1.442695, %v1760_v33  ;;  %v1758_v47 = vadd.f32 %v4999_v53, %v1746_v39  ;;  %v3228_v58 = vmul.f32 -1.442695, %v1762_v48 }
 0x518   :  { %v3223_v44 = vmul.f32 -1.442695, %v1755_v38  ;;  %3479 = vpow2.f32 %v3224_v40  ;;  %v1757_v32 = vadd.f32 %v4995_v50, %v1745_v19  ;;  %v1803_v48 = vrot.slane %v5153_v16, 7 }
 0x519   :  { %v3225_v46 = vmul.f32 -1.442695, %v1756_v43  ;;  %v3227_v55 = vmul.f32 -1.442695, %v1758_v47 }
 0x51a   :  { %3481 = vpow2.f32 %v3223_v44 }
 0x51b   :  { %3483 = vpow2.f32 %v3225_v46 }
 0x51c   :  { %3485 = vpow2.f32 %v3226_v45 }
 0x51d   :  { %3487 = vtanh.f32 %v1761_v54 }
 0x51e   :  { %3489 = vpow2.f32 %v3227_v55  ;;  %v1804_v55 = vrot.slane %v5155_v35, 7 }
 0x51f   :  { %3491 = vpow2.f32 %v3228_v58 }
 0x522   :  { %v3480_v36 = vpop.eup %3479 }
 0x523   :  { %v1770_v37 = vadd.f32 1.0, %v3480_v36 }
 0x524   :  { %v3482_v33 = vpop.eup %3481 }
 0x525   :  { %v3484_v38 = vpop.eup %3483  ;;  %v1769_v40 = vadd.f32 1.0, %v3482_v33  ;;  %3493 = vrcp.f32 %v1770_v37 }
 0x526   :  { %v3486_v41 = vpop.eup %3485  ;;  %3495 = vtanh.f32 %v1757_v32  ;;  %v1781_v42 = vadd.f32 1.0, %v3484_v38 }
 0x527   :  { %3497 = vrcp.f32 %v1769_v40  ;;  %v1782_v59 = vadd.f32 1.0, %v3486_v41  ;;  %v3488_v51 = vpop.eup %3487 }
 0x528   :  { %3499 = vrcp.f32 %v1781_v42  ;;  %v3490_v43 = vpop.eup %3489 }
 0x529   :  { %3501 = vrcp.f32 %v1782_v59  ;;  %v3492_v39 = vpop.eup %3491  ;;  %v1795_v19 = vadd.f32 1.0, %v3490_v43 }
 0x52a   :  { %v1796_v36 = vadd.f32 1.0, %v3492_v39 }
 0x52b   :  { %3503 = vrcp.f32 %v1795_v19 }
 0x52c   :  { %3505 = vrcp.f32 %v1796_v36 }
 0x52f   :  { %v3494_v44 = vpop.eup %3493 }
 0x530   :  { %v3496_v45 = vpop.eup %3495  ;;  %v1810_v46 = vmul.f32 %v3494_v44, %v3488_v51 }
 0x531   :  { %v3498_v47 = vpop.eup %3497 }
 0x532   :  { %v3500_v54 = vpop.eup %3499  ;;  %v1809_v58 = vmul.f32 %v3498_v47, %v3496_v45 }
 0x533   :  { %v3502_v32 = vpop.eup %3501  ;;  %v1807_v37 = vmul.f32 %v3500_v54, %v1803_v48 }
 0x534   :  { %v1808_v33 = vmul.f32 %v3502_v32, %v1804_v55 }
 0x535   :  { %v5204_v38 = vadd.f32 %v1809_v58, %v1807_v37  ;;  %v3504_v16 = vpop.eup %3503 }
 0x536   :  { %v5206_v40 = vadd.f32 %v1810_v46, %v1808_v33  ;;  %v3506_v41 = vpop.eup %3505 }
 0x537   :  { %3507 = vtanh.f32 %v5204_v38 }
 0x538   :  { %3509 = vtanh.f32 %v5206_v40 }
 0x541   :  { %v3508_v42 = vpop.eup %3507 }
 0x542   :  { %v3510_v59 = vpop.eup %3509  ;;  %v1815_v35 = vmul.f32 %v3508_v42, %v3504_v16 }
 0x543   :  { %v1816_v51 = vmul.f32 %v3510_v59, %v3506_v41 }
 0x544   :  { %1817 = vst [vmem:[#allocation9] sm:$0x2] %v1815_v35  ;;  %v1819_v43 = vpack.c.bf16 %v1815_v35, %v1815_v35 }
 0x545   :  { %1818 = vst [vmem:[#allocation9 + $0x8] sm:$0x2] %v1816_v51  ;;  %v1820_v39 = vpack.c.bf16 %v1816_v51, %v1816_v51 }
 0x546   :  { %v1823_v44 = vunpack.c.l.b16 %v1819_v43 }
 0x547   :  { %v1824_v45 = vunpack.c.l.b16 %v1820_v39 }
 0x548   :  { %v1825_v47 = vrot.slane %v1823_v44, 1 }
 0x54a   :  { %v1826_v46 = vsel %vm1653_vm2, %v1824_v45, %v1825_v47 }
 0x54b   :  { %v1827_v48 = vpack.c.b16 %v1826_v46, %v1826_v46 }
 0x54d   :  { %1862 = vmatmul.mubr.bf16.vlgmr.msra.gmra.mrb[12].mxu0 %v1827_v48  ;;  %1903 = vmatmul.mubr.bf16.vlgmr.msra.gmra.mrb[12].mxu1 %v1827_v48 }
 0x54e   :  { %2007 = vmatpush1.bf16.msra.mxu0 %v5013_v63  ;;  %2048 = vmatpush1.bf16.msra.mxu1 %v5025_v3 }
 0x54f   :  { %2008 = vmatprep.subr.bf16.mxu0 %v5015_v0  ;;  %2049 = vmatprep.subr.bf16.mxu1 %v5027_v4 }
 0x550   :  { %2038 = vmatprep.mubr.bf16.mxu0 %v4212_v34  ;;  %2079 = vmatprep.mubr.bf16.mxu1 %v4212_v34 }
 0x552   :  { %2009 = vmatpush1.bf16.msra.mxu0 %v5022_v2  ;;  %2050 = vmatpush1.bf16.msra.mxu1 %v5033_v6 }
 0x553   :  { %2010 = vmatprep.subr.bf16.mxu0 %v5029_v5  ;;  %2051 = vmatprep.subr.bf16.mxu1 %v5036_v7 }
 0x556   :  { %2011 = vmatpush1.bf16.msra.mxu0 %v5039_v8  ;;  %2052 = vmatpush1.bf16.msra.mxu1 %v5045_v10 }
 0x557   :  { %2012 = vmatprep.subr.bf16.mxu0 %v5041_v9  ;;  %2053 = vmatprep.subr.bf16.mxu1 %v5048_v11 }
 0x55a   :  { %2013 = vmatpush1.bf16.msra.mxu0 %v5051_v12  ;;  %2054 = vmatpush1.bf16.msra.mxu1 %v5057_v14 }
 0x55b   :  { %2014 = vmatprep.subr.bf16.mxu0 %v5053_v13  ;;  %2055 = vmatprep.subr.bf16.mxu1 %v5060_v15 }
 0x55e   :  { %2015 = vmatpush1.bf16.msra.mxu0 %v5063_v17  ;;  %2056 = vmatpush1.bf16.msra.mxu1 %v5069_v20 }
 0x55f   :  { %2016 = vmatprep.subr.bf16.mxu0 %v5065_v18  ;;  %2057 = vmatprep.subr.bf16.mxu1 %v5072_v21 }
 0x562   :  { %2017 = vmatpush1.bf16.msra.mxu0 %v5075_v22  ;;  %2058 = vmatpush1.bf16.msra.mxu1 %v5081_v24 }
 0x563   :  { %2018 = vmatprep.subr.bf16.mxu0 %v5077_v23  ;;  %2059 = vmatprep.subr.bf16.mxu1 %v5084_v25 }
 0x566   :  { %2019 = vmatpush1.bf16.msra.mxu0 %v5087_v26  ;;  %2060 = vmatpush1.bf16.msra.mxu1 %v5093_v28 }
 0x567   :  { %2020 = vmatprep.subr.bf16.mxu0 %v5089_v27  ;;  %2061 = vmatprep.subr.bf16.mxu1 %v5096_v29 }
 0x56a   :  { %2021 = vmatpush1.bf16.msra.mxu0 %v5099_v30  ;;  %2062 = vmatpush1.bf16.msra.mxu1 %v5103_v31 }
 0x56b   :  { %2183 = vmatprep.subr.bf16.mxu0 %v5011_v62  ;;  %2224 = vmatprep.subr.bf16.mxu1 %v5019_v1 }
 0x620   :  { %v1863_v19 = vpop.f32.mrb[12].mxu0  ;;  %v1904_v54 = vpop.f32.mrb[12].mxu1 }
 0x621   :  { %v1915_v55 = vrot.slane %v1863_v19, 6  ;;  %v1919_v58 = vrot.slane %v1863_v19, 7  ;;  %v1865_v36 = vpop.f32.mrb[13].mxu0  ;;  %v1906_v32 = vpop.f32.mrb[13].mxu1 }
 0x622   :  { %v1916_v37 = vrot.slane %v1865_v36, 6  ;;  %v1920_v33 = vrot.slane %v1865_v36, 7  ;;  %v1867_v16 = vpop.f32.mrb[14].mxu0  ;;  %v1908_v41 = vpop.f32.mrb[14].mxu1  ;;  %v1918_v48 = vrot.slane %v1906_v32, 6  ;;  %v1922_v19 = vrot.slane %v1906_v32, 7 }
 0x623   :  { %v1931_v42 = vadd.f32 %v4993_v49, %v1915_v55  ;;  %v1935_v59 = vadd.f32 %v5001_v56, %v1919_v58  ;;  %v1868_v35 = vpop.f32.mrb[15].mxu0  ;;  %v1909_v51 = vpop.f32.mrb[15].mxu1  ;;  %v1917_v36 = vrot.slane %v1904_v54, 6  ;;  %v1921_v16 = vrot.slane %v1904_v54, 7 }
 0x624   :  { %v1932_v43 = vadd.f32 %v4997_v52, %v1916_v37  ;;  %v1936_v39 = vadd.f32 %v5005_v60, %v1920_v33  ;;  %v1934_v55 = vadd.f32 %v4999_v53, %v1918_v48  ;;  %v1938_v58 = vadd.f32 %v5007_v61, %v1922_v19 }
 0x625   :  { %v3229_v44 = vmul.f32 -1.442695, %v1931_v42  ;;  %v3230_v45 = vmul.f32 -1.442695, %v1935_v59  ;;  %v1933_v37 = vadd.f32 %v4995_v50, %v1917_v36  ;;  %v1937_v33 = vadd.f32 %v5003_v57, %v1921_v16 }
 0x626   :  { %v3231_v47 = vmul.f32 -1.442695, %v1932_v43  ;;  %v3232_v46 = vmul.f32 -1.442695, %v1936_v39  ;;  %v3233_v41 = vmul.f32 -1.442695, %v1934_v55 }
 0x627   :  { %3511 = vpow2.f32 %v3229_v44  ;;  %v3234_v42 = vmul.f32 -1.442695, %v1938_v58  ;;  %v1979_v55 = vrot.slane %v5204_v38, 7 }
 0x628   :  { %3513 = vpow2.f32 %v3230_v45 }
 0x629   :  { %3515 = vpow2.f32 %v3231_v47 }
 0x62a   :  { %3517 = vpow2.f32 %v3232_v46 }
 0x62b   :  { %3519 = vtanh.f32 %v1933_v37 }
 0x62c   :  { %3521 = vtanh.f32 %v1937_v33 }
 0x62d   :  { %3523 = vpow2.f32 %v3233_v41  ;;  %v1980_v41 = vrot.slane %v5206_v40, 7 }
 0x62e   :  { %3525 = vpow2.f32 %v3234_v42 }
 0x631   :  { %v3512_v59 = vpop.eup %3511 }
 0x632   :  { %v3514_v35 = vpop.eup %3513  ;;  %v1945_v32 = vadd.f32 1.0, %v3512_v59 }
 0x633   :  { %v3516_v51 = vpop.eup %3515  ;;  %v1946_v54 = vadd.f32 1.0, %v3514_v35 }
 0x634   :  { %v3518_v43 = vpop.eup %3517  ;;  %3527 = vrcp.f32 %v1945_v32  ;;  %v1957_v39 = vadd.f32 1.0, %v3516_v51 }
 0x635   :  { %3529 = vrcp.f32 %v1946_v54  ;;  %v1958_v44 = vadd.f32 1.0, %v3518_v43  ;;  %v3520_v45 = vpop.eup %3519 }
 0x636   :  { %3531 = vrcp.f32 %v1957_v39  ;;  %v3522_v47 = vpop.eup %3521 }
 0x637   :  { %3533 = vrcp.f32 %v1958_v44  ;;  %v3524_v46 = vpop.eup %3523 }
 0x638   :  { %v3526_v48 = vpop.eup %3525  ;;  %v1971_v58 = vadd.f32 1.0, %v3524_v46 }
 0x639   :  { %v1972_v42 = vadd.f32 1.0, %v3526_v48 }
 0x63a   :  { %3535 = vrcp.f32 %v1971_v58 }
 0x63b   :  { %3537 = vrcp.f32 %v1972_v42 }
 0x63e   :  { %v3528_v19 = vpop.eup %3527 }
 0x63f   :  { %v3530_v36 = vpop.eup %3529  ;;  %v1985_v16 = vmul.f32 %v3528_v19, %v3520_v45 }
 0x640   :  { %v3532_v37 = vpop.eup %3531  ;;  %v1986_v33 = vmul.f32 %v3530_v36, %v3522_v47 }
 0x641   :  { %v3534_v59 = vpop.eup %3533  ;;  %v1983_v35 = vmul.f32 %v3532_v37, %v1979_v55 }
 0x642   :  { %v1984_v32 = vmul.f32 %v3534_v59, %v1980_v41 }
 0x643   :  { %v5255_v51 = vadd.f32 %v1985_v16, %v1983_v35 }
 0x644   :  { %v5257_v54 = vadd.f32 %v1986_v33, %v1984_v32  ;;  %v3536_v38 = vpop.eup %3535 }
 0x645   :  { %3539 = vtanh.f32 %v5255_v51  ;;  %v3538_v43 = vpop.eup %3537 }
 0x646   :  { %3541 = vtanh.f32 %v5257_v54 }
 0x64f   :  { %v3540_v39 = vpop.eup %3539 }
 0x650   :  { %v3542_v44 = vpop.eup %3541  ;;  %v1991_v45 = vmul.f32 %v3540_v39, %v3536_v38 }
 0x651   :  { %v1992_v40 = vmul.f32 %v3542_v44, %v3538_v43 }
 0x652   :  { %1993 = vst [vmem:[#allocation9] sm:$0x4] %v1991_v45  ;;  %v1995_v47 = vpack.c.bf16 %v1991_v45, %v1991_v45 }
 0x653   :  { %1994 = vst [vmem:[#allocation9 + $0x8] sm:$0x4] %v1992_v40  ;;  %v1996_v46 = vpack.c.bf16 %v1992_v40, %v1992_v40 }
 0x654   :  { %v1999_v48 = vunpack.c.l.b16 %v1995_v47  ;;  %v2156_v47 = vrot.slane %v5255_v51, 7 }
 0x655   :  { %v2000_v19 = vunpack.c.l.b16 %v1996_v46 }
 0x656   :  { %v2001_v36 = vrot.slane %v1999_v48, 2 }
 0x657   :  { %v2002_v16 = vrot.slane %v2000_v19, 1 }
 0x659   :  { %v2003_v55 = vsel %vm1653_vm2, %v2002_v16, %v2001_v36  ;;  %v2157_v36 = vrot.slane %v5257_v54, 7 }
 0x65a   :  { %v2004_v58 = vpack.c.b16 %v2003_v55, %v2003_v55 }
 0x65c   :  { %2039 = vmatmul.mubr.bf16.vlgmr.msra.gmra.mrb[16].mxu0 %v2004_v58  ;;  %2080 = vmatmul.mubr.bf16.vlgmr.msra.gmra.mrb[16].mxu1 %v2004_v58 }
 0x65d   :  { %2184 = vmatpush1.bf16.msra.mxu0 %v5013_v63  ;;  %2225 = vmatpush1.bf16.msra.mxu1 %v5025_v3 }
 0x65e   :  { %2185 = vmatprep.subr.bf16.mxu0 %v5015_v0  ;;  %2226 = vmatprep.subr.bf16.mxu1 %v5027_v4 }
 0x65f   :  { %2215 = vmatprep.mubr.bf16.mxu0 %v4212_v34  ;;  %2256 = vmatprep.mubr.bf16.mxu1 %v4212_v34 }
 0x661   :  { %2186 = vmatpush1.bf16.msra.mxu0 %v5022_v2  ;;  %2227 = vmatpush1.bf16.msra.mxu1 %v5033_v6 }
 0x662   :  { %2187 = vmatprep.subr.bf16.mxu0 %v5029_v5  ;;  %2228 = vmatprep.subr.bf16.mxu1 %v5036_v7 }
 0x665   :  { %2188 = vmatpush1.bf16.msra.mxu0 %v5039_v8  ;;  %2229 = vmatpush1.bf16.msra.mxu1 %v5045_v10 }
 0x666   :  { %2189 = vmatprep.subr.bf16.mxu0 %v5041_v9  ;;  %2230 = vmatprep.subr.bf16.mxu1 %v5048_v11 }
 0x669   :  { %2190 = vmatpush1.bf16.msra.mxu0 %v5051_v12  ;;  %2231 = vmatpush1.bf16.msra.mxu1 %v5057_v14 }
 0x66a   :  { %2191 = vmatprep.subr.bf16.mxu0 %v5053_v13  ;;  %2232 = vmatprep.subr.bf16.mxu1 %v5060_v15 }
 0x66d   :  { %2192 = vmatpush1.bf16.msra.mxu0 %v5063_v17  ;;  %2233 = vmatpush1.bf16.msra.mxu1 %v5069_v20 }
 0x66e   :  { %2193 = vmatprep.subr.bf16.mxu0 %v5065_v18  ;;  %2234 = vmatprep.subr.bf16.mxu1 %v5072_v21 }
 0x671   :  { %2194 = vmatpush1.bf16.msra.mxu0 %v5075_v22  ;;  %2235 = vmatpush1.bf16.msra.mxu1 %v5081_v24 }
 0x672   :  { %2195 = vmatprep.subr.bf16.mxu0 %v5077_v23  ;;  %2236 = vmatprep.subr.bf16.mxu1 %v5084_v25 }
 0x675   :  { %2196 = vmatpush1.bf16.msra.mxu0 %v5087_v26  ;;  %2237 = vmatpush1.bf16.msra.mxu1 %v5093_v28 }
 0x676   :  { %2197 = vmatprep.subr.bf16.mxu0 %v5089_v27  ;;  %2238 = vmatprep.subr.bf16.mxu1 %v5096_v29 }
 0x679   :  { %2198 = vmatpush1.bf16.msra.mxu0 %v5099_v30  ;;  %2239 = vmatpush1.bf16.msra.mxu1 %v5103_v31 }
 0x67a   :  { %2360 = vmatprep.subr.bf16.mxu0 %v5011_v62  ;;  %2401 = vmatprep.subr.bf16.mxu1 %v5019_v1 }
 0x72f   :  { %v2040_v63 = vpop.f32.mrb[16].mxu0  ;;  %v2081_v0 = vpop.f32.mrb[16].mxu1 }
 0x730   :  { %v2092_v2 = vrot.slane %v2040_v63, 5  ;;  %v2096_v3 = vrot.slane %v2040_v63, 6  ;;  %v2042_v4 = vpop.f32.mrb[17].mxu0  ;;  %v2083_v5 = vpop.f32.mrb[17].mxu1  ;;  %v2094_v22 = vrot.slane %v2081_v0, 5  ;;  %v2098_v23 = vrot.slane %v2081_v0, 6 }
 0x731   :  { %v2093_v6 = vrot.slane %v2042_v4, 5  ;;  %v2097_v7 = vrot.slane %v2042_v4, 6  ;;  %v2044_v8 = vpop.f32.mrb[18].mxu0  ;;  %v2085_v9 = vpop.f32.mrb[18].mxu1  ;;  %v2095_v20 = vrot.slane %v2083_v5, 5  ;;  %v2099_v21 = vrot.slane %v2083_v5, 6 }
 0x732   :  { %v2108_v10 = vadd.f32 %v4993_v49, %v2092_v2  ;;  %v2112_v11 = vadd.f32 %v5001_v56, %v2096_v3  ;;  %v2045_v12 = vpop.f32.mrb[19].mxu0  ;;  %v2086_v13 = vpop.f32.mrb[19].mxu1  ;;  %v2110_v26 = vadd.f32 %v4995_v50, %v2094_v22  ;;  %v2114_v27 = vadd.f32 %v5003_v57, %v2098_v23  ;;  %v5336_v22 = vld [vmem:[#allocation4 + $0x58] sm:$0xff]  ;;  %v5339_v23 = vld [vmem:[#allocation4 + $0x40] sm:$0xff] }
 0x733   :  { %v2109_v62 = vadd.f32 %v4997_v52, %v2093_v6  ;;  %v2113_v1 = vadd.f32 %v5005_v60, %v2097_v7  ;;  %v2111_v24 = vadd.f32 %v4999_v53, %v2095_v20  ;;  %v2115_v25 = vadd.f32 %v5007_v61, %v2099_v21  ;;  %v5330_v20 = vld [vmem:[#allocation4 + $0x30] sm:$0xff]  ;;  %v5333_v21 = vld [vmem:[#allocation4 + $0x48] sm:$0xff] }
 0x734   :  { %v3235_v14 = vmul.f32 -1.442695, %v2108_v10  ;;  %v3236_v15 = vmul.f32 -1.442695, %v2112_v11 }
 0x735   :  { %v3237_v17 = vmul.f32 -1.442695, %v2109_v62  ;;  %v3238_v18 = vmul.f32 -1.442695, %v2113_v1  ;;  %v3239_v28 = vmul.f32 -1.442695, %v2111_v24 }
 0x736   :  { %3543 = vpow2.f32 %v3235_v14  ;;  %v3240_v29 = vmul.f32 -1.442695, %v2115_v25  ;;  %v5313_v1 = vld [vmem:[#allocation4] sm:$0xff]  ;;  %v5316_v14 = vld [vmem:[#allocation4 + $0x10] sm:$0xff]  ;;  %v5345_v25 = vld [vmem:[#allocation4 + $0x68] sm:$0xff] }
 0x737   :  { %3545 = vpow2.f32 %v3236_v15  ;;  %v5319_v15 = vld [vmem:[#allocation4 + $0x28] sm:$0xff]  ;;  %v5342_v24 = vld [vmem:[#allocation4 + $0x50] sm:$0xff] }
 0x738   :  { %3547 = vpow2.f32 %v3237_v17  ;;  %v5322_v17 = vld [vmem:[#allocation4 + $0x38] sm:$0xff] }
 0x739   :  { %3549 = vpow2.f32 %v3238_v18  ;;  %v5327_v18 = vld [vmem:[#allocation4 + $0x20] sm:$0xff] }
 0x73a   :  { %3551 = vtanh.f32 %v2110_v26  ;;  %v5348_v26 = vld [vmem:[#allocation4 + $0x78] sm:$0xff] }
 0x73b   :  { %3553 = vtanh.f32 %v2114_v27  ;;  %v5351_v27 = vld [vmem:[#allocation4 + $0x60] sm:$0xff] }
 0x73c   :  { %3555 = vpow2.f32 %v3239_v28  ;;  %v5354_v28 = vld [vmem:[#allocation4 + $0x70] sm:$0xff] }
 0x73d   :  { %3557 = vpow2.f32 %v3240_v29  ;;  %v5357_v29 = vld [vmem:[#allocation4 + $0x88] sm:$0xff] }
 0x740   :  { %v3544_v30 = vpop.eup %3543 }
 0x741   :  { %v3546_v31 = vpop.eup %3545  ;;  %v2122_v37 = vadd.f32 1.0, %v3544_v30  ;;  %v5360_v30 = vld [vmem:[#allocation4 + $0x98] sm:$0xff] }
 0x742   :  { %v3548_v33 = vpop.eup %3547  ;;  %v2123_v41 = vadd.f32 1.0, %v3546_v31  ;;  %v5363_v31 = vld [vmem:[#allocation4 + $0x80] sm:$0xff] }
 0x743   :  { %v3550_v42 = vpop.eup %3549  ;;  %3559 = vrcp.f32 %v2122_v37  ;;  %v2134_v59 = vadd.f32 1.0, %v3548_v33  ;;  %v5366_v37 = vld [vmem:[#allocation4 + $0x90] sm:$0xff]  ;;  %v5369_v33 = vld [vmem:[#allocation4 + $0xa8] sm:$0xff] }
 0x744   :  { %3561 = vrcp.f32 %v2123_v41  ;;  %v2135_v35 = vadd.f32 1.0, %v3550_v42  ;;  %v3552_v32 = vpop.eup %3551  ;;  %v5372_v41 = vld [vmem:[#allocation4 + $0xb8] sm:$0xff]  ;;  %v5375_v42 = vld [vmem:[#allocation4 + $0xa0] sm:$0xff] }
 0x745   :  { %3563 = vrcp.f32 %v2134_v59  ;;  %v3554_v38 = vpop.eup %3553  ;;  %v5378_v59 = vld [vmem:[#allocation4 + $0xb0] sm:$0xff] }
 0x746   :  { %3565 = vrcp.f32 %v2135_v35  ;;  %v3556_v43 = vpop.eup %3555  ;;  %v5381_v35 = vld [vmem:[#allocation4 + $0xc8] sm:$0xff] }
 0x747   :  { %v3558_v39 = vpop.eup %3557  ;;  %v2148_v46 = vadd.f32 1.0, %v3556_v43  ;;  %v5390_v43 = vld [vmem:[#allocation4 + $0xd0] sm:$0xff] }
 0x748   :  { %v2149_v16 = vadd.f32 1.0, %v3558_v39  ;;  %v5393_v39 = vld [vmem:[#allocation4 + $0xe8] sm:$0xff] }
 0x749   :  { %3567 = vrcp.f32 %v2148_v46  ;;  %v5408_v46 = vld [vmem:[#allocation4 + $0x18] sm:$0xff] }
 0x74a   :  { %3569 = vrcp.f32 %v2149_v16 }
 0x74d   :  { %v3560_v44 = vpop.eup %3559 }
 0x74e   :  { %v3562_v45 = vpop.eup %3561  ;;  %v2162_v40 = vmul.f32 %v3560_v44, %v3552_v32  ;;  %v5384_v32 = vld [vmem:[#allocation4 + $0xd8] sm:$0xff] }
 0x74f   :  { %v3564_v48 = vpop.eup %3563  ;;  %v2163_v19 = vmul.f32 %v3562_v45, %v3554_v38  ;;  %v5387_v38 = vld [vmem:[#allocation4 + $0xc0] sm:$0xff]  ;;  %v5396_v44 = vld [vmem:[#allocation4 + $0xf8] sm:$0xff] }
 0x750   :  { %v3566_v55 = vpop.eup %3565  ;;  %v2160_v58 = vmul.f32 %v3564_v48, %v2156_v47  ;;  %v5399_v45 = vld [vmem:[#allocation4 + $0xe0] sm:$0xff]  ;;  %v5405_v47 = vld [vmem:[#allocation4 + $0x8] sm:$0xff] }
 0x751   :  { %v2161_v63 = vmul.f32 %v3566_v55, %v2157_v36 }
 0x752   :  { %v5306_v0 = vadd.f32 %v2162_v40, %v2160_v58  ;;  %v5402_v40 = vld [vmem:[#allocation4 + $0xf0] sm:$0xff] }
 0x753   :  { %v5308_v2 = vadd.f32 %v2163_v19, %v2161_v63  ;;  %v3568_v51 = vpop.eup %3567 }
 0x754   :  { %3571 = vtanh.f32 %v5306_v0  ;;  %v3570_v3 = vpop.eup %3569 }
 0x755   :  { %3573 = vtanh.f32 %v5308_v2 }
 0x75e   :  { %v3572_v4 = vpop.eup %3571 }
 0x75f   :  { %v3574_v5 = vpop.eup %3573  ;;  %v2168_v6 = vmul.f32 %v3572_v4, %v3568_v51 }
 0x760   :  { %v2169_v54 = vmul.f32 %v3574_v5, %v3570_v3 }
 0x761   :  { %2170 = vst [vmem:[#allocation9] sm:$0x8] %v2168_v6  ;;  %v2172_v7 = vpack.c.bf16 %v2168_v6, %v2168_v6 }
 0x762   :  { %2171 = vst [vmem:[#allocation9 + $0x8] sm:$0x8] %v2169_v54  ;;  %v2173_v8 = vpack.c.bf16 %v2169_v54, %v2169_v54 }
 0x763   :  { %v2176_v9 = vunpack.c.l.b16 %v2172_v7 }
 0x764   :  { %v2177_v10 = vunpack.c.l.b16 %v2173_v8 }
 0x765   :  { %v2178_v11 = vrot.slane %v2176_v9, 3 }
 0x766   :  { %v2179_v12 = vrot.slane %v2177_v10, 2 }
 0x768   :  { %v2180_v13 = vsel %vm1653_vm2, %v2179_v12, %v2178_v11 }
 0x769   :  { %v2181_v62 = vpack.c.b16 %v2180_v13, %v2180_v13 }
 0x76b   :  { %2216 = vmatmul.mubr.bf16.vlgmr.msra.gmra.mrb[20].mxu0 %v2181_v62  ;;  %2257 = vmatmul.mubr.bf16.vlgmr.msra.gmra.mrb[20].mxu1 %v2181_v62 }
 0x76c   :  { %2361 = vmatpush1.bf16.msra.mxu0 %v5313_v1  ;;  %2402 = vmatpush1.bf16.msra.mxu1 %v5316_v14 }
 0x76d   :  { %2362 = vmatprep.subr.bf16.mxu0 %v5319_v15  ;;  %2403 = vmatprep.subr.bf16.mxu1 %v5322_v17 }
 0x76e   :  { %2392 = vmatprep.mubr.bf16.mxu0 %v4212_v34  ;;  %2433 = vmatprep.mubr.bf16.mxu1 %v4212_v34 }
 0x770   :  { %2363 = vmatpush1.bf16.msra.mxu0 %v5327_v18  ;;  %2404 = vmatpush1.bf16.msra.mxu1 %v5330_v20 }
 0x771   :  { %2364 = vmatprep.subr.bf16.mxu0 %v5333_v21  ;;  %2405 = vmatprep.subr.bf16.mxu1 %v5336_v22 }
 0x774   :  { %2365 = vmatpush1.bf16.msra.mxu0 %v5339_v23  ;;  %2406 = vmatpush1.bf16.msra.mxu1 %v5342_v24 }
 0x775   :  { %2366 = vmatprep.subr.bf16.mxu0 %v5345_v25  ;;  %2407 = vmatprep.subr.bf16.mxu1 %v5348_v26 }
 0x778   :  { %2367 = vmatpush1.bf16.msra.mxu0 %v5351_v27  ;;  %2408 = vmatpush1.bf16.msra.mxu1 %v5354_v28 }
 0x779   :  { %2368 = vmatprep.subr.bf16.mxu0 %v5357_v29  ;;  %2409 = vmatprep.subr.bf16.mxu1 %v5360_v30 }
 0x77c   :  { %2369 = vmatpush1.bf16.msra.mxu0 %v5363_v31  ;;  %2410 = vmatpush1.bf16.msra.mxu1 %v5366_v37 }
 0x77d   :  { %2370 = vmatprep.subr.bf16.mxu0 %v5369_v33  ;;  %2411 = vmatprep.subr.bf16.mxu1 %v5372_v41 }
 0x780   :  { %2371 = vmatpush1.bf16.msra.mxu0 %v5375_v42  ;;  %2412 = vmatpush1.bf16.msra.mxu1 %v5378_v59 }
 0x781   :  { %2372 = vmatprep.subr.bf16.mxu0 %v5381_v35  ;;  %2413 = vmatprep.subr.bf16.mxu1 %v5384_v32 }
 0x784   :  { %2373 = vmatpush1.bf16.msra.mxu0 %v5387_v38  ;;  %2414 = vmatpush1.bf16.msra.mxu1 %v5390_v43 }
 0x785   :  { %2374 = vmatprep.subr.bf16.mxu0 %v5393_v39  ;;  %2415 = vmatprep.subr.bf16.mxu1 %v5396_v44 }
 0x788   :  { %2375 = vmatpush1.bf16.msra.mxu0 %v5399_v45  ;;  %2416 = vmatpush1.bf16.msra.mxu1 %v5402_v40 }
 0x789   :  { %2537 = vmatprep.subr.bf16.mxu0 %v5405_v47  ;;  %2578 = vmatprep.subr.bf16.mxu1 %v5408_v46 }
 0x83e   :  { %v2217_v48 = vpop.f32.mrb[20].mxu0  ;;  %v2258_v19 = vpop.f32.mrb[20].mxu1 }
 0x83f   :  { %v2269_v36 = vrot.slane %v2217_v48, 4  ;;  %v2273_v16 = vrot.slane %v2217_v48, 5  ;;  %v2219_v55 = vpop.f32.mrb[21].mxu0  ;;  %v2260_v58 = vpop.f32.mrb[21].mxu1 }
 0x840   :  { %v2270_v63 = vrot.slane %v2219_v55, 4  ;;  %v2274_v51 = vrot.slane %v2219_v55, 5  ;;  %v2221_v3 = vpop.f32.mrb[22].mxu0  ;;  %v2262_v4 = vpop.f32.mrb[22].mxu1  ;;  %v2272_v62 = vrot.slane %v2260_v58, 4  ;;  %v2276_v48 = vrot.slane %v2260_v58, 5 }
 0x841   :  { %v2285_v5 = vadd.f32 %v4993_v49, %v2269_v36  ;;  %v2289_v6 = vadd.f32 %v5001_v56, %v2273_v16  ;;  %v2222_v54 = vpop.f32.mrb[23].mxu0  ;;  %v2263_v7 = vpop.f32.mrb[23].mxu1  ;;  %v2271_v55 = vrot.slane %v2258_v19, 4  ;;  %v2275_v3 = vrot.slane %v2258_v19, 5 }
 0x842   :  { %v2286_v8 = vadd.f32 %v4997_v52, %v2270_v63  ;;  %v2290_v9 = vadd.f32 %v5005_v60, %v2274_v51  ;;  %v2288_v36 = vadd.f32 %v4999_v53, %v2272_v62  ;;  %v2292_v16 = vadd.f32 %v5007_v61, %v2276_v48 }
 0x843   :  { %v3241_v10 = vmul.f32 -1.442695, %v2285_v5  ;;  %v3242_v11 = vmul.f32 -1.442695, %v2289_v6  ;;  %v2287_v63 = vadd.f32 %v4995_v50, %v2271_v55  ;;  %v2291_v51 = vadd.f32 %v5003_v57, %v2275_v3 }
 0x844   :  { %v3243_v12 = vmul.f32 -1.442695, %v2286_v8  ;;  %v3244_v13 = vmul.f32 -1.442695, %v2290_v9  ;;  %v3245_v4 = vmul.f32 -1.442695, %v2288_v36 }
 0x845   :  { %3575 = vpow2.f32 %v3241_v10  ;;  %v3246_v5 = vmul.f32 -1.442695, %v2292_v16  ;;  %v2333_v36 = vrot.slane %v5306_v0, 7 }
 0x846   :  { %3577 = vpow2.f32 %v3242_v11 }
 0x847   :  { %3579 = vpow2.f32 %v3243_v12 }
 0x848   :  { %3581 = vpow2.f32 %v3244_v13 }
 0x849   :  { %3583 = vtanh.f32 %v2287_v63 }
 0x84a   :  { %3585 = vtanh.f32 %v2291_v51 }
 0x84b   :  { %3587 = vpow2.f32 %v3245_v4  ;;  %v2334_v4 = vrot.slane %v5308_v2, 7 }
 0x84c   :  { %3589 = vpow2.f32 %v3246_v5 }
 0x84f   :  { %v3576_v6 = vpop.eup %3575 }
 0x850   :  { %v3578_v54 = vpop.eup %3577  ;;  %v2299_v58 = vadd.f32 1.0, %v3576_v6 }
 0x851   :  { %v3580_v7 = vpop.eup %3579  ;;  %v2300_v19 = vadd.f32 1.0, %v3578_v54 }
 0x852   :  { %v3582_v8 = vpop.eup %3581  ;;  %3591 = vrcp.f32 %v2299_v58  ;;  %v2311_v9 = vadd.f32 1.0, %v3580_v7 }
 0x853   :  { %3593 = vrcp.f32 %v2300_v19  ;;  %v2312_v10 = vadd.f32 1.0, %v3582_v8  ;;  %v3584_v11 = vpop.eup %3583 }
 0x854   :  { %3595 = vrcp.f32 %v2311_v9  ;;  %v3586_v12 = vpop.eup %3585 }
 0x855   :  { %3597 = vrcp.f32 %v2312_v10  ;;  %v3588_v13 = vpop.eup %3587 }
 0x856   :  { %v3590_v62 = vpop.eup %3589  ;;  %v2325_v16 = vadd.f32 1.0, %v3588_v13 }
 0x857   :  { %v2326_v5 = vadd.f32 1.0, %v3590_v62 }
 0x858   :  { %3599 = vrcp.f32 %v2325_v16 }
 0x859   :  { %3601 = vrcp.f32 %v2326_v5 }
 0x85c   :  { %v3592_v48 = vpop.eup %3591 }
 0x85d   :  { %v3594_v55 = vpop.eup %3593  ;;  %v2339_v3 = vmul.f32 %v3592_v48, %v3584_v11 }
 0x85e   :  { %v3596_v63 = vpop.eup %3595  ;;  %v2340_v51 = vmul.f32 %v3594_v55, %v3586_v12 }
 0x85f   :  { %v3598_v6 = vpop.eup %3597  ;;  %v2337_v54 = vmul.f32 %v3596_v63, %v2333_v36 }
 0x860   :  { %v2338_v58 = vmul.f32 %v3598_v6, %v2334_v4 }
 0x861   :  { %v5421_v7 = vadd.f32 %v2339_v3, %v2337_v54 }
 0x862   :  { %v5423_v19 = vadd.f32 %v2340_v51, %v2338_v58  ;;  %v3600_v0 = vpop.eup %3599 }
 0x863   :  { %3603 = vtanh.f32 %v5421_v7  ;;  %v3602_v8 = vpop.eup %3601 }
 0x864   :  { %3605 = vtanh.f32 %v5423_v19 }
 0x86d   :  { %v3604_v9 = vpop.eup %3603 }
 0x86e   :  { %v3606_v10 = vpop.eup %3605  ;;  %v2345_v11 = vmul.f32 %v3604_v9, %v3600_v0 }
 0x86f   :  { %v2346_v2 = vmul.f32 %v3606_v10, %v3602_v8 }
 0x870   :  { %2347 = vst [vmem:[#allocation9] sm:$0x10] %v2345_v11  ;;  %v2349_v12 = vpack.c.bf16 %v2345_v11, %v2345_v11 }
 0x871   :  { %2348 = vst [vmem:[#allocation9 + $0x8] sm:$0x10] %v2346_v2  ;;  %v2350_v13 = vpack.c.bf16 %v2346_v2, %v2346_v2 }
 0x872   :  { %v2353_v62 = vunpack.c.l.b16 %v2349_v12 }
 0x873   :  { %v2354_v48 = vunpack.c.l.b16 %v2350_v13 }
 0x874   :  { %v2355_v55 = vrot.slane %v2353_v62, 4 }
 0x875   :  { %v2356_v3 = vrot.slane %v2354_v48, 3 }
 0x877   :  { %v2357_v36 = vsel %vm1653_vm2, %v2356_v3, %v2355_v55 }
 0x878   :  { %v2358_v16 = vpack.c.b16 %v2357_v36, %v2357_v36 }
 0x87a   :  { %2393 = vmatmul.mubr.bf16.vlgmr.msra.gmra.mrb[24].mxu0 %v2358_v16  ;;  %2434 = vmatmul.mubr.bf16.vlgmr.msra.gmra.mrb[24].mxu1 %v2358_v16 }
 0x87b   :  { %2538 = vmatpush1.bf16.msra.mxu0 %v5313_v1  ;;  %2579 = vmatpush1.bf16.msra.mxu1 %v5316_v14 }
 0x87c   :  { %2539 = vmatprep.subr.bf16.mxu0 %v5319_v15  ;;  %2580 = vmatprep.subr.bf16.mxu1 %v5322_v17 }
 0x87d   :  { %2569 = vmatprep.mubr.bf16.mxu0 %v4212_v34  ;;  %2610 = vmatprep.mubr.bf16.mxu1 %v4212_v34 }
 0x87f   :  { %2540 = vmatpush1.bf16.msra.mxu0 %v5327_v18  ;;  %2581 = vmatpush1.bf16.msra.mxu1 %v5330_v20 }
 0x880   :  { %2541 = vmatprep.subr.bf16.mxu0 %v5333_v21  ;;  %2582 = vmatprep.subr.bf16.mxu1 %v5336_v22 }
 0x883   :  { %2542 = vmatpush1.bf16.msra.mxu0 %v5339_v23  ;;  %2583 = vmatpush1.bf16.msra.mxu1 %v5342_v24 }
 0x884   :  { %2543 = vmatprep.subr.bf16.mxu0 %v5345_v25  ;;  %2584 = vmatprep.subr.bf16.mxu1 %v5348_v26 }
 0x887   :  { %2544 = vmatpush1.bf16.msra.mxu0 %v5351_v27  ;;  %2585 = vmatpush1.bf16.msra.mxu1 %v5354_v28 }
 0x888   :  { %2545 = vmatprep.subr.bf16.mxu0 %v5357_v29  ;;  %2586 = vmatprep.subr.bf16.mxu1 %v5360_v30 }
 0x88b   :  { %2546 = vmatpush1.bf16.msra.mxu0 %v5363_v31  ;;  %2587 = vmatpush1.bf16.msra.mxu1 %v5366_v37 }
 0x88c   :  { %2547 = vmatprep.subr.bf16.mxu0 %v5369_v33  ;;  %2588 = vmatprep.subr.bf16.mxu1 %v5372_v41 }
 0x88f   :  { %2548 = vmatpush1.bf16.msra.mxu0 %v5375_v42  ;;  %2589 = vmatpush1.bf16.msra.mxu1 %v5378_v59 }
 0x890   :  { %2549 = vmatprep.subr.bf16.mxu0 %v5381_v35  ;;  %2590 = vmatprep.subr.bf16.mxu1 %v5384_v32 }
 0x893   :  { %2550 = vmatpush1.bf16.msra.mxu0 %v5387_v38  ;;  %2591 = vmatpush1.bf16.msra.mxu1 %v5390_v43 }
 0x894   :  { %2551 = vmatprep.subr.bf16.mxu0 %v5393_v39  ;;  %2592 = vmatprep.subr.bf16.mxu1 %v5396_v44 }
 0x897   :  { %2552 = vmatpush1.bf16.msra.mxu0 %v5399_v45  ;;  %2593 = vmatpush1.bf16.msra.mxu1 %v5402_v40 }
 0x898   :  { %2714 = vmatprep.subr.bf16.mxu0 %v5405_v47  ;;  %2755 = vmatprep.subr.bf16.mxu1 %v5408_v46 }
 0x94d   :  { %v2394_v63 = vpop.f32.mrb[24].mxu0  ;;  %v2435_v51 = vpop.f32.mrb[24].mxu1 }
 0x94e   :  { %v2446_v4 = vrot.slane %v2394_v63, 3  ;;  %v2450_v5 = vrot.slane %v2394_v63, 4  ;;  %v2396_v6 = vpop.f32.mrb[25].mxu0  ;;  %v2437_v54 = vpop.f32.mrb[25].mxu1  ;;  %v2448_v16 = vrot.slane %v2435_v51, 3  ;;  %v2452_v63 = vrot.slane %v2435_v51, 4 }
 0x94f   :  { %v2447_v58 = vrot.slane %v2396_v6, 3  ;;  %v2451_v0 = vrot.slane %v2396_v6, 4  ;;  %v2398_v8 = vpop.f32.mrb[26].mxu0  ;;  %v2439_v9 = vpop.f32.mrb[26].mxu1  ;;  %v2449_v3 = vrot.slane %v2437_v54, 3  ;;  %v2453_v36 = vrot.slane %v2437_v54, 4 }
 0x950   :  { %v2462_v10 = vadd.f32 %v4993_v49, %v2446_v4  ;;  %v2466_v11 = vadd.f32 %v5001_v56, %v2450_v5  ;;  %v2399_v2 = vpop.f32.mrb[27].mxu0  ;;  %v2440_v12 = vpop.f32.mrb[27].mxu1  ;;  %v2464_v6 = vadd.f32 %v4995_v50, %v2448_v16  ;;  %v2510_v16 = vrot.slane %v5421_v7, 7 }
 0x951   :  { %v2463_v47 = vadd.f32 %v4997_v52, %v2447_v58  ;;  %v2467_v46 = vadd.f32 %v5005_v60, %v2451_v0  ;;  %v2465_v4 = vadd.f32 %v4999_v53, %v2449_v3  ;;  %v2469_v5 = vadd.f32 %v5007_v61, %v2453_v36 }
 0x952   :  { %v3247_v13 = vmul.f32 -1.442695, %v2462_v10  ;;  %v3248_v62 = vmul.f32 -1.442695, %v2466_v11  ;;  %v2468_v58 = vadd.f32 %v5003_v57, %v2452_v63 }
 0x953   :  { %v3249_v48 = vmul.f32 -1.442695, %v2463_v47  ;;  %v3250_v55 = vmul.f32 -1.442695, %v2467_v46  ;;  %v3251_v0 = vmul.f32 -1.442695, %v2465_v4 }
 0x954   :  { %3607 = vpow2.f32 %v3247_v13  ;;  %v3252_v8 = vmul.f32 -1.442695, %v2469_v5 }
 0x955   :  { %3609 = vpow2.f32 %v3248_v62 }
 0x956   :  { %3611 = vpow2.f32 %v3249_v48 }
 0x957   :  { %3613 = vpow2.f32 %v3250_v55 }
 0x958   :  { %3615 = vtanh.f32 %v2464_v6  ;;  %v2511_v6 = vrot.slane %v5423_v19, 7 }
 0x959   :  { %3617 = vtanh.f32 %v2468_v58 }
 0x95a   :  { %3619 = vpow2.f32 %v3251_v0 }
 0x95b   :  { %3621 = vpow2.f32 %v3252_v8 }
 0x95e   :  { %v3608_v9 = vpop.eup %3607 }
 0x95f   :  { %v3610_v10 = vpop.eup %3609  ;;  %v2476_v54 = vadd.f32 1.0, %v3608_v9 }
 0x960   :  { %v3612_v11 = vpop.eup %3611  ;;  %v2477_v51 = vadd.f32 1.0, %v3610_v10 }
 0x961   :  { %v3614_v2 = vpop.eup %3613  ;;  %3623 = vrcp.f32 %v2476_v54  ;;  %v2488_v12 = vadd.f32 1.0, %v3612_v11 }
 0x962   :  { %3625 = vrcp.f32 %v2477_v51  ;;  %v2489_v47 = vadd.f32 1.0, %v3614_v2  ;;  %v3616_v46 = vpop.eup %3615 }
 0x963   :  { %3627 = vrcp.f32 %v2488_v12  ;;  %v3618_v13 = vpop.eup %3617 }
 0x964   :  { %3629 = vrcp.f32 %v2489_v47  ;;  %v3620_v62 = vpop.eup %3619 }
 0x965   :  { %v3622_v48 = vpop.eup %3621  ;;  %v2502_v63 = vadd.f32 1.0, %v3620_v62 }
 0x966   :  { %v2503_v58 = vadd.f32 1.0, %v3622_v48 }
 0x967   :  { %3631 = vrcp.f32 %v2502_v63 }
 0x968   :  { %3633 = vrcp.f32 %v2503_v58 }
 0x96b   :  { %v3624_v55 = vpop.eup %3623 }
 0x96c   :  { %v3626_v3 = vpop.eup %3625  ;;  %v2516_v36 = vmul.f32 %v3624_v55, %v3616_v46 }
 0x96d   :  { %v3628_v4 = vpop.eup %3627  ;;  %v2517_v5 = vmul.f32 %v3626_v3, %v3618_v13 }
 0x96e   :  { %v3630_v0 = vpop.eup %3629  ;;  %v2514_v8 = vmul.f32 %v3628_v4, %v2510_v16 }
 0x96f   :  { %v2515_v9 = vmul.f32 %v3630_v0, %v2511_v6 }
 0x970   :  { %v5472_v10 = vadd.f32 %v2516_v36, %v2514_v8 }
 0x971   :  { %v5474_v54 = vadd.f32 %v2517_v5, %v2515_v9  ;;  %v3632_v7 = vpop.eup %3631 }
 0x972   :  { %3635 = vtanh.f32 %v5472_v10  ;;  %v3634_v11 = vpop.eup %3633 }
 0x973   :  { %3637 = vtanh.f32 %v5474_v54 }
 0x97c   :  { %v3636_v51 = vpop.eup %3635 }
 0x97d   :  { %v3638_v2 = vpop.eup %3637  ;;  %v2522_v12 = vmul.f32 %v3636_v51, %v3632_v7 }
 0x97e   :  { %v2523_v19 = vmul.f32 %v3638_v2, %v3634_v11 }
 0x97f   :  { %2524 = vst [vmem:[#allocation9] sm:$0x20] %v2522_v12  ;;  %v2526_v47 = vpack.c.bf16 %v2522_v12, %v2522_v12 }
 0x980   :  { %2525 = vst [vmem:[#allocation9 + $0x8] sm:$0x20] %v2523_v19  ;;  %v2527_v46 = vpack.c.bf16 %v2523_v19, %v2523_v19  ;;  %v2687_v19 = vrot.slane %v5472_v10, 7 }
 0x981   :  { %v2530_v13 = vunpack.c.l.b16 %v2526_v47 }
 0x982   :  { %v2531_v62 = vunpack.c.l.b16 %v2527_v46 }
 0x983   :  { %v2532_v48 = vrot.slane %v2530_v13, 5 }
 0x984   :  { %v2533_v55 = vrot.slane %v2531_v62, 4  ;;  %v2688_v62 = vrot.slane %v5474_v54, 7 }
 0x986   :  { %v2534_v3 = vsel %vm1653_vm2, %v2533_v55, %v2532_v48 }
 0x987   :  { %v2535_v36 = vpack.c.b16 %v2534_v3, %v2534_v3 }
 0x989   :  { %2570 = vmatmul.mubr.bf16.vlgmr.msra.gmra.mrb[28].mxu0 %v2535_v36  ;;  %2611 = vmatmul.mubr.bf16.vlgmr.msra.gmra.mrb[28].mxu1 %v2535_v36 }
 0x98a   :  { %2715 = vmatpush1.bf16.msra.mxu0 %v5313_v1  ;;  %2756 = vmatpush1.bf16.msra.mxu1 %v5316_v14 }
 0x98b   :  { %2716 = vmatprep.subr.bf16.mxu0 %v5319_v15  ;;  %2757 = vmatprep.subr.bf16.mxu1 %v5322_v17 }
 0x98c   :  { %2746 = vmatprep.mubr.bf16.mxu0 %v4212_v34  ;;  %2787 = vmatprep.mubr.bf16.mxu1 %v4212_v34 }
 0x98e   :  { %2717 = vmatpush1.bf16.msra.mxu0 %v5327_v18  ;;  %2758 = vmatpush1.bf16.msra.mxu1 %v5330_v20 }
 0x98f   :  { %2718 = vmatprep.subr.bf16.mxu0 %v5333_v21  ;;  %2759 = vmatprep.subr.bf16.mxu1 %v5336_v22 }
 0x992   :  { %2719 = vmatpush1.bf16.msra.mxu0 %v5339_v23  ;;  %2760 = vmatpush1.bf16.msra.mxu1 %v5342_v24 }
 0x993   :  { %2720 = vmatprep.subr.bf16.mxu0 %v5345_v25  ;;  %2761 = vmatprep.subr.bf16.mxu1 %v5348_v26 }
 0x996   :  { %2721 = vmatpush1.bf16.msra.mxu0 %v5351_v27  ;;  %2762 = vmatpush1.bf16.msra.mxu1 %v5354_v28 }
 0x997   :  { %2722 = vmatprep.subr.bf16.mxu0 %v5357_v29  ;;  %2763 = vmatprep.subr.bf16.mxu1 %v5360_v30 }
 0x99a   :  { %2723 = vmatpush1.bf16.msra.mxu0 %v5363_v31  ;;  %2764 = vmatpush1.bf16.msra.mxu1 %v5366_v37 }
 0x99b   :  { %2724 = vmatprep.subr.bf16.mxu0 %v5369_v33  ;;  %2765 = vmatprep.subr.bf16.mxu1 %v5372_v41 }
 0x99e   :  { %2725 = vmatpush1.bf16.msra.mxu0 %v5375_v42  ;;  %2766 = vmatpush1.bf16.msra.mxu1 %v5378_v59 }
 0x99f   :  { %2726 = vmatprep.subr.bf16.mxu0 %v5381_v35  ;;  %2767 = vmatprep.subr.bf16.mxu1 %v5384_v32 }
 0x9a2   :  { %2727 = vmatpush1.bf16.msra.mxu0 %v5387_v38  ;;  %2768 = vmatpush1.bf16.msra.mxu1 %v5390_v43 }
 0x9a3   :  { %2728 = vmatprep.subr.bf16.mxu0 %v5393_v39  ;;  %2769 = vmatprep.subr.bf16.mxu1 %v5396_v44 }
 0x9a6   :  { %2729 = vmatpush1.bf16.msra.mxu0 %v5399_v45  ;;  %2770 = vmatpush1.bf16.msra.mxu1 %v5402_v40 }
 0xa5c   :  { %v2571_v34 = vpop.f32.mrb[28].mxu0  ;;  %v2612_v1 = vpop.f32.mrb[28].mxu1 }
 0xa5d   :  { %v2623_v14 = vrot.slane %v2571_v34, 2  ;;  %v2627_v15 = vrot.slane %v2571_v34, 3  ;;  %v2573_v17 = vpop.f32.mrb[29].mxu0  ;;  %v2614_v18 = vpop.f32.mrb[29].mxu1  ;;  %v2625_v59 = vrot.slane %v2612_v1, 2  ;;  %v2629_v35 = vrot.slane %v2612_v1, 3 }
 0xa5e   :  { %v2624_v20 = vrot.slane %v2573_v17, 2  ;;  %v2628_v21 = vrot.slane %v2573_v17, 3  ;;  %v2575_v22 = vpop.f32.mrb[30].mxu0  ;;  %v2616_v23 = vpop.f32.mrb[30].mxu1  ;;  %v2626_v41 = vrot.slane %v2614_v18, 2  ;;  %v2630_v42 = vrot.slane %v2614_v18, 3 }
 0xa5f   :  { %v2639_v24 = vadd.f32 %v4993_v49, %v2623_v14  ;;  %v2643_v25 = vadd.f32 %v5001_v56, %v2627_v15  ;;  %v2576_v26 = vpop.f32.mrb[31].mxu0  ;;  %v2617_v27 = vpop.f32.mrb[31].mxu1  ;;  %v2641_v43 = vadd.f32 %v4995_v50, %v2625_v59  ;;  %v2645_v39 = vadd.f32 %v5003_v57, %v2629_v35 }
 0xa60   :  { %v2640_v28 = vadd.f32 %v4997_v52, %v2624_v20  ;;  %v2644_v29 = vadd.f32 %v5005_v60, %v2628_v21  ;;  %v2642_v32 = vadd.f32 %v4999_v53, %v2626_v41  ;;  %v2646_v38 = vadd.f32 %v5007_v61, %v2630_v42 }
 0xa61   :  { %v3253_v30 = vmul.f32 -1.442695, %v2639_v24  ;;  %v3254_v31 = vmul.f32 -1.442695, %v2643_v25 }
 0xa62   :  { %v3255_v37 = vmul.f32 -1.442695, %v2640_v28  ;;  %v3256_v33 = vmul.f32 -1.442695, %v2644_v29  ;;  %v3257_v44 = vmul.f32 -1.442695, %v2642_v32 }
 0xa63   :  { %3639 = vpow2.f32 %v3253_v30  ;;  %v3258_v45 = vmul.f32 -1.442695, %v2646_v38 }
 0xa64   :  { %3641 = vpow2.f32 %v3254_v31 }
 0xa65   :  { %3643 = vpow2.f32 %v3255_v37 }
 0xa66   :  { %3645 = vpow2.f32 %v3256_v33 }
 0xa67   :  { %3647 = vtanh.f32 %v2641_v43 }
 0xa68   :  { %3649 = vtanh.f32 %v2645_v39 }
 0xa69   :  { %3651 = vpow2.f32 %v3257_v44 }
 0xa6a   :  { %3653 = vpow2.f32 %v3258_v45 }
 0xa6d   :  { %v3640_v40 = vpop.eup %3639 }
 0xa6e   :  { %v3642_v16 = vpop.eup %3641  ;;  %v2653_v63 = vadd.f32 1.0, %v3640_v40 }
 0xa6f   :  { %v3644_v4 = vpop.eup %3643  ;;  %v2654_v5 = vadd.f32 1.0, %v3642_v16 }
 0xa70   :  { %v3646_v6 = vpop.eup %3645  ;;  %3655 = vrcp.f32 %v2653_v63  ;;  %v2665_v58 = vadd.f32 1.0, %v3644_v4 }
 0xa71   :  { %3657 = vrcp.f32 %v2654_v5  ;;  %v2666_v0 = vadd.f32 1.0, %v3646_v6  ;;  %v3648_v8 = vpop.eup %3647 }
 0xa72   :  { %3659 = vrcp.f32 %v2665_v58  ;;  %v3650_v9 = vpop.eup %3649 }
 0xa73   :  { %3661 = vrcp.f32 %v2666_v0  ;;  %v3652_v7 = vpop.eup %3651 }
 0xa74   :  { %v3654_v11 = vpop.eup %3653  ;;  %v2679_v47 = vadd.f32 1.0, %v3652_v7 }
 0xa75   :  { %v2680_v48 = vadd.f32 1.0, %v3654_v11 }
 0xa76   :  { %3663 = vrcp.f32 %v2679_v47 }
 0xa77   :  { %3665 = vrcp.f32 %v2680_v48 }
 0xa7a   :  { %v3656_v51 = vpop.eup %3655 }
 0xa7b   :  { %v3658_v2 = vpop.eup %3657  ;;  %v2693_v12 = vmul.f32 %v3656_v51, %v3648_v8 }
 0xa7c   :  { %v3660_v46 = vpop.eup %3659  ;;  %v2694_v13 = vmul.f32 %v3658_v2, %v3650_v9 }
 0xa7d   :  { %v3662_v55 = vpop.eup %3661  ;;  %v2691_v3 = vmul.f32 %v3660_v46, %v2687_v19 }
 0xa7e   :  { %v2692_v36 = vmul.f32 %v3662_v55, %v2688_v62 }
 0xa7f   :  { %v5521_v34 = vadd.f32 %v2693_v12, %v2691_v3 }
 0xa80   :  { %v5523_v1 = vadd.f32 %v2694_v13, %v2692_v36  ;;  %v3664_v10 = vpop.eup %3663 }
 0xa81   :  { %3667 = vtanh.f32 %v5521_v34  ;;  %v3666_v14 = vpop.eup %3665  ;;  %v2864_v55 = vrot.slane %v5521_v34, 7 }
 0xa82   :  { %3669 = vtanh.f32 %v5523_v1 }
 0xa8b   :  { %v3668_v15 = vpop.eup %3667 }
 0xa8c   :  { %v3670_v17 = vpop.eup %3669  ;;  %v2699_v18 = vmul.f32 %v3668_v15, %v3664_v10 }
 0xa8d   :  { %v2700_v54 = vmul.f32 %v3670_v17, %v3666_v14  ;;  %v2865_v14 = vrot.slane %v5523_v1, 7 }
 0xa8e   :  { %2701 = vst [vmem:[#allocation9] sm:$0x40] %v2699_v18  ;;  %v2703_v20 = vpack.c.bf16 %v2699_v18, %v2699_v18 }
 0xa8f   :  { %2702 = vst [vmem:[#allocation9 + $0x8] sm:$0x40] %v2700_v54  ;;  %v2704_v21 = vpack.c.bf16 %v2700_v54, %v2700_v54 }
 0xa90   :  { %v2707_v22 = vunpack.c.l.b16 %v2703_v20 }
 0xa91   :  { %v2708_v23 = vunpack.c.l.b16 %v2704_v21 }
 0xa92   :  { %v2709_v24 = vrot.slane %v2707_v22, 6 }
 0xa93   :  { %v2710_v25 = vrot.slane %v2708_v23, 5 }
 0xa95   :  { %v2711_v26 = vsel %vm1653_vm2, %v2710_v25, %v2709_v24 }
 0xa96   :  { %v2712_v27 = vpack.c.b16 %v2711_v26, %v2711_v26 }
 0xa98   :  { %2747 = vmatmul.mubr.bf16.vlgmr.msra.gmra.mrb[32].mxu0 %v2712_v27  ;;  %2788 = vmatmul.mubr.bf16.vlgmr.msra.gmra.mrb[32].mxu1 %v2712_v27 }
 0xb6b   :  { %v2748_v28 = vpop.f32.mrb[32].mxu0  ;;  %v2789_v29 = vpop.f32.mrb[32].mxu1 }
 0xb6c   :  { %v2800_v30 = vrot.slane %v2748_v28, 1  ;;  %v2804_v31 = vrot.slane %v2748_v28, 2  ;;  %v2750_v37 = vpop.f32.mrb[33].mxu0  ;;  %v2791_v33 = vpop.f32.mrb[33].mxu1  ;;  %v2802_v58 = vrot.slane %v2789_v29, 1  ;;  %v2806_v0 = vrot.slane %v2789_v29, 2 }
 0xb6d   :  { %v2801_v41 = vrot.slane %v2750_v37, 1  ;;  %v2805_v42 = vrot.slane %v2750_v37, 2  ;;  %v2752_v59 = vpop.f32.mrb[34].mxu0  ;;  %v2793_v35 = vpop.f32.mrb[34].mxu1  ;;  %v2803_v5 = vrot.slane %v2791_v33, 1  ;;  %v2807_v6 = vrot.slane %v2791_v33, 2 }
 0xb6e   :  { %v2816_v32 = vadd.f32 %v4993_v49, %v2800_v30  ;;  %v2820_v38 = vadd.f32 %v5001_v56, %v2804_v31  ;;  %v2753_v43 = vpop.f32.mrb[35].mxu0  ;;  %v2794_v39 = vpop.f32.mrb[35].mxu1 }
 0xb6f   :  { %v2817_v44 = vadd.f32 %v4997_v52, %v2801_v41  ;;  %v2821_v45 = vadd.f32 %v5005_v60, %v2805_v42  ;;  %v2819_v49 = vadd.f32 %v4999_v53, %v2803_v5  ;;  %v2823_v56 = vadd.f32 %v5007_v61, %v2807_v6 }
 0xb70   :  { %v3259_v40 = vmul.f32 -1.442695, %v2816_v32  ;;  %v3260_v16 = vmul.f32 -1.442695, %v2820_v38  ;;  %v2818_v52 = vadd.f32 %v4995_v50, %v2802_v58  ;;  %v2822_v60 = vadd.f32 %v5003_v57, %v2806_v0 }
 0xb71   :  { %v3261_v63 = vmul.f32 -1.442695, %v2817_v44  ;;  %v3262_v4 = vmul.f32 -1.442695, %v2821_v45  ;;  %v3263_v8 = vmul.f32 -1.442695, %v2819_v49 }
 0xb72   :  { %3671 = vpow2.f32 %v3259_v40  ;;  %v3264_v9 = vmul.f32 -1.442695, %v2823_v56 }
 0xb73   :  { %3673 = vpow2.f32 %v3260_v16 }
 0xb74   :  { %3675 = vpow2.f32 %v3261_v63 }
 0xb75   :  { %3677 = vpow2.f32 %v3262_v4 }
 0xb76   :  { %3679 = vtanh.f32 %v2818_v52 }
 0xb77   :  { %3681 = vtanh.f32 %v2822_v60 }
 0xb78   :  { %3683 = vpow2.f32 %v3263_v8 }
 0xb79   :  { %3685 = vpow2.f32 %v3264_v9 }
 0xb7c   :  { %v3672_v7 = vpop.eup %3671 }
 0xb7d   :  { %v3674_v11 = vpop.eup %3673  ;;  %v2830_v51 = vadd.f32 1.0, %v3672_v7 }
 0xb7e   :  { %v3676_v2 = vpop.eup %3675  ;;  %v2831_v12 = vadd.f32 1.0, %v3674_v11 }
 0xb7f   :  { %v3678_v19 = vpop.eup %3677  ;;  %3687 = vrcp.f32 %v2830_v51  ;;  %v2842_v53 = vadd.f32 1.0, %v3676_v2 }
 0xb80   :  { %3689 = vrcp.f32 %v2831_v12  ;;  %v2843_v61 = vadd.f32 1.0, %v3678_v19  ;;  %v3680_v50 = vpop.eup %3679 }
 0xb81   :  { %3691 = vrcp.f32 %v2842_v53  ;;  %v3682_v57 = vpop.eup %3681 }
 0xb82   :  { %3693 = vrcp.f32 %v2843_v61  ;;  %v3684_v47 = vpop.eup %3683 }
 0xb83   :  { %v3686_v46 = vpop.eup %3685  ;;  %v2856_v3 = vadd.f32 1.0, %v3684_v47 }
 0xb84   :  { %v2857_v15 = vadd.f32 1.0, %v3686_v46 }
 0xb85   :  { %3695 = vrcp.f32 %v2856_v3 }
 0xb86   :  { %3697 = vrcp.f32 %v2857_v15 }
 0xb89   :  { %v3688_v13 = vpop.eup %3687 }
 0xb8a   :  { %v3690_v62 = vpop.eup %3689  ;;  %v2870_v48 = vmul.f32 %v3688_v13, %v3680_v50 }
 0xb8b   :  { %v3692_v36 = vpop.eup %3691  ;;  %v2871_v10 = vmul.f32 %v3690_v62, %v3682_v57 }
 0xb8c   :  { %v3694_v17 = vpop.eup %3693  ;;  %v2868_v18 = vmul.f32 %v3692_v36, %v2864_v55 }
 0xb8d   :  { %v2869_v54 = vmul.f32 %v3694_v17, %v2865_v14 }
 0xb8e   :  { %v2872_v20 = vadd.f32 %v2870_v48, %v2868_v18 }
 0xb8f   :  { %v2873_v21 = vadd.f32 %v2871_v10, %v2869_v54  ;;  %v3696_v22 = vpop.eup %3695 }
 0xb90   :  { %3699 = vtanh.f32 %v2872_v20  ;;  %v3698_v23 = vpop.eup %3697 }
 0xb91   :  { %3701 = vtanh.f32 %v2873_v21 }
 0xb9a   :  { %v3700_v34 = vpop.eup %3699 }
 0xb9b   :  { %v3702_v24 = vpop.eup %3701  ;;  %v2876_v25 = vmul.f32 %v3700_v34, %v3696_v22 }
 0xb9c   :  { %v2877_v26 = vmul.f32 %v3702_v24, %v3698_v23 }
 0xb9d   :  { %2878 = vst [vmem:[#allocation9] sm:$0x80] %v2876_v25 }
 0xb9e   :  { %2879 = vst [vmem:[#allocation9 + $0x8] sm:$0x80] %v2877_v26 }
 0xb9f   :  { %4142 = shalt.err (!%p4139_p5)
}
 0xba0   :  { %s5568_s8 = sld [smem:[#allocation50_spill]] }
 0xba6   :  { %s4143_s16 = scalar_lea.hbm %s5568_s8, 256 }
 0xba7   :  { %p4144_p6 = scmp.ne.s32.totalorder %s5568_s8, %s4143_s16  ;;  %p4147_p7 = scmp.lt.u32.totalorder %s4143_s16, %s5568_s8 }
 0xba9   :  { %p4149_p8 = pnand %p4147_p7, %p4144_p6 }
 0xbab   :  { %4152 = shalt.err (!%p4149_p8)
}
 0xbac   :  { %s4214_s22 = smov 8  }
 0xbad   :  { %2891 = dma.vmem_to_hbm [thread:$0]  %s2886_s13, 256, %s5568_s8, [#allocation10], %s5566_s10, %s5566_s10, %s4214_s22  }
 0xbae   :  { %4191 = dma.done.wait [#allocation10], 256  }
 0xbaf   :  { %4192 = vsyncadd [#allocation10], 4294967040 }
 0xbb0   :  { %2895 = vsyncpa [#allocation10], 1 }
 0xbb1   :  { %2896 = vsyncmov [#allocation5] }
 0xbb4   :  { %s2897_s2 = vpop.sfrf %2896 }
 0xbb5   :  { %p3265_p9 = scmp.ne.s32.totalorder %s2897_s2, 0 }
 0xbb7   :  { %2901 = shalt.err (%p3265_p9)  }
 0xbb8   :  { %2903 = vsyncmov [#allocation5 + $0x1] }
 0xbbb   :  { %s2904_s11 = vpop.sfrf %2903 }
 0xbbc   :  { %p3266_p10 = scmp.ne.s32.totalorder %s2904_s11, 0 }
 0xbbe   :  { %2908 = shalt.err (%p3266_p10)  }
 0xbbf   :  { %2910 = vsyncmov [#allocation5 + $0x2] }
 0xbc2   :  { %s2911_s24 = vpop.sfrf %2910 }
 0xbc3   :  { %p3267_p11 = scmp.ne.s32.totalorder %s2911_s24, 0 }
 0xbc5   :  { %2915 = shalt.err (%p3267_p11)  }
 0xbc6   :  { %2917 = vsyncmov [#allocation5 + $0x3] }
 0xbc9   :  { %s2918_s29 = vpop.sfrf %2917 }
 0xbca   :  { %p3268_p12 = scmp.ne.s32.totalorder %s2918_s29, 0 }
 0xbcc   :  { %2922 = shalt.err (%p3268_p12)  }
 0xbcd   :  { %2924 = vsyncmov [#allocation5 + $0x4] }
 0xbd0   :  { %s2925_s10 = vpop.sfrf %2924 }
 0xbd1   :  { %p3269_p13 = scmp.ne.s32.totalorder %s2925_s10, 0 }
 0xbd3   :  { %2929 = shalt.err (%p3269_p13)  }
 0xbd4   :  { %2931 = vsyncmov [#allocation5 + $0x5] }
 0xbd7   :  { %s2932_s19 = vpop.sfrf %2931 }
 0xbd8   :  { %p3270_p0 = scmp.ne.s32.totalorder %s2932_s19, 0 }
 0xbda   :  { %2936 = shalt.err (%p3270_p0)  }
 0xbdb   :  { %2938 = vsyncmov [#allocation5 + $0x6] }
 0xbde   :  { %s2939_s18 = vpop.sfrf %2938 }
 0xbdf   :  { %p3271_p1 = scmp.ne.s32.totalorder %s2939_s18, 0 }
 0xbe1   :  { %2943 = shalt.err (%p3271_p1)  }
 0xbe2   :  { %2945 = vsyncmov [#allocation5 + $0x7] }
 0xbe5   :  { %s2946_s0 = vpop.sfrf %2945 }
 0xbe6   :  { %p3272_p2 = scmp.ne.s32.totalorder %s2946_s0, 0 }
 0xbe8   :  { %2950 = shalt.err (%p3272_p2)  }
 0xbe9   :  { %2952 = vsyncmov [#allocation5 + $0x8] }
 0xbec   :  { %s2953_s17 = vpop.sfrf %2952 }
 0xbed   :  { %p3273_p3 = scmp.ne.s32.totalorder %s2953_s17, 0 }
 0xbef   :  { %2957 = shalt.err (%p3273_p3)  }
 0xbf0   :  { %2959 = vsyncmov [#allocation5 + $0x9] }
 0xbf3   :  { %s2960_s4 = vpop.sfrf %2959 }
 0xbf4   :  { %p3274_p4 = scmp.ne.s32.totalorder %s2960_s4, 0 }
 0xbf6   :  { %2964 = shalt.err (%p3274_p4)  }
 0xbf7   :  { %2966 = vsyncmov [#allocation5 + $0xa] }
 0xbfa   :  { %s2967_s5 = vpop.sfrf %2966 }
 0xbfb   :  { %p3275_p5 = scmp.ne.s32.totalorder %s2967_s5, 0 }
 0xbfd   :  { %2971 = shalt.err (%p3275_p5)  }
 0xbfe   :  { %2973 = vsyncmov [#allocation5 + $0xb] }
 0xc01   :  { %s2974_s6 = vpop.sfrf %2973 }
 0xc02   :  { %p3276_p6 = scmp.ne.s32.totalorder %s2974_s6, 0 }
 0xc04   :  { %2978 = shalt.err (%p3276_p6)  }
 0xc05   :  { %2980 = vsyncmov [#allocation5 + $0xc] }
 0xc08   :  { %s2981_s20 = vpop.sfrf %2980 }
 0xc09   :  { %p3277_p7 = scmp.ne.s32.totalorder %s2981_s20, 0 }
 0xc0b   :  { %2985 = shalt.err (%p3277_p7)  }
 0xc0c   :  { %2987 = vsyncmov [#allocation5 + $0xd] }
 0xc0f   :  { %s2988_s27 = vpop.sfrf %2987 }
 0xc10   :  { %p3278_p8 = scmp.ne.s32.totalorder %s2988_s27, 0 }
 0xc12   :  { %2992 = shalt.err (%p3278_p8)  }
 0xc13   :  { %2994 = vsyncmov [#allocation5 + $0xe] }
 0xc16   :  { %s2995_s3 = vpop.sfrf %2994 }
 0xc17   :  { %p3279_p9 = scmp.ne.s32.totalorder %s2995_s3, 0 }
 0xc19   :  { %2999 = shalt.err (%p3279_p9)  }
 0xc1a   :  { %3001 = vsyncmov [#allocation5 + $0xf] }
 0xc1d   :  { %s3002_s23 = vpop.sfrf %3001 }
 0xc1e   :  { %p3280_p10 = scmp.ne.s32.totalorder %s3002_s23, 0 }
 0xc20   :  { %3006 = shalt.err (%p3280_p10)  }
 0xc21   :  { %3007 = vsyncmov [#allocation6] }
 0xc24   :  { %s3008_s28 = vpop.sfrf %3007 }
 0xc25   :  { %p3281_p11 = scmp.ne.s32.totalorder %s3008_s28, 0 }
 0xc27   :  { %3012 = shalt.err (%p3281_p11)  }
 0xc28   :  { %3014 = vsyncmov [#allocation6 + $0x1] }
 0xc2b   :  { %s3015_s1 = vpop.sfrf %3014 }
 0xc2c   :  { %p3282_p12 = scmp.ne.s32.totalorder %s3015_s1, 0 }
 0xc2e   :  { %3019 = shalt.err (%p3282_p12)  }

</bundles_post_ra>
